<compile_context>
chip_gen: v6e
topology: v6e:2x2x1
jax: 0.10.0
libtpu: 0.0.40
codegen_flags: <defaults>
</compile_context>

<pallas_src>
import jax
import jax.numpy as jnp
from jax.experimental import pallas as pl
from jax.experimental.pallas import tpu as pltpu


# MXU input dtype.  Set to jnp.bfloat16 on v6e/v7x for MXU-native inputs (review
# item); kept f32 here so the strict f32 self-check tolerance holds.  Accumulation
# is always f32 via preferred_element_type.
MXU_IN_DTYPE = jnp.float32


def _mx(a):
    return a.astype(MXU_IN_DTYPE)


def _dot(a, b):
    return jnp.dot(_mx(a), _mx(b), preferred_element_type=jnp.float32)


# --------------------------- Pallas kernels ---------------------------------

def _in_proj_kernel(x_ref, w_ref, b_ref, o_ref):
    # x: (Cin, HW), w: (C, Cin), b: (C, 1) -> o: (C, HW)   (lane-dense output)
    o_ref[...] = (_dot(w_ref[...], x_ref[...]) + b_ref[...]).astype(o_ref.dtype)


def in_proj(x_cf, w_t, b_t):
    B, Cin, HW = x_cf.shape
    C = w_t.shape[0]
    return pl.pallas_call(
        _in_proj_kernel,
        out_shape=jax.ShapeDtypeStruct((B, C, HW), jnp.float32),
        grid_spec=pltpu.PrefetchScalarGridSpec(
            num_scalar_prefetch=0,
            grid=(B,),
            in_specs=[
                pl.BlockSpec((None, Cin, HW), lambda b: (b, 0, 0)),
                pl.BlockSpec((C, Cin), lambda b: (0, 0)),
                pl.BlockSpec((C, 1), lambda b: (0, 0)),
            ],
            out_specs=pl.BlockSpec((None, C, HW), lambda b: (b, 0, 0)),
        ),
        compiler_params=pltpu.CompilerParams(dimension_semantics=("parallel",)),
    )(x_cf, w_t, b_t)


def _specmix_kernel(xr_ref, xi_ref, wr_ref, wi_ref, or_ref, oi_ref):
    # All frequencies in this chunk at once: batched complex (B,I)@(I,O).
    xr, xi = xr_ref[...], xi_ref[...]
    wr, wi = wr_ref[...], wi_ref[...]

    def bdot(a, w):
        return jnp.einsum("pbi,pio->pbo", _mx(a), _mx(w),
                          preferred_element_type=jnp.float32)

    or_ref[...] = bdot(xr, wr) - bdot(xi, wi)
    oi_ref[...] = bdot(xr, wi) + bdot(xi, wr)


def specmix(xr, xi, wr, wi):
    """Per-frequency complex channel mixing, frequencies batched in-kernel.

    xr/xi: (P, B, I), wr/wi: (P, I, O) -> (P, B, O) real/imag.
    """
    P, B, I = xr.shape
    O = wr.shape[2]
    nc = 2 if P % 2 == 0 else 1     # >=2 parallel chunks so v7x megacore can split
    pc = P // nc
    spec_x = pl.BlockSpec((pc, B, I), lambda p: (p, 0, 0))
    spec_w = pl.BlockSpec((pc, I, O), lambda p: (p, 0, 0))
    spec_o = pl.BlockSpec((pc, B, O), lambda p: (p, 0, 0))
    return pl.pallas_call(
        _specmix_kernel,
        out_shape=(jax.ShapeDtypeStruct((P, B, O), jnp.float32),
                   jax.ShapeDtypeStruct((P, B, O), jnp.float32)),
        grid_spec=pltpu.PrefetchScalarGridSpec(
            num_scalar_prefetch=0,
            grid=(nc,),
            in_specs=[spec_x, spec_x, spec_w, spec_w],
            out_specs=(spec_o, spec_o),
        ),
        compiler_params=pltpu.CompilerParams(dimension_semantics=("parallel",)),
    )(xr, xi, wr, wi)


def _ff_resid_kernel(xf_ref, xc_ref, w0_ref, b0_ref, w1_ref, b1_ref, xn_ref):
    # Fused backcast FeedForward + residual: x_new = x - (W1 relu(W0 xf + b0) + b1).
    # The (Cf, HW) hidden lives only in VMEM/vregs.
    h = jnp.maximum(_dot(w0_ref[...], xf_ref[...]) + b0_ref[...], 0.0)
    bk = _dot(w1_ref[...], h) + b1_ref[...]
    xn_ref[...] = (xc_ref[...] - bk).astype(xn_ref.dtype)


def ff_resid(xf, xc, w0_t, b0_t, w1_t, b1_t):
    B, C, HW = xf.shape
    Cf = w0_t.shape[0]
    act = pl.BlockSpec((None, C, HW), lambda b: (b, 0, 0))
    return pl.pallas_call(
        _ff_resid_kernel,
        out_shape=jax.ShapeDtypeStruct((B, C, HW), jnp.float32),
        grid_spec=pltpu.PrefetchScalarGridSpec(
            num_scalar_prefetch=0,
            grid=(B,),
            in_specs=[
                act, act,
                pl.BlockSpec((Cf, C), lambda b: (0, 0)),
                pl.BlockSpec((Cf, 1), lambda b: (0, 0)),
                pl.BlockSpec((C, Cf), lambda b: (0, 0)),
                pl.BlockSpec((C, 1), lambda b: (0, 0)),
            ],
            out_specs=act,
        ),
        compiler_params=pltpu.CompilerParams(dimension_semantics=("parallel",)),
    )(xf, xc, w0_t, b0_t, w1_t, b1_t)


def _ff_film_head_kernel(xf_ref, w0_ref, b0_ref, w1_ref, b1_ref,
                         g_ref, be_ref, hw0_ref, hb0_ref, hw1_ref, hb1_ref,
                         o_ref):
    # Last layer: backcast FF -> FiLM -> output head, all resident in VMEM.
    h = jnp.maximum(_dot(w0_ref[...], xf_ref[...]) + b0_ref[...], 0.0)
    bk = _dot(w1_ref[...], h) + b1_ref[...]             # (C, HW)
    bf = g_ref[...] * bk + be_ref[...]                  # FiLM: gamma * b + beta
    h2 = _dot(hw0_ref[...], bf) + hb0_ref[...]          # (128, HW)
    o_ref[...] = (_dot(hw1_ref[...], h2) + hb1_ref[...]).astype(o_ref.dtype)


def ff_film_head(xf, w0_t, b0_t, w1_t, b1_t, gamma, beta,
                 hw0_t, hb0_t, hw1_t, hb1_t):
    B, C, HW = xf.shape
    Cf = w0_t.shape[0]
    H = hw0_t.shape[0]
    # gamma/beta/bias blocks are tiny constant-index VMEM blocks reused across
    # the 2-step batch grid; cheaper than an SMEM scalar re-broadcast here.
    return pl.pallas_call(
        _ff_film_head_kernel,
        out_shape=jax.ShapeDtypeStruct((B, 1, HW), jnp.float32),
        grid_spec=pltpu.PrefetchScalarGridSpec(
            num_scalar_prefetch=0,
            grid=(B,),
            in_specs=[
                pl.BlockSpec((None, C, HW), lambda b: (b, 0, 0)),
                pl.BlockSpec((Cf, C), lambda b: (0, 0)),
                pl.BlockSpec((Cf, 1), lambda b: (0, 0)),
                pl.BlockSpec((C, Cf), lambda b: (0, 0)),
                pl.BlockSpec((C, 1), lambda b: (0, 0)),
                pl.BlockSpec((None, C, 1), lambda b: (b, 0, 0)),
                pl.BlockSpec((None, 1, 1), lambda b: (b, 0, 0)),
                pl.BlockSpec((H, C), lambda b: (0, 0)),
                pl.BlockSpec((H, 1), lambda b: (0, 0)),
                pl.BlockSpec((1, H), lambda b: (0, 0)),
                pl.BlockSpec((1, 1), lambda b: (0, 0)),
            ],
            out_specs=pl.BlockSpec((None, 1, HW), lambda b: (b, 0, 0)),
        ),
        compiler_params=pltpu.CompilerParams(dimension_semantics=("parallel",)),
    )(xf, w0_t, b0_t, w1_t, b1_t, gamma, beta, hw0_t, hb0_t, hw1_t, hb1_t)


# --------------------------- model glue (plain JAX) --------------------------

def forward_fourier(x_bcf, wr, wi, modes, M, N):
    """SpectralConv2d.forward_fourier on channels-first (B, C, M*N) activations."""
    B, C, HW = x_bcf.shape
    # TODO(synk): FFT has no Pallas primitive on TPU; rfft2/irfft2 stay in jnp.fft.
    x_ft = jnp.fft.rfft2(x_bcf.reshape(B, C, M, N), s=(M, N), norm="ortho")
    lo = x_ft[:, :, :modes, :modes]
    hi = x_ft[:, :, M - modes:, :modes]
    P = 2 * modes * modes
    xb = jnp.transpose(jnp.stack([lo, hi], axis=0), (0, 3, 4, 1, 2)).reshape(P, B, C)
    o_r, o_i = specmix(jnp.real(xb), jnp.imag(xb), wr, wi)
    out = (o_r + 1j * o_i).reshape(2, modes, modes, B, C)
    out = jnp.transpose(out, (0, 3, 4, 1, 2))            # (2, B, C, modes, modes)
    Nf = N // 2 + 1
    pad = ((0, 0), (0, 0), (0, 0), (0, Nf - modes))
    mid = jnp.zeros((B, C, M - 2 * modes, Nf), jnp.complex64)
    # out_ft shape is (B, C, M, N//2+1), matching rfft2(s=(M, N)); built with
    # pad+concat rather than zeros().at[].set (review item).
    out_ft = jnp.concatenate([jnp.pad(out[0], pad), mid, jnp.pad(out[1], pad)],
                             axis=2)
    y = jnp.fft.irfft2(out_ft, s=(M, N), norm="ortho")   # (B, C, M, N)
    return y.reshape(B, C, HW)


def make_forward(config):
    modes = config["modes"]
    n_layers = config["n_layers"]
    start_film = config["start_layer_film"]
    width = config["width"]

    def forward(params, x, conditions):
        B, M, N, _ = x.shape
        assert M >= 2 * modes and N // 2 + 1 >= modes
        HW = M * N

        # FiLM conditioning MLP: (B,2)->(B,10)->(B,10)->(B, a*(1+width)).  Tiny,
        # so plain XLA (three Pallas launches of pure overhead otherwise).
        h = jnp.maximum(conditions @ params["cond_w0"] + params["cond_b0"][0], 0.0)
        h = jnp.maximum(h @ params["cond_w1"] + params["cond_b1"][0], 0.0)
        film = h @ params["cond_w2"] + params["cond_b2"][0]
        if n_layers > start_film:
            film = film.reshape(B, n_layers - start_film, 1 + width)

        # lift to channels-first (B, width, H*W); in_dropout p=0 -> identity
        x_cf = jnp.transpose(x, (0, 3, 1, 2)).reshape(B, -1, HW)
        xcur = in_proj(x_cf, params["in_proj_w_t"], params["in_proj_b_t"])

        # layers 0..L-2: spectral conv + fused (backcast FF + residual).
        # Their FiLM'd backcast is never used downstream, so it is not computed.
        for idx in range(n_layers - 1):
            lp = params["layers"][idx]
            xf = forward_fourier(xcur, lp["spec_wr"], lp["spec_wi"], modes, M, N)
            xcur = ff_resid(xf, xcur, lp["ff_w0_t"], lp["ff_b0_t"],
                            lp["ff_w1_t"], lp["ff_b1_t"])

        # last layer: spectral conv + fused (backcast FF + FiLM + output head)
        lp = params["layers"][n_layers - 1]
        xf = forward_fourier(xcur, lp["spec_wr"], lp["spec_wi"], modes, M, N)
        if n_layers - 1 >= start_film:
            ic = n_layers - 1 - start_film
            gamma = film[:, ic, 1:][:, :, None]          # (B, width, 1)
            beta = film[:, ic, 0][:, None, None]         # (B, 1, 1)
        else:
            gamma = jnp.ones((B, width, 1), jnp.float32)
            beta = jnp.zeros((B, 1, 1), jnp.float32)
        out = ff_film_head(xf, lp["ff_w0_t"], lp["ff_b0_t"],
                           lp["ff_w1_t"], lp["ff_b1_t"], gamma, beta,
                           params["out_w0_t"], params["out_b0_t"],
                           params["out_w1_t"], params["out_b1_t"])
        return out.reshape(B, M, N, 1)

    return forward


def reference_forward(params, x, conditions, config):
    """Pure-JAX (channels-last) reference mirroring the PyTorch forward."""
    modes = config["modes"]
    n_layers = config["n_layers"]
    start_film = config["start_layer_film"]
    width = config["width"]

    def lin(z, w, b, act=None):
        y = z @ w + b[0]
        return jnp.maximum(y, 0.0) if act == "relu" else y

    B, M, N, _ = x.shape
    h = lin(conditions, params["cond_w0"], params["cond_b0"], "relu")
    h = lin(h, params["cond_w1"], params["cond_b1"], "relu")
    film = lin(h, params["cond_w2"], params["cond_b2"]).reshape(
        B, n_layers - start_film, 1 + width)
    xcur = lin(x, params["in_proj_w"], params["in_proj_b"])
    b_last = None
    for idx in range(n_layers):
        lp = params["layers"][idx]
        x_cf = jnp.transpose(xcur, (0, 3, 1, 2))
        x_ft = jnp.fft.rfft2(x_cf, s=(M, N), norm="ortho")        # (B,C,M,N//2+1)
        out_ft = jnp.zeros((B, width, M, N // 2 + 1), jnp.complex64)
        out_ft = out_ft.at[:, :, :modes, :modes].set(
            jnp.einsum("bixy,ioxy->boxy", x_ft[:, :, :modes, :modes], lp["fw1"]))
        out_ft = out_ft.at[:, :, M - modes:, :modes].set(
            jnp.einsum("bixy,ioxy->boxy", x_ft[:, :, M - modes:, :modes], lp["fw2"]))
        xf = jnp.transpose(jnp.fft.irfft2(out_ft, s=(M, N), norm="ortho"),
                           (0, 2, 3, 1))
        hh = lin(xf, lp["ff_w0"], lp["ff_b0"], "relu")
        b = lin(hh, lp["ff_w1"], lp["ff_b1"])
        xcur = xcur - b
        if idx >= start_film:
            ic = idx - start_film
            beta = film[:, ic, 0][:, None, None, None]
            gamma = film[:, ic, 1:][:, None, None, :]
            b = gamma * b + beta
        b_last = b
    o = lin(b_last, params["out_w0"], params["out_b0"])
    return lin(o, params["out_w1"], params["out_b1"])


# --------------------------- deterministic params ----------------------------

def init_params(key, *, input_dim, width, modes, n_layers, condition_dim,
                start_layer_film, factor):
    keys = iter(jax.random.split(key, 128))

    def lin_init(din, dout):
        std = (2.0 / (din + dout)) ** 0.5
        w = jax.random.normal(next(keys), (din, dout), jnp.float32) * std
        b = jax.random.normal(next(keys), (1, dout), jnp.float32) * 0.01
        return w, b

    params = {}
    w, b = lin_init(input_dim, width)
    params["in_proj_w"], params["in_proj_b"] = w, b
    params["in_proj_w_t"], params["in_proj_b_t"] = w.T, b.T        # (C,Cin),(C,1)

    P = 2 * modes * modes
    layers = []
    fan = width * modes * modes * 2
    fstd = (2.0 / (fan + fan)) ** 0.5          # xavier_normal over (I,O,mx,my,2)
    for _ in range(n_layers):
        lp = {}
        fws = []
        for name in ("fw1", "fw2"):
            wr = jax.random.normal(next(keys), (width, width, modes, modes, 2),
                                   jnp.float32) * fstd
            cw = (wr[..., 0] + 1j * wr[..., 1]).astype(jnp.complex64)
            lp[name] = cw
            fws.append(cw)
        # kernel layout for specmix, precomputed once here (hoisted out of forward)
        wb = jnp.stack(fws, axis=0)                                # (2,I,O,mx,my)
        wb = jnp.transpose(wb, (0, 3, 4, 1, 2)).reshape(P, width, width)
        lp["spec_wr"] = jnp.real(wb)
        lp["spec_wi"] = jnp.imag(wb)
        w0, b0 = lin_init(width, width * factor)
        w1, b1 = lin_init(width * factor, width)
        lp["ff_w0"], lp["ff_b0"] = w0, b0
        lp["ff_w1"], lp["ff_b1"] = w1, b1
        lp["ff_w0_t"], lp["ff_b0_t"] = w0.T, b0.T                  # (Cf,C),(Cf,1)
        lp["ff_w1_t"], lp["ff_b1_t"] = w1.T, b1.T                  # (C,Cf),(C,1)
        layers.append(lp)
    params["layers"] = layers

    w0, b0 = lin_init(width, 128)
    w1, b1 = lin_init(128, 1)
    params["out_w0"], params["out_b0"] = w0, b0
    params["out_w1"], params["out_b1"] = w1, b1
    params["out_w0_t"], params["out_b0_t"] = w0.T, b0.T            # (128,C),(128,1)
    params["out_w1_t"], params["out_b1_t"] = w1.T, b1.T            # (1,128),(1,1)

    params["cond_w0"], params["cond_b0"] = lin_init(condition_dim, 10)
    params["cond_w1"], params["cond_b1"] = lin_init(10, 10)
    params["cond_w2"], params["cond_b2"] = lin_init(
        10, (n_layers - start_layer_film) * (1 + width))
    return params


# ------------------------------------ main -----------------------------------

if __name__ == "__main__":
    config = dict(modes=4, width=32, input_dim=12, n_layers=4,
                  condition_dim=2, start_layer_film=2, factor=2)

    key = jax.random.PRNGKey(0)
    kp, kx, kc = jax.random.split(key, 3)
    params = init_params(kp, **config)

    B, M, N = 2, 16, 16
    x = jax.random.normal(kx, (B, M, N, config["input_dim"]), jnp.float32)
    conditions = jax.random.normal(kc, (B, config["condition_dim"]), jnp.float32)

    forward = jax.jit(make_forward(config))
    out = jax.block_until_ready(forward(params, x, conditions))

    assert out.shape == (B, M, N, 1), out.shape
    assert bool(jnp.all(jnp.isfinite(out)))

    ref = reference_forward(params, x, conditions, config)
    max_err = float(jnp.max(jnp.abs(out - ref)))
    assert max_err < 5e-2, f"mismatch vs reference: {max_err}"

    print("KERNEL_OK")
</pallas_src>

<mosaic_0001>
module attributes {stable_mosaic.version = 11 : i64} {
  func.func @_in_proj_kernel(%arg0: i32, %arg1: memref<1x12x256xf32, #tpu.memory_space<vmem>>, %arg2: memref<32x12xf32, #tpu.memory_space<vmem>>, %arg3: memref<32x1xf32, #tpu.memory_space<vmem>>, %arg4: memref<1x32x256xf32, #tpu.memory_space<vmem>>) attributes {dimension_semantics = [#tpu.dimension_semantics<parallel>], iteration_bounds = array<i64: 2>, scalar_prefetch = 0 : i64, scratch_operands = 0 : i64, tpu.core_type = #tpu.core_type<tc>, window_params = [{transform_indices = @transform_0, window_bounds = array<i64: 1, 12, 256>}, {pipeline_mode = #tpu.pipeline_mode<synchronous>, transform_indices = @transform_1, window_bounds = array<i64: 32, 12>}, {pipeline_mode = #tpu.pipeline_mode<synchronous>, transform_indices = @transform_2, window_bounds = array<i64: 32, 1>}, {transform_indices = @transform_3, window_bounds = array<i64: 1, 32, 256>}]} {
    %c0 = arith.constant 0 : index
    %c0_0 = arith.constant 0 : index
    %0 = vector.load %arg2[%c0, %c0_0] : memref<32x12xf32, #tpu.memory_space<vmem>>, vector<32x12xf32>
    %c0_1 = arith.constant 0 : index
    %c0_2 = arith.constant 0 : index
    %c0_3 = arith.constant 0 : index
    %1 = vector.load %arg1[%c0_1, %c0_2, %c0_3] : memref<1x12x256xf32, #tpu.memory_space<vmem>>, vector<1x12x256xf32>
    %2 = vector.shape_cast %1 : vector<1x12x256xf32> to vector<12x256xf32>
    %cst = arith.constant dense<0.000000e+00> : vector<32x256xf32>
    %3 = tpu.matmul %0, %2, %cst {dimension_numbers = #tpu.dot_dimension_numbers<[1], [0], [0], [1], [0, 0, 1, 1], [], []>} : vector<32x12xf32>, vector<12x256xf32>, vector<32x256xf32> -> vector<32x256xf32>
    %c0_4 = arith.constant 0 : index
    %c0_5 = arith.constant 0 : index
    %4 = vector.load %arg3[%c0_4, %c0_5] : memref<32x1xf32, #tpu.memory_space<vmem>>, vector<32x1xf32>
    %5 = vector.broadcast %4 : vector<32x1xf32> to vector<32x256xf32>
    %6 = arith.addf %3, %5 : vector<32x256xf32>
    %c0_6 = arith.constant 0 : index
    %c0_7 = arith.constant 0 : index
    %c0_8 = arith.constant 0 : index
    %7 = vector.load %arg4[%c0_6, %c0_7, %c0_8] : memref<1x32x256xf32, #tpu.memory_space<vmem>>, vector<1x32x256xf32>
    %8 = vector.shape_cast %7 : vector<1x32x256xf32> to vector<32x256xf32>
    %9 = vector.shape_cast %6 : vector<32x256xf32> to vector<1x32x256xf32>
    tpu.vector_store %arg4[%c0_6, %c0_7, %c0_8], %9 {strides = array<i32>} : memref<1x32x256xf32, #tpu.memory_space<vmem>>, vector<1x32x256xf32>,
    return
  }
  func.func @transform_0(%arg0: i32) -> (i32, i32, i32) {
    %c0_i32 = arith.constant 0 : i32
    %c0_i32_0 = arith.constant 0 : i32
    %c0_i32_1 = arith.constant 0 : i32
    return %arg0, %c0_i32, %c0_i32_0 : i32, i32, i32
  }
  func.func @transform_1(%arg0: i32) -> (i32, i32) {
    %c0_i32 = arith.constant 0 : i32
    %c0_i32_0 = arith.constant 0 : i32
    %c0_i32_1 = arith.constant 0 : i32
    return %c0_i32, %c0_i32_0 : i32, i32
  }
  func.func @transform_2(%arg0: i32) -> (i32, i32) {
    %c0_i32 = arith.constant 0 : i32
    %c0_i32_0 = arith.constant 0 : i32
    %c0_i32_1 = arith.constant 0 : i32
    return %c0_i32, %c0_i32_0 : i32, i32
  }
  func.func @transform_3(%arg0: i32) -> (i32, i32, i32) {
    %c0_i32 = arith.constant 0 : i32
    %c0_i32_0 = arith.constant 0 : i32
    %c0_i32_1 = arith.constant 0 : i32
    return %arg0, %c0_i32, %c0_i32_0 : i32, i32, i32
  }
}

module attributes {stable_mosaic.version = 11 : i64} {
  func.func @_specmix_kernel(%arg0: i32, %arg1: memref<16x2x32xf32, #tpu.memory_space<vmem>>, %arg2: memref<16x2x32xf32, #tpu.memory_space<vmem>>, %arg3: memref<16x32x32xf32, #tpu.memory_space<vmem>>, %arg4: memref<16x32x32xf32, #tpu.memory_space<vmem>>, %arg5: memref<16x2x32xf32, #tpu.memory_space<vmem>>, %arg6: memref<16x2x32xf32, #tpu.memory_space<vmem>>) attributes {dimension_semantics = [#tpu.dimension_semantics<parallel>], iteration_bounds = array<i64: 2>, scalar_prefetch = 0 : i64, scratch_operands = 0 : i64, tpu.core_type = #tpu.core_type<tc>, window_params = [{transform_indices = @transform_0, window_bounds = array<i64: 16, 2, 32>}, {transform_indices = @transform_1, window_bounds = array<i64: 16, 2, 32>}, {transform_indices = @transform_2, window_bounds = array<i64: 16, 32, 32>}, {transform_indices = @transform_3, window_bounds = array<i64: 16, 32, 32>}, {transform_indices = @transform_4, window_bounds = array<i64: 16, 2, 32>}, {transform_indices = @transform_5, window_bounds = array<i64: 16, 2, 32>}]} {
    %c0 = arith.constant 0 : index
    %c0_0 = arith.constant 0 : index
    %c0_1 = arith.constant 0 : index
    %0 = vector.load %arg1[%c0, %c0_0, %c0_1] : memref<16x2x32xf32, #tpu.memory_space<vmem>>, vector<16x2x32xf32>
    %c0_2 = arith.constant 0 : index
    %c0_3 = arith.constant 0 : index
    %c0_4 = arith.constant 0 : index
    %1 = vector.load %arg2[%c0_2, %c0_3, %c0_4] : memref<16x2x32xf32, #tpu.memory_space<vmem>>, vector<16x2x32xf32>
    %c0_5 = arith.constant 0 : index
    %c0_6 = arith.constant 0 : index
    %c0_7 = arith.constant 0 : index
    %2 = vector.load %arg3[%c0_5, %c0_6, %c0_7] : memref<16x32x32xf32, #tpu.memory_space<vmem>>, vector<16x32x32xf32>
    %c0_8 = arith.constant 0 : index
    %c0_9 = arith.constant 0 : index
    %c0_10 = arith.constant 0 : index
    %3 = vector.load %arg4[%c0_8, %c0_9, %c0_10] : memref<16x32x32xf32, #tpu.memory_space<vmem>>, vector<16x32x32xf32>
    "tpu.trace_start"() <{level = 10 : i32, message = "pbi,pio->pbo"}> : () -> ()
    %cst = arith.constant dense<0.000000e+00> : vector<16x2x32xf32>
    %4 = tpu.matmul %0, %2, %cst {dimension_numbers = #tpu.dot_dimension_numbers<[2], [1], [1], [2], [0, 0, 0, 1, 1, 2], [0], [0]>} : vector<16x2x32xf32>, vector<16x32x32xf32>, vector<16x2x32xf32> -> vector<16x2x32xf32>
    %cst_11 = arith.constant dense<0.000000e+00> : vector<16x2x32xf32>
    %5 = tpu.matmul %1, %3, %cst_11 {dimension_numbers = #tpu.dot_dimension_numbers<[2], [1], [1], [2], [0, 0, 0, 1, 1, 2], [0], [0]>} : vector<16x2x32xf32>, vector<16x32x32xf32>, vector<16x2x32xf32> -> vector<16x2x32xf32>
    "tpu.trace_stop"() : () -> ()
    %6 = arith.subf %4, %5 : vector<16x2x32xf32>
    %c0_12 = arith.constant 0 : index
    %c0_13 = arith.constant 0 : index
    %c0_14 = arith.constant 0 : index
    %7 = vector.load %arg5[%c0_12, %c0_13, %c0_14] : memref<16x2x32xf32, #tpu.memory_space<vmem>>, vector<16x2x32xf32>
    tpu.vector_store %arg5[%c0_12, %c0_13, %c0_14], %6 {strides = array<i32>} : memref<16x2x32xf32, #tpu.memory_space<vmem>>, vector<16x2x32xf32>,
    "tpu.trace_start"() <{level = 10 : i32, message = "pbi,pio->pbo"}> : () -> ()
    %cst_15 = arith.constant dense<0.000000e+00> : vector<16x2x32xf32>
    %8 = tpu.matmul %0, %3, %cst_15 {dimension_numbers = #tpu.dot_dimension_numbers<[2], [1], [1], [2], [0, 0, 0, 1, 1, 2], [0], [0]>} : vector<16x2x32xf32>, vector<16x32x32xf32>, vector<16x2x32xf32> -> vector<16x2x32xf32>
    %cst_16 = arith.constant dense<0.000000e+00> : vector<16x2x32xf32>
    %9 = tpu.matmul %1, %2, %cst_16 {dimension_numbers = #tpu.dot_dimension_numbers<[2], [1], [1], [2], [0, 0, 0, 1, 1, 2], [0], [0]>} : vector<16x2x32xf32>, vector<16x32x32xf32>, vector<16x2x32xf32> -> vector<16x2x32xf32>
    "tpu.trace_stop"() : () -> ()
    %10 = arith.addf %8, %9 : vector<16x2x32xf32>
    %c0_17 = arith.constant 0 : index
    %c0_18 = arith.constant 0 : index
    %c0_19 = arith.constant 0 : index
    %11 = vector.load %arg6[%c0_17, %c0_18, %c0_19] : memref<16x2x32xf32, #tpu.memory_space<vmem>>, vector<16x2x32xf32>
    tpu.vector_store %arg6[%c0_17, %c0_18, %c0_19], %10 {strides = array<i32>} : memref<16x2x32xf32, #tpu.memory_space<vmem>>, vector<16x2x32xf32>,
    return
  }
  func.func @transform_0(%arg0: i32) -> (i32, i32, i32) {
    %c0_i32 = arith.constant 0 : i32
    %c0_i32_0 = arith.constant 0 : i32
    %c0_i32_1 = arith.constant 0 : i32
    return %arg0, %c0_i32, %c0_i32_0 : i32, i32, i32
  }
  func.func @transform_1(%arg0: i32) -> (i32, i32, i32) {
    %c0_i32 = arith.constant 0 : i32
    %c0_i32_0 = arith.constant 0 : i32
    %c0_i32_1 = arith.constant 0 : i32
    return %arg0, %c0_i32, %c0_i32_0 : i32, i32, i32
  }
  func.func @transform_2(%arg0: i32) -> (i32, i32, i32) {
    %c0_i32 = arith.constant 0 : i32
    %c0_i32_0 = arith.constant 0 : i32
    %c0_i32_1 = arith.constant 0 : i32
    return %arg0, %c0_i32, %c0_i32_0 : i32, i32, i32
  }
  func.func @transform_3(%arg0: i32) -> (i32, i32, i32) {
    %c0_i32 = arith.constant 0 : i32
    %c0_i32_0 = arith.constant 0 : i32
    %c0_i32_1 = arith.constant 0 : i32
    return %arg0, %c0_i32, %c0_i32_0 : i32, i32, i32
  }
  func.func @transform_4(%arg0: i32) -> (i32, i32, i32) {
    %c0_i32 = arith.constant 0 : i32
    %c0_i32_0 = arith.constant 0 : i32
    %c0_i32_1 = arith.constant 0 : i32
    return %arg0, %c0_i32, %c0_i32_0 : i32, i32, i32
  }
  func.func @transform_5(%arg0: i32) -> (i32, i32, i32) {
    %c0_i32 = arith.constant 0 : i32
    %c0_i32_0 = arith.constant 0 : i32
    %c0_i32_1 = arith.constant 0 : i32
    return %arg0, %c0_i32, %c0_i32_0 : i32, i32, i32
  }
}

module attributes {stable_mosaic.version = 11 : i64} {
  func.func @_ff_resid_kernel(%arg0: i32, %arg1: memref<1x32x256xf32, #tpu.memory_space<vmem>>, %arg2: memref<1x32x256xf32, #tpu.memory_space<vmem>>, %arg3: memref<64x32xf32, #tpu.memory_space<vmem>>, %arg4: memref<64x1xf32, #tpu.memory_space<vmem>>, %arg5: memref<32x64xf32, #tpu.memory_space<vmem>>, %arg6: memref<32x1xf32, #tpu.memory_space<vmem>>, %arg7: memref<1x32x256xf32, #tpu.memory_space<vmem>>) attributes {dimension_semantics = [#tpu.dimension_semantics<parallel>], iteration_bounds = array<i64: 2>, scalar_prefetch = 0 : i64, scratch_operands = 0 : i64, tpu.core_type = #tpu.core_type<tc>, window_params = [{transform_indices = @transform_0, window_bounds = array<i64: 1, 32, 256>}, {transform_indices = @transform_1, window_bounds = array<i64: 1, 32, 256>}, {pipeline_mode = #tpu.pipeline_mode<synchronous>, transform_indices = @transform_2, window_bounds = array<i64: 64, 32>}, {pipeline_mode = #tpu.pipeline_mode<synchronous>, transform_indices = @transform_3, window_bounds = array<i64: 64, 1>}, {pipeline_mode = #tpu.pipeline_mode<synchronous>, transform_indices = @transform_4, window_bounds = array<i64: 32, 64>}, {pipeline_mode = #tpu.pipeline_mode<synchronous>, transform_indices = @transform_5, window_bounds = array<i64: 32, 1>}, {transform_indices = @transform_6, window_bounds = array<i64: 1, 32, 256>}]} {
    %c0 = arith.constant 0 : index
    %c0_0 = arith.constant 0 : index
    %0 = vector.load %arg3[%c0, %c0_0] : memref<64x32xf32, #tpu.memory_space<vmem>>, vector<64x32xf32>
    %c0_1 = arith.constant 0 : index
    %c0_2 = arith.constant 0 : index
    %c0_3 = arith.constant 0 : index
    %1 = vector.load %arg1[%c0_1, %c0_2, %c0_3] : memref<1x32x256xf32, #tpu.memory_space<vmem>>, vector<1x32x256xf32>
    %2 = vector.shape_cast %1 : vector<1x32x256xf32> to vector<32x256xf32>
    %cst = arith.constant dense<0.000000e+00> : vector<64x256xf32>
    %3 = tpu.matmul %0, %2, %cst {dimension_numbers = #tpu.dot_dimension_numbers<[1], [0], [0], [1], [0, 0, 1, 1], [], []>} : vector<64x32xf32>, vector<32x256xf32>, vector<64x256xf32> -> vector<64x256xf32>
    %c0_4 = arith.constant 0 : index
    %c0_5 = arith.constant 0 : index
    %4 = vector.load %arg4[%c0_4, %c0_5] : memref<64x1xf32, #tpu.memory_space<vmem>>, vector<64x1xf32>
    %5 = vector.broadcast %4 : vector<64x1xf32> to vector<64x256xf32>
    %6 = arith.addf %3, %5 : vector<64x256xf32>
    %cst_6 = arith.constant 0.000000e+00 : f32
    %7 = vector.broadcast %cst_6 : f32 to vector<64x256xf32>
    %8 = arith.maximumf %6, %7 : vector<64x256xf32>
    %c0_7 = arith.constant 0 : index
    %c0_8 = arith.constant 0 : index
    %9 = vector.load %arg5[%c0_7, %c0_8] : memref<32x64xf32, #tpu.memory_space<vmem>>, vector<32x64xf32>
    %cst_9 = arith.constant dense<0.000000e+00> : vector<32x256xf32>
    %10 = tpu.matmul %9, %8, %cst_9 {dimension_numbers = #tpu.dot_dimension_numbers<[1], [0], [0], [1], [0, 0, 1, 1], [], []>} : vector<32x64xf32>, vector<64x256xf32>, vector<32x256xf32> -> vector<32x256xf32>
    %c0_10 = arith.constant 0 : index
    %c0_11 = arith.constant 0 : index
    %11 = vector.load %arg6[%c0_10, %c0_11] : memref<32x1xf32, #tpu.memory_space<vmem>>, vector<32x1xf32>
    %12 = vector.broadcast %11 : vector<32x1xf32> to vector<32x256xf32>
    %13 = arith.addf %10, %12 : vector<32x256xf32>
    %c0_12 = arith.constant 0 : index
    %c0_13 = arith.constant 0 : index
    %c0_14 = arith.constant 0 : index
    %14 = vector.load %arg2[%c0_12, %c0_13, %c0_14] : memref<1x32x256xf32, #tpu.memory_space<vmem>>, vector<1x32x256xf32>
    %15 = vector.shape_cast %14 : vector<1x32x256xf32> to vector<32x256xf32>
    %16 = arith.subf %15, %13 : vector<32x256xf32>
    %c0_15 = arith.constant 0 : index
    %c0_16 = arith.constant 0 : index
    %c0_17 = arith.constant 0 : index
    %17 = vector.load %arg7[%c0_15, %c0_16, %c0_17] : memref<1x32x256xf32, #tpu.memory_space<vmem>>, vector<1x32x256xf32>
    %18 = vector.shape_cast %17 : vector<1x32x256xf32> to vector<32x256xf32>
    %19 = vector.shape_cast %16 : vector<32x256xf32> to vector<1x32x256xf32>
    tpu.vector_store %arg7[%c0_15, %c0_16, %c0_17], %19 {strides = array<i32>} : memref<1x32x256xf32, #tpu.memory_space<vmem>>, vector<1x32x256xf32>,
    return
  }
  func.func @transform_0(%arg0: i32) -> (i32, i32, i32) {
    %c0_i32 = arith.constant 0 : i32
    %c0_i32_0 = arith.constant 0 : i32
    %c0_i32_1 = arith.constant 0 : i32
    return %arg0, %c0_i32, %c0_i32_0 : i32, i32, i32
  }
  func.func @transform_1(%arg0: i32) -> (i32, i32, i32) {
    %c0_i32 = arith.constant 0 : i32
    %c0_i32_0 = arith.constant 0 : i32
    %c0_i32_1 = arith.constant 0 : i32
    return %arg0, %c0_i32, %c0_i32_0 : i32, i32, i32
  }
  func.func @transform_2(%arg0: i32) -> (i32, i32) {
    %c0_i32 = arith.constant 0 : i32
    %c0_i32_0 = arith.constant 0 : i32
    %c0_i32_1 = arith.constant 0 : i32
    return %c0_i32, %c0_i32_0 : i32, i32
  }
  func.func @transform_3(%arg0: i32) -> (i32, i32) {
    %c0_i32 = arith.constant 0 : i32
    %c0_i32_0 = arith.constant 0 : i32
    %c0_i32_1 = arith.constant 0 : i32
    return %c0_i32, %c0_i32_0 : i32, i32
  }
  func.func @transform_4(%arg0: i32) -> (i32, i32) {
    %c0_i32 = arith.constant 0 : i32
    %c0_i32_0 = arith.constant 0 : i32
    %c0_i32_1 = arith.constant 0 : i32
    return %c0_i32, %c0_i32_0 : i32, i32
  }
  func.func @transform_5(%arg0: i32) -> (i32, i32) {
    %c0_i32 = arith.constant 0 : i32
    %c0_i32_0 = arith.constant 0 : i32
    %c0_i32_1 = arith.constant 0 : i32
    return %c0_i32, %c0_i32_0 : i32, i32
  }
  func.func @transform_6(%arg0: i32) -> (i32, i32, i32) {
    %c0_i32 = arith.constant 0 : i32
    %c0_i32_0 = arith.constant 0 : i32
    %c0_i32_1 = arith.constant 0 : i32
    return %arg0, %c0_i32, %c0_i32_0 : i32, i32, i32
  }
}

module attributes {stable_mosaic.version = 11 : i64} {
  func.func @_ff_film_head_kernel(%arg0: i32, %arg1: memref<1x32x256xf32, #tpu.memory_space<vmem>>, %arg2: memref<64x32xf32, #tpu.memory_space<vmem>>, %arg3: memref<64x1xf32, #tpu.memory_space<vmem>>, %arg4: memref<32x64xf32, #tpu.memory_space<vmem>>, %arg5: memref<32x1xf32, #tpu.memory_space<vmem>>, %arg6: memref<1x32x1xf32, #tpu.memory_space<vmem>>, %arg7: memref<1x1x1xf32, #tpu.memory_space<vmem>>, %arg8: memref<128x32xf32, #tpu.memory_space<vmem>>, %arg9: memref<128x1xf32, #tpu.memory_space<vmem>>, %arg10: memref<1x128xf32, #tpu.memory_space<vmem>>, %arg11: memref<1x1xf32, #tpu.memory_space<vmem>>, %arg12: memref<1x1x256xf32, #tpu.memory_space<vmem>>) attributes {dimension_semantics = [#tpu.dimension_semantics<parallel>], iteration_bounds = array<i64: 2>, scalar_prefetch = 0 : i64, scratch_operands = 0 : i64, tpu.core_type = #tpu.core_type<tc>, window_params = [{transform_indices = @transform_0, window_bounds = array<i64: 1, 32, 256>}, {pipeline_mode = #tpu.pipeline_mode<synchronous>, transform_indices = @transform_1, window_bounds = array<i64: 64, 32>}, {pipeline_mode = #tpu.pipeline_mode<synchronous>, transform_indices = @transform_2, window_bounds = array<i64: 64, 1>}, {pipeline_mode = #tpu.pipeline_mode<synchronous>, transform_indices = @transform_3, window_bounds = array<i64: 32, 64>}, {pipeline_mode = #tpu.pipeline_mode<synchronous>, transform_indices = @transform_4, window_bounds = array<i64: 32, 1>}, {transform_indices = @transform_5, window_bounds = array<i64: 1, 32, 1>}, {transform_indices = @transform_6, window_bounds = array<i64: 1, 1, 1>}, {pipeline_mode = #tpu.pipeline_mode<synchronous>, transform_indices = @transform_7, window_bounds = array<i64: 128, 32>}, {pipeline_mode = #tpu.pipeline_mode<synchronous>, transform_indices = @transform_8, window_bounds = array<i64: 128, 1>}, {pipeline_mode = #tpu.pipeline_mode<synchronous>, transform_indices = @transform_9, window_bounds = array<i64: 1, 128>}, {pipeline_mode = #tpu.pipeline_mode<synchronous>, transform_indices = @transform_10, window_bounds = array<i64: 1, 1>}, {transform_indices = @transform_11, window_bounds = array<i64: 1, 1, 256>}]} {
    %c0 = arith.constant 0 : index
    %c0_0 = arith.constant 0 : index
    %0 = vector.load %arg2[%c0, %c0_0] : memref<64x32xf32, #tpu.memory_space<vmem>>, vector<64x32xf32>
    %c0_1 = arith.constant 0 : index
    %c0_2 = arith.constant 0 : index
    %c0_3 = arith.constant 0 : index
    %1 = vector.load %arg1[%c0_1, %c0_2, %c0_3] : memref<1x32x256xf32, #tpu.memory_space<vmem>>, vector<1x32x256xf32>
    %2 = vector.shape_cast %1 : vector<1x32x256xf32> to vector<32x256xf32>
    %cst = arith.constant dense<0.000000e+00> : vector<64x256xf32>
    %3 = tpu.matmul %0, %2, %cst {dimension_numbers = #tpu.dot_dimension_numbers<[1], [0], [0], [1], [0, 0, 1, 1], [], []>} : vector<64x32xf32>, vector<32x256xf32>, vector<64x256xf32> -> vector<64x256xf32>
    %c0_4 = arith.constant 0 : index
    %c0_5 = arith.constant 0 : index
    %4 = vector.load %arg3[%c0_4, %c0_5] : memref<64x1xf32, #tpu.memory_space<vmem>>, vector<64x1xf32>
    %5 = vector.broadcast %4 : vector<64x1xf32> to vector<64x256xf32>
    %6 = arith.addf %3, %5 : vector<64x256xf32>
    %cst_6 = arith.constant 0.000000e+00 : f32
    %7 = vector.broadcast %cst_6 : f32 to vector<64x256xf32>
    %8 = arith.maximumf %6, %7 : vector<64x256xf32>
    %c0_7 = arith.constant 0 : index
    %c0_8 = arith.constant 0 : index
    %9 = vector.load %arg4[%c0_7, %c0_8] : memref<32x64xf32, #tpu.memory_space<vmem>>, vector<32x64xf32>
    %cst_9 = arith.constant dense<0.000000e+00> : vector<32x256xf32>
    %10 = tpu.matmul %9, %8, %cst_9 {dimension_numbers = #tpu.dot_dimension_numbers<[1], [0], [0], [1], [0, 0, 1, 1], [], []>} : vector<32x64xf32>, vector<64x256xf32>, vector<32x256xf32> -> vector<32x256xf32>
    %c0_10 = arith.constant 0 : index
    %c0_11 = arith.constant 0 : index
    %11 = vector.load %arg5[%c0_10, %c0_11] : memref<32x1xf32, #tpu.memory_space<vmem>>, vector<32x1xf32>
    %12 = vector.broadcast %11 : vector<32x1xf32> to vector<32x256xf32>
    %13 = arith.addf %10, %12 : vector<32x256xf32>
    %c0_12 = arith.constant 0 : index
    %c0_13 = arith.constant 0 : index
    %c0_14 = arith.constant 0 : index
    %14 = vector.load %arg6[%c0_12, %c0_13, %c0_14] : memref<1x32x1xf32, #tpu.memory_space<vmem>>, vector<1x32x1xf32>
    %15 = vector.shape_cast %14 : vector<1x32x1xf32> to vector<32x1xf32>
    %16 = vector.broadcast %15 : vector<32x1xf32> to vector<32x256xf32>
    %17 = arith.mulf %16, %13 : vector<32x256xf32>
    %c0_15 = arith.constant 0 : index
    %c0_16 = arith.constant 0 : index
    %c0_17 = arith.constant 0 : index
    %18 = vector.load %arg7[%c0_15, %c0_16, %c0_17] : memref<1x1x1xf32, #tpu.memory_space<vmem>>, vector<1x1x1xf32>
    %19 = vector.shape_cast %18 : vector<1x1x1xf32> to vector<1x1xf32>
    %20 = vector.broadcast %19 : vector<1x1xf32> to vector<32x256xf32>
    %21 = arith.addf %17, %20 : vector<32x256xf32>
    %c0_18 = arith.constant 0 : index
    %c0_19 = arith.constant 0 : index
    %22 = vector.load %arg8[%c0_18, %c0_19] : memref<128x32xf32, #tpu.memory_space<vmem>>, vector<128x32xf32>
    %cst_20 = arith.constant dense<0.000000e+00> : vector<128x256xf32>
    %23 = tpu.matmul %22, %21, %cst_20 {dimension_numbers = #tpu.dot_dimension_numbers<[1], [0], [0], [1], [0, 0, 1, 1], [], []>} : vector<128x32xf32>, vector<32x256xf32>, vector<128x256xf32> -> vector<128x256xf32>
    %c0_21 = arith.constant 0 : index
    %c0_22 = arith.constant 0 : index
    %24 = vector.load %arg9[%c0_21, %c0_22] : memref<128x1xf32, #tpu.memory_space<vmem>>, vector<128x1xf32>
    %25 = vector.broadcast %24 : vector<128x1xf32> to vector<128x256xf32>
    %26 = arith.addf %23, %25 : vector<128x256xf32>
    %c0_23 = arith.constant 0 : index
    %c0_24 = arith.constant 0 : index
    %27 = vector.load %arg10[%c0_23, %c0_24] : memref<1x128xf32, #tpu.memory_space<vmem>>, vector<1x128xf32>
    %cst_25 = arith.constant dense<0.000000e+00> : vector<1x256xf32>
    %28 = tpu.matmul %27, %26, %cst_25 {dimension_numbers = #tpu.dot_dimension_numbers<[1], [0], [0], [1], [0, 0, 1, 1], [], []>} : vector<1x128xf32>, vector<128x256xf32>, vector<1x256xf32> -> vector<1x256xf32>
    %c0_26 = arith.constant 0 : index
    %c0_27 = arith.constant 0 : index
    %29 = vector.load %arg11[%c0_26, %c0_27] : memref<1x1xf32, #tpu.memory_space<vmem>>, vector<1x1xf32>
    %30 = vector.broadcast %29 : vector<1x1xf32> to vector<1x256xf32>
    %31 = arith.addf %28, %30 : vector<1x256xf32>
    %c0_28 = arith.constant 0 : index
    %c0_29 = arith.constant 0 : index
    %c0_30 = arith.constant 0 : index
    %32 = vector.load %arg12[%c0_28, %c0_29, %c0_30] : memref<1x1x256xf32, #tpu.memory_space<vmem>>, vector<1x1x256xf32>
    %33 = vector.shape_cast %32 : vector<1x1x256xf32> to vector<1x256xf32>
    %34 = vector.shape_cast %31 : vector<1x256xf32> to vector<1x1x256xf32>
    tpu.vector_store %arg12[%c0_28, %c0_29, %c0_30], %34 {strides = array<i32>} : memref<1x1x256xf32, #tpu.memory_space<vmem>>, vector<1x1x256xf32>,
    return
  }
  func.func @transform_0(%arg0: i32) -> (i32, i32, i32) {
    %c0_i32 = arith.constant 0 : i32
    %c0_i32_0 = arith.constant 0 : i32
    %c0_i32_1 = arith.constant 0 : i32
    return %arg0, %c0_i32, %c0_i32_0 : i32, i32, i32
  }
  func.func @transform_1(%arg0: i32) -> (i32, i32) {
    %c0_i32 = arith.constant 0 : i32
    %c0_i32_0 = arith.constant 0 : i32
    %c0_i32_1 = arith.constant 0 : i32
    return %c0_i32, %c0_i32_0 : i32, i32
  }
  func.func @transform_2(%arg0: i32) -> (i32, i32) {
    %c0_i32 = arith.constant 0 : i32
    %c0_i32_0 = arith.constant 0 : i32
    %c0_i32_1 = arith.constant 0 : i32
    return %c0_i32, %c0_i32_0 : i32, i32
  }
  func.func @transform_3(%arg0: i32) -> (i32, i32) {
    %c0_i32 = arith.constant 0 : i32
    %c0_i32_0 = arith.constant 0 : i32
    %c0_i32_1 = arith.constant 0 : i32
    return %c0_i32, %c0_i32_0 : i32, i32
  }
  func.func @transform_4(%arg0: i32) -> (i32, i32) {
    %c0_i32 = arith.constant 0 : i32
    %c0_i32_0 = arith.constant 0 : i32
    %c0_i32_1 = arith.constant 0 : i32
    return %c0_i32, %c0_i32_0 : i32, i32
  }
  func.func @transform_5(%arg0: i32) -> (i32, i32, i32) {
    %c0_i32 = arith.constant 0 : i32
    %c0_i32_0 = arith.constant 0 : i32
    %c0_i32_1 = arith.constant 0 : i32
    return %arg0, %c0_i32, %c0_i32_0 : i32, i32, i32
  }
  func.func @transform_6(%arg0: i32) -> (i32, i32, i32) {
    %c0_i32 = arith.constant 0 : i32
    %c0_i32_0 = arith.constant 0 : i32
    %c0_i32_1 = arith.constant 0 : i32
    return %arg0, %c0_i32, %c0_i32_0 : i32, i32, i32
  }
  func.func @transform_7(%arg0: i32) -> (i32, i32) {
    %c0_i32 = arith.constant 0 : i32
    %c0_i32_0 = arith.constant 0 : i32
    %c0_i32_1 = arith.constant 0 : i32
    return %c0_i32, %c0_i32_0 : i32, i32
  }
  func.func @transform_8(%arg0: i32) -> (i32, i32) {
    %c0_i32 = arith.constant 0 : i32
    %c0_i32_0 = arith.constant 0 : i32
    %c0_i32_1 = arith.constant 0 : i32
    return %c0_i32, %c0_i32_0 : i32, i32
  }
  func.func @transform_9(%arg0: i32) -> (i32, i32) {
    %c0_i32 = arith.constant 0 : i32
    %c0_i32_0 = arith.constant 0 : i32
    %c0_i32_1 = arith.constant 0 : i32
    return %c0_i32, %c0_i32_0 : i32, i32
  }
  func.func @transform_10(%arg0: i32) -> (i32, i32) {
    %c0_i32 = arith.constant 0 : i32
    %c0_i32_0 = arith.constant 0 : i32
    %c0_i32_1 = arith.constant 0 : i32
    return %c0_i32, %c0_i32_0 : i32, i32
  }
  func.func @transform_11(%arg0: i32) -> (i32, i32, i32) {
    %c0_i32 = arith.constant 0 : i32
    %c0_i32_0 = arith.constant 0 : i32
    %c0_i32_1 = arith.constant 0 : i32
    return %arg0, %c0_i32, %c0_i32_0 : i32, i32, i32
  }
}

</mosaic_0001>

<bundles_post_ra>
// kernel: forward.9
= control target key start
LH: loop header
LB: loop body
LE: loop exit
PB: predicated region body
PF: predicated region fallthrough
CT: control target
= control target key end

     0   :  { %s440_s12 = smov 0   ;;  %s489_s0 = inlined_call_operand.vmem [shape: f32[2,12,256], index: 0, kind: input, shape index: {}]   ;;  %s490_s1 = inlined_call_operand.vmem [shape: f32[32,12], index: 1, kind: input, shape index: {}]   ;;  %s491_s2 = inlined_call_operand.vmem [shape: f32[32,1], index: 2, kind: input, shape index: {}]   ;;  %s492_s3 = inlined_call_operand.vmem [shape: f32[2,32,256], index: 3, kind: output, shape index: {}]  }
   0x1 LB: > { %s375_s13 = sadd.s32 4294967295, %s416_s12   ;;  %p379_p0 = scmp.ge.s32.totalorder %s416_s12, 1  ;;  %s416_s12 = sphi %s440_s12, %s13_s12  }
   0x2   : > { %p137_p1 = scmp.lt.s32.totalorder %s416_s12, 3 }
   0x4   : > { %p138_p2 = pnand %p379_p0, %p137_p1 }
   0x5   : > { %p161_p3 = scmp.lt.s32.totalorder (!%p138_p2), %s375_s13, 1 }
   0x6   : > { %141 = sbr.rel (%p138_p2) target bundleno = 221 (0xdd), region = 32 }
   0xb   : > { %v418_v0 = vmov 0.0   ;;  %v181_v1 = vld [vmem:[%s491_s2 + $0x10] sm:$0xff]  ;;  %s494_s13 = smov (!%p161_p3, %s375_s13), 1  ;;  %v419_v2 = vmov 0   ;;  %v179_v3 = vld [vmem:[%s491_s2] sm:$0xff]  ;;  %vm216_vm0 = vcmask 1043456  }
   0xc   : > { %287 = vmatprep.mubr.f32.mxu0 %v418_v0  ;;  %299 = vmatprep.mubr.f32.mxu1 %v418_v0  ;;  %s392_s18 = sshll.u32 %s494_s13, 5  ;;  %v171_v8 = vld [vmem:[%s490_s1] sm:$0xff]  ;;  %vm203_vm1 = vcmask 97280   ;;  %v173_v9 = vld [vmem:[%s490_s1 + $0x10] sm:$0xff]  ;;  %v182_v10 = vld [vmem:[%s491_s2 + $0x18] sm:$0xff]  ;;  %s393_s7 = sshll.u32 %s494_s13, 6 }
   0xd   : > { %409 = vset.pattern.permute.xlu1 %v419_v2  ;;  %408 = vset.pattern.permute.xlu0 %v419_v2  ;;  %s165_s21 = scalar_lea.vmem %s489_s0, %s392_s18  ;;  %v180_v11 = vld [vmem:[%s491_s2 + $0x8] sm:$0xff]  ;;  %v174_v13 = vld [vmem:[%s490_s1 + $0x18] sm:$0xff]  ;;  %s170_s10 = scalar_lea.vmem %s492_s3, %s393_s7 }
   0xe   : > { %195 = vperm.xlu1 %409, %v181_v1   ;;  %185 = vperm.xlu0 %408, %v179_v3   ;;  %v178_v4 = vld [vmem:[%s165_s21 + $0x18] sm:$0xf]  ;;  %v177_v5 = vld [vmem:[%s165_s21 + $0x10] sm:$0xf]  ;;  %v176_v6 = vld [vmem:[%s165_s21 + $0x8] sm:$0xff] }
   0xf   : > { %384 = vmatprep.subr.msk.mxu0 %vm216_vm0, %v178_v4  ;;  %394 = vmatprep.subr.msk.mxu1 %vm216_vm0, %v178_v4  ;;  %v175_v7 = vld [vmem:[%s165_s21] sm:$0xff]  ;;  %v172_v12 = vld [vmem:[%s490_s1 + $0x8] sm:$0xff] }
  0x10   : > { %385 = vmatpush1.msk.msra.mxu0 %vm216_vm0, %v177_v5  ;;  %396 = vmatpush1.msk.msra.mxu1 %vm216_vm0, %v177_v5 }
  0x11   : > { %253 = vmatprep.subr.mxu0 %v176_v6  ;;  %395 = vmatprep.subr.mxu1 %v176_v6 }
  0x12   : > { %254 = vmatpush1.msra.mxu0 %v175_v7  ;;  %397 = vmatpush1.msra.mxu1 %v175_v7 }
  0x13   : > { %386 = vmatmul.mubr.msk.f32.vlgmr.msra.gmra.mxu0 %vm203_vm1, %v171_v8  ;;  %388 = vmatmul.mubr.msk.f32.vlgmr.msra.gmra.mxu1 %vm203_vm1, %v173_v9 }
  0x14   : > { %293 = vmatprep.mubr.f32.mxu0 %v418_v0  ;;  %305 = vmatprep.mubr.f32.mxu1 %v418_v0 }
  0x15   : > { %200 = vperm.xlu1 %409, %v182_v10   ;;  %190 = vperm.xlu0 %408, %v180_v11  }
  0x17   : > { %387 = vmatmul.mubr.msk.f32.gmra.mxu0 %vm203_vm1, %v172_v12  ;;  %389 = vmatmul.mubr.msk.f32.gmra.mxu1 %vm203_vm1, %v174_v13 }
  0x89   : > { %v196_v14 = vpop.permute.xlu1 %195  ;;  %v186_v15 = vpop.permute.xlu0 %185 }
  0x90   : > { %v201_v22 = vpop.permute.xlu1 %200  ;;  %v191_v23 = vpop.permute.xlu0 %190 }
  0xd3   : > { %v289_v16 = vpop.f32.mrf.mxu0  ;;  %v301_v17 = vpop.f32.mrf.mxu1 }
  0xd4   : > { %v290_v18 = vadd.f32 %v289_v16, %v186_v15  ;;  %v302_v19 = vadd.f32 %v301_v17, %v196_v14 }
  0xd5   : > { %v291_v20 = vpop.f32.mrf.mxu0  ;;  %v303_v21 = vpop.f32.mrf.mxu1 }
  0xd6   : > { %312 = vst [vmem:[%s170_s10] sm:$0xff] %v290_v18  ;;  %316 = vst [vmem:[%s170_s10 + $0x20] sm:$0xff] %v302_v19  ;;  %v292_v24 = vadd.f32 %v291_v20, %v186_v15  ;;  %v304_v25 = vadd.f32 %v303_v21, %v196_v14 }
  0xd7   : > { %v295_v26 = vpop.f32.mrf.mxu0  ;;  %v307_v27 = vpop.f32.mrf.mxu1 }
  0xd8   : > { %313 = vst [vmem:[%s170_s10 + $0x8] sm:$0xff] %v292_v24  ;;  %317 = vst [vmem:[%s170_s10 + $0x28] sm:$0xff] %v304_v25  ;;  %v296_v28 = vadd.f32 %v295_v26, %v191_v23  ;;  %v308_v29 = vadd.f32 %v307_v27, %v201_v22 }
  0xd9   : > { %v297_v30 = vpop.f32.mrf.mxu0  ;;  %v309_v31 = vpop.f32.mrf.mxu1 }
  0xda   : > { %314 = vst [vmem:[%s170_s10 + $0x10] sm:$0xff] %v296_v28  ;;  %318 = vst [vmem:[%s170_s10 + $0x30] sm:$0xff] %v308_v29  ;;  %v298_v32 = vadd.f32 %v297_v30, %v191_v23  ;;  %v310_v33 = vadd.f32 %v309_v31, %v201_v22 }
  0xdc   : > { %315 = vst [vmem:[%s170_s10 + $0x18] sm:$0xff] %v298_v32  ;;  %319 = vst [vmem:[%s170_s10 + $0x38] sm:$0xff] %v310_v33 }
  0xdd PF: > { %s13_s12 = sadd.s32 1, %s416_s12  }
  0xde   : > { %p10_p4 = scmp.ge.s32.totalorder %s13_s12, 4  }
  0xe0   :  { %12 = sbr.rel (!%p10_p4) target bundleno = 1 (0x1), region = 62 }

// kernel: reverse.8
= control target key start
LH: loop header
LB: loop body
LE: loop exit
PB: predicated region body
PF: predicated region fallthrough
CT: control target
= control target key end

     0   :  { %s344_s0 = inlined_call_operand.vmem [shape: f32[2,32,16,7], index: 0, kind: input, shape index: {}]   ;;  %s345_s1 = inlined_call_operand.vmem [shape: f32[2,32,16,7], index: 1, kind: output, shape index: {}]  }
   0x1   :  { %v112_v0 = vld [vmem:[%s344_s0 + $0x60] sm:$0xff]  ;;  %v113_v1 = vld [vmem:[%s344_s0 + $0xd0] sm:$0xff]  ;;  %v138_v14 = vld [vmem:[%s344_s0 + $0x68] sm:$0xff] }
   0x2   :  { %v115_v2 = vld [vmem:[%s344_s0 + $0x50] sm:$0xff]  ;;  %4 = vst [vmem:[%s345_s1] sm:$0xff] %v112_v0  ;;  %114 = vst [vmem:[%s345_s1 + $0x70] sm:$0xff] %v113_v1  ;;  %v117_v3 = vld [vmem:[%s344_s0 + $0xc0] sm:$0xff] }
   0x3   :  { %116 = vst [vmem:[%s345_s1 + $0x10] sm:$0xff] %v115_v2  ;;  %v119_v4 = vld [vmem:[%s344_s0 + $0x40] sm:$0xff]  ;;  %v121_v5 = vld [vmem:[%s344_s0 + $0xb0] sm:$0xff]  ;;  %118 = vst [vmem:[%s345_s1 + $0x80] sm:$0xff] %v117_v3 }
   0x4   :  { %120 = vst [vmem:[%s345_s1 + $0x20] sm:$0xff] %v119_v4  ;;  %122 = vst [vmem:[%s345_s1 + $0x90] sm:$0xff] %v121_v5  ;;  %v123_v6 = vld [vmem:[%s344_s0 + $0x30] sm:$0xff]  ;;  %v125_v7 = vld [vmem:[%s344_s0 + $0xa0] sm:$0xff] }
   0x5   :  { %v127_v8 = vld [vmem:[%s344_s0 + $0x20] sm:$0xff]  ;;  %124 = vst [vmem:[%s345_s1 + $0x30] sm:$0xff] %v123_v6  ;;  %126 = vst [vmem:[%s345_s1 + $0xa0] sm:$0xff] %v125_v7  ;;  %v129_v9 = vld [vmem:[%s344_s0 + $0x90] sm:$0xff] }
   0x6   :  { %128 = vst [vmem:[%s345_s1 + $0x40] sm:$0xff] %v127_v8  ;;  %v131_v10 = vld [vmem:[%s344_s0 + $0x10] sm:$0xff]  ;;  %v133_v11 = vld [vmem:[%s344_s0 + $0x80] sm:$0xff]  ;;  %130 = vst [vmem:[%s345_s1 + $0xb0] sm:$0xff] %v129_v9 }
   0x7   :  { %132 = vst [vmem:[%s345_s1 + $0x50] sm:$0xff] %v131_v10  ;;  %134 = vst [vmem:[%s345_s1 + $0xc0] sm:$0xff] %v133_v11  ;;  %v49_v12 = vld [vmem:[%s344_s0] sm:$0xff]  ;;  %v136_v13 = vld [vmem:[%s344_s0 + $0x70] sm:$0xff] }
   0x8   :  { %135 = vst [vmem:[%s345_s1 + $0x60] sm:$0xff] %v49_v12  ;;  %137 = vst [vmem:[%s345_s1 + $0xd0] sm:$0xff] %v136_v13  ;;  %v140_v15 = vld [vmem:[%s344_s0 + $0xd8] sm:$0xff]  ;;  %v144_v17 = vld [vmem:[%s344_s0 + $0xc8] sm:$0xff] }
   0x9   :  { %139 = vst [vmem:[%s345_s1 + $0x8] sm:$0xff] %v138_v14  ;;  %v142_v16 = vld [vmem:[%s344_s0 + $0x58] sm:$0xff]  ;;  %141 = vst [vmem:[%s345_s1 + $0x78] sm:$0xff] %v140_v15  ;;  %v146_v18 = vld [vmem:[%s344_s0 + $0x48] sm:$0xff] }
   0xa   :  { %143 = vst [vmem:[%s345_s1 + $0x18] sm:$0xff] %v142_v16  ;;  %145 = vst [vmem:[%s345_s1 + $0x88] sm:$0xff] %v144_v17  ;;  %v148_v19 = vld [vmem:[%s344_s0 + $0xb8] sm:$0xff]  ;;  %v152_v21 = vld [vmem:[%s344_s0 + $0xa8] sm:$0xff] }
   0xb   :  { %v150_v20 = vld [vmem:[%s344_s0 + $0x38] sm:$0xff]  ;;  %147 = vst [vmem:[%s345_s1 + $0x28] sm:$0xff] %v146_v18  ;;  %149 = vst [vmem:[%s345_s1 + $0x98] sm:$0xff] %v148_v19  ;;  %v154_v22 = vld [vmem:[%s344_s0 + $0x28] sm:$0xff] }
   0xc   :  { %151 = vst [vmem:[%s345_s1 + $0x38] sm:$0xff] %v150_v20  ;;  %v156_v23 = vld [vmem:[%s344_s0 + $0x98] sm:$0xff]  ;;  %153 = vst [vmem:[%s345_s1 + $0xa8] sm:$0xff] %v152_v21  ;;  %v160_v25 = vld [vmem:[%s344_s0 + $0x88] sm:$0xff] }
   0xd   :  { %155 = vst [vmem:[%s345_s1 + $0x48] sm:$0xff] %v154_v22  ;;  %157 = vst [vmem:[%s345_s1 + $0xb8] sm:$0xff] %v156_v23  ;;  %v158_v24 = vld [vmem:[%s344_s0 + $0x18] sm:$0xff]  ;;  %v162_v26 = vld [vmem:[%s344_s0 + $0x8] sm:$0xff] }
   0xe   :  { %159 = vst [vmem:[%s345_s1 + $0x58] sm:$0xff] %v158_v24  ;;  %161 = vst [vmem:[%s345_s1 + $0xc8] sm:$0xff] %v160_v25  ;;  %v164_v27 = vld [vmem:[%s344_s0 + $0x78] sm:$0xff] }
   0xf   :  { %163 = vst [vmem:[%s345_s1 + $0x68] sm:$0xff] %v162_v26  ;;  %165 = vst [vmem:[%s345_s1 + $0xd8] sm:$0xff] %v164_v27 }

// kernel: forward.10
= control target key start
LH: loop header
LB: loop body
LE: loop exit
PB: predicated region body
PF: predicated region fallthrough
CT: control target
= control target key end

     0   :  { %s6403_s18 = smov 0   ;;  %s7776_s0 = inlined_call_operand.vmem [shape: f32[32,2,32], index: 0, kind: input, shape index: {}]   ;;  %s7777_s1 = inlined_call_operand.vmem [shape: f32[32,2,32], index: 1, kind: input, shape index: {}]   ;;  %s7778_s2 = inlined_call_operand.vmem [shape: f32[32,32,32], index: 2, kind: input, shape index: {}]   ;;  %s7779_s3 = inlined_call_operand.vmem [shape: f32[32,32,32], index: 3, kind: input, shape index: {}]   ;;  %s7780_s4 = inlined_call_operand.vmem [shape: f32[32,2,32], index: 4, kind: output, shape index: {0}]   ;;  %s7781_s5 = inlined_call_operand.vmem [shape: f32[32,2,32], index: 5, kind: output, shape index: {1}]  }
   0x1 LB: > { %s5226_s19 = sadd.s32 4294967295, %s6369_s18   ;;  %p5230_p0 = scmp.ge.s32.totalorder %s6369_s18, 1  ;;  %s6369_s18 = sphi %s6403_s18, %s16_s18  }
   0x2   : > { %p226_p1 = scmp.lt.s32.totalorder %s6369_s18, 3 }
   0x4   : > { %p227_p2 = pnand %p5230_p0, %p226_p1 }
   0x6   : > { %230 = sbr.rel (%p227_p2) target bundleno = 532 (0x214), region = 36 }
   0xb   : > { %s5231_s20 = sshll.u32 %s5226_s19, 4  ;;  %v6371_v0 = vmov 0.0   ;;  %vm6372_vm0 = vmmov 0   ;;  %vm474_vm1 = vcmask 261120   ;;  %vm2827_vm2 = vcmask 254976  }
   0xc   : > { %5633 = vmatprep.subr.mxu0 %v6371_v0  ;;  %5644 = vmatprep.subr.mxu1 %v6371_v0  ;;  %p277_p3 = scmp.lt.s32.totalorder %s5231_s20, 31 }
   0xd   : > { %5641 = vmatprep.mubr.msk.f32.mxu0 %vm6372_vm0, %v6371_v0  ;;  %5652 = vmatprep.mubr.msk.f32.mxu1 %vm6372_vm0, %v6371_v0 }
   0xe   : > { %s8026_s20 = smov (!%p277_p3, %s5231_s20), 31 }
   0xf   : > { %s5311_s21 = sshll.u32 %s8026_s20, 5  ;;  %s6428_s25 = sshll.u32 %s8026_s20, 1 }
  0x10   : > { %s6425_s24 = scalar_lea.vmem %s7778_s2, %s5311_s21  ;;  %s6456_s28 = scalar_lea.vmem %s7776_s0, %s6428_s25 }
  0x11   : > { %v6431_v1 = vld [vmem:[%s6425_s24 + $0x18] sm:$0xff]  ;;  %v6437_v3 = vld [vmem:[%s6425_s24 + $0x10] sm:$0xff]  ;;  %v6447_v5 = vld [vmem:[%s6425_s24 + $0x8] sm:$0xff]  ;;  %s6802_s6 = scalar_lea.vmem %s7779_s3, %s5311_s21  ;;  %s6851_s9 = scalar_lea.vmem %s7777_s1, %s6428_s25 }
  0x12   : > { %v6434_v2 = vld [vmem:[%s6425_s24 + $0x38] sm:$0xff]  ;;  %5634 = vmatpush3.msra.mxu0 %v6431_v1  ;;  %v6442_v4 = vld [vmem:[%s6425_s24 + $0x30] sm:$0xff]  ;;  %v6450_v6 = vld [vmem:[%s6425_s24 + $0x28] sm:$0xff]  ;;  %s7587_s12 = scalar_lea.vmem %s7780_s4, %s6428_s25  ;;  %s7737_s15 = scalar_lea.vmem %s7781_s5, %s6428_s25 }
  0x13   : > { %5645 = vmatpush3.msra.mxu1 %v6434_v2  ;;  %5635 = vmatprep.subr.mxu0 %v6371_v0  ;;  %v6463_v7 = vld [vmem:[%s6425_s24] sm:$0xff]  ;;  %v6477_v11 = vld [vmem:[%s6425_s24 + $0x58] sm:$0xff]  ;;  %v6487_v13 = vld [vmem:[%s6425_s24 + $0x50] sm:$0xff] }
  0x14   : > { %5646 = vmatprep.subr.mxu1 %v6371_v0  ;;  %5636 = vmatpush3.msra.mxu0 %v6437_v3  ;;  %v6466_v8 = vld [vmem:[%s6425_s24 + $0x20] sm:$0xff]  ;;  %v6480_v12 = vld [vmem:[%s6425_s24 + $0x78] sm:$0xff]  ;;  %v6490_v14 = vld [vmem:[%s6425_s24 + $0x70] sm:$0xff] }
  0x15   : > { %5647 = vmatpush3.msra.mxu1 %v6442_v4  ;;  %5637 = vmatprep.subr.mxu0 %v6371_v0  ;;  %v314_v9 = vld [vmem:[%s6456_s28] sm:$0x3]  ;;  %v315_v10 = vld [vmem:[%s6456_s28 + $0x2] sm:$0x3]  ;;  %v6497_v15 = vld [vmem:[%s6425_s24 + $0x48] sm:$0xff] }
  0x16   : > { %5648 = vmatprep.subr.mxu1 %v6371_v0  ;;  %5638 = vmatpush3.msra.mxu0 %v6447_v5  ;;  %v6500_v16 = vld [vmem:[%s6425_s24 + $0x68] sm:$0xff]  ;;  %v6507_v17 = vld [vmem:[%s6425_s24 + $0x40] sm:$0xff]  ;;  %v6525_v21 = vld [vmem:[%s6425_s24 + $0x98] sm:$0xff] }
  0x17   : > { %5649 = vmatpush3.msra.mxu1 %v6450_v6  ;;  %5639 = vmatprep.subr.mxu0 %v6371_v0  ;;  %v6512_v18 = vld [vmem:[%s6425_s24 + $0x60] sm:$0xff]  ;;  %v6528_v22 = vld [vmem:[%s6425_s24 + $0xb8] sm:$0xff]  ;;  %v6535_v23 = vld [vmem:[%s6425_s24 + $0x90] sm:$0xff] }
  0x18   : > { %5650 = vmatprep.subr.mxu1 %v6371_v0  ;;  %5640 = vmatpush3.msra.mxu0 %v6463_v7  ;;  %v316_v19 = vld [vmem:[%s6456_s28 + $0x4] sm:$0x3]  ;;  %v317_v20 = vld [vmem:[%s6456_s28 + $0x6] sm:$0x3]  ;;  %v6538_v24 = vld [vmem:[%s6425_s24 + $0xb0] sm:$0xff] }
  0x19   : > { %5651 = vmatpush3.msra.mxu1 %v6466_v8  ;;  %5642 = vmatmul.mubr.msk.f32.vlgmr.msra.gmra.mxu0 %vm474_vm1, %v314_v9  ;;  %v6545_v25 = vld [vmem:[%s6425_s24 + $0x88] sm:$0xff]  ;;  %v6555_v27 = vld [vmem:[%s6425_s24 + $0x80] sm:$0xff]  ;;  %v6573_v31 = vld [vmem:[%s6425_s24 + $0xd8] sm:$0xff] }
  0x1a   : > { %5653 = vmatmul.mubr.msk.f32.vlgmr.msra.gmra.mxu1 %vm474_vm1, %v315_v10  ;;  %5655 = vmatprep.subr.mxu0 %v6371_v0  ;;  %v6548_v26 = vld [vmem:[%s6425_s24 + $0xa8] sm:$0xff]  ;;  %v6560_v28 = vld [vmem:[%s6425_s24 + $0xa0] sm:$0xff]  ;;  %v6576_v32 = vld [vmem:[%s6425_s24 + $0xf8] sm:$0xff] }
  0x1b   : > { %5666 = vmatprep.subr.mxu1 %v6371_v0  ;;  %5656 = vmatpush3.msra.mxu0 %v6477_v11  ;;  %v318_v29 = vld [vmem:[%s6456_s28 + $0x8] sm:$0x3]  ;;  %v319_v30 = vld [vmem:[%s6456_s28 + $0xa] sm:$0x3]  ;;  %v6583_v33 = vld [vmem:[%s6425_s24 + $0xd0] sm:$0xff] }
  0x1c   : > { %5667 = vmatpush3.msra.mxu1 %v6480_v12  ;;  %5657 = vmatprep.subr.mxu0 %v6371_v0  ;;  %v6586_v34 = vld [vmem:[%s6425_s24 + $0xf0] sm:$0xff]  ;;  %v6593_v35 = vld [vmem:[%s6425_s24 + $0xc8] sm:$0xff]  ;;  %v6603_v37 = vld [vmem:[%s6425_s24 + $0xc0] sm:$0xff] }
  0x1d   : > { %5668 = vmatprep.subr.mxu1 %v6371_v0  ;;  %5658 = vmatpush3.msra.mxu0 %v6487_v13  ;;  %v6596_v36 = vld [vmem:[%s6425_s24 + $0xe8] sm:$0xff]  ;;  %v6608_v38 = vld [vmem:[%s6425_s24 + $0xe0] sm:$0xff]  ;;  %v6621_v41 = vld [vmem:[%s6425_s24 + $0x118] sm:$0xff] }
  0x1e   : > { %5669 = vmatpush3.msra.mxu1 %v6490_v14  ;;  %5659 = vmatprep.subr.mxu0 %v6371_v0  ;;  %v320_v39 = vld [vmem:[%s6456_s28 + $0xc] sm:$0x3]  ;;  %v321_v40 = vld [vmem:[%s6456_s28 + $0xe] sm:$0x3]  ;;  %v6624_v42 = vld [vmem:[%s6425_s24 + $0x138] sm:$0xff] }
  0x1f   : > { %5670 = vmatprep.subr.mxu1 %v6371_v0  ;;  %5660 = vmatpush3.msra.mxu0 %v6497_v15  ;;  %v6631_v43 = vld [vmem:[%s6425_s24 + $0x110] sm:$0xff]  ;;  %v6641_v45 = vld [vmem:[%s6425_s24 + $0x108] sm:$0xff]  ;;  %v6651_v47 = vld [vmem:[%s6425_s24 + $0x100] sm:$0xff] }
  0x20   : > { %5671 = vmatpush3.msra.mxu1 %v6500_v16  ;;  %5661 = vmatprep.subr.mxu0 %v6371_v0  ;;  %v6634_v44 = vld [vmem:[%s6425_s24 + $0x130] sm:$0xff]  ;;  %v6644_v46 = vld [vmem:[%s6425_s24 + $0x128] sm:$0xff]  ;;  %v6656_v48 = vld [vmem:[%s6425_s24 + $0x120] sm:$0xff] }
  0x21   : > { %5672 = vmatprep.subr.mxu1 %v6371_v0  ;;  %5662 = vmatpush3.msra.mxu0 %v6507_v17  ;;  %v322_v49 = vld [vmem:[%s6456_s28 + $0x10] sm:$0x3]  ;;  %v323_v50 = vld [vmem:[%s6456_s28 + $0x12] sm:$0x3]  ;;  %v6669_v51 = vld [vmem:[%s6425_s24 + $0x158] sm:$0xff] }
  0x22   : > { %5663 = vmatprep.mubr.msk.f32.mxu0 %vm6372_vm0, %v6371_v0  ;;  %5673 = vmatpush3.msra.mxu1 %v6512_v18  ;;  %v6672_v52 = vld [vmem:[%s6425_s24 + $0x178] sm:$0xff]  ;;  %v6679_v53 = vld [vmem:[%s6425_s24 + $0x150] sm:$0xff]  ;;  %v6689_v55 = vld [vmem:[%s6425_s24 + $0x148] sm:$0xff] }
  0x23   : > { %5674 = vmatprep.mubr.msk.f32.mxu1 %vm6372_vm0, %v6371_v0  ;;  %5664 = vmatmul.mubr.msk.f32.vlgmr.msra.gmra.mxu0 %vm474_vm1, %v316_v19  ;;  %v6682_v54 = vld [vmem:[%s6425_s24 + $0x170] sm:$0xff]  ;;  %v6692_v56 = vld [vmem:[%s6425_s24 + $0x168] sm:$0xff]  ;;  %v6699_v57 = vld [vmem:[%s6425_s24 + $0x140] sm:$0xff] }
  0x24   : > { %5675 = vmatmul.mubr.msk.f32.vlgmr.msra.gmra.mxu1 %vm474_vm1, %v317_v20  ;;  %5677 = vmatprep.subr.mxu0 %v6371_v0  ;;  %7863 = vst [vmem:[#allocation2_spill] sm:$0xff] %v6699_v57  ;;  %v6704_v58 = vld [vmem:[%s6425_s24 + $0x160] sm:$0xff]  ;;  %v324_v59 = vld [vmem:[%s6456_s28 + $0x14] sm:$0x3]  ;;  %v325_v60 = vld [vmem:[%s6456_s28 + $0x16] sm:$0x3] }
  0x25   : > { %5688 = vmatprep.subr.mxu1 %v6371_v0  ;;  %5678 = vmatpush3.msra.mxu0 %v6525_v21  ;;  %7864 = vst [vmem:[#allocation3_spill] sm:$0xff] %v6704_v58  ;;  %v6717_v61 = vld [vmem:[%s6425_s24 + $0x198] sm:$0xff]  ;;  %v6727_v63 = vld [vmem:[%s6425_s24 + $0x190] sm:$0xff]  ;;  %v6737_v10 = vld [vmem:[%s6425_s24 + $0x188] sm:$0xff] }
  0x26   : > { %5689 = vmatpush3.msra.mxu1 %v6528_v22  ;;  %5679 = vmatprep.subr.mxu0 %v6371_v0  ;;  %7865 = vst [vmem:[#allocation4_spill] sm:$0xff] %v6717_v61  ;;  %v6720_v62 = vld [vmem:[%s6425_s24 + $0x1b8] sm:$0xff]  ;;  %7867 = vst [vmem:[#allocation6_spill] sm:$0xff] %v6727_v63  ;;  %v6730_v9 = vld [vmem:[%s6425_s24 + $0x1b0] sm:$0xff] }
  0x27   : > { %5690 = vmatprep.subr.mxu1 %v6371_v0  ;;  %5680 = vmatpush3.msra.mxu0 %v6535_v23  ;;  %7866 = vst [vmem:[#allocation5_spill] sm:$0xff] %v6720_v62  ;;  %7868 = vst [vmem:[#allocation7_spill] sm:$0xff] %v6730_v9  ;;  %v6740_v19 = vld [vmem:[%s6425_s24 + $0x1a8] sm:$0xff]  ;;  %v6747_v20 = vld [vmem:[%s6425_s24 + $0x180] sm:$0xff] }
  0x28   : > { %5691 = vmatpush3.msra.mxu1 %v6538_v24  ;;  %5681 = vmatprep.subr.mxu0 %v6371_v0  ;;  %7869 = vst [vmem:[#allocation8_spill] sm:$0xff] %v6737_v10  ;;  %7870 = vst [vmem:[#allocation9_spill] sm:$0xff] %v6740_v19 }
  0x29   : > { %5692 = vmatprep.subr.mxu1 %v6371_v0  ;;  %5682 = vmatpush3.msra.mxu0 %v6545_v25  ;;  %7871 = vst [vmem:[#allocation10_spill] sm:$0xff] %v6747_v20 }
  0x2a   : > { %5693 = vmatpush3.msra.mxu1 %v6548_v26  ;;  %5683 = vmatprep.subr.mxu0 %v6371_v0 }
  0x2b   : > { %5694 = vmatprep.subr.mxu1 %v6371_v0  ;;  %5684 = vmatpush3.msra.mxu0 %v6555_v27 }
  0x2c   : > { %5685 = vmatprep.mubr.msk.f32.mxu0 %vm6372_vm0, %v6371_v0  ;;  %5695 = vmatpush3.msra.mxu1 %v6560_v28 }
  0x2d   : > { %5696 = vmatprep.mubr.msk.f32.mxu1 %vm6372_vm0, %v6371_v0  ;;  %5686 = vmatmul.mubr.msk.f32.vlgmr.msra.gmra.mxu0 %vm474_vm1, %v318_v29  ;;  %v6752_v29 = vld [vmem:[%s6425_s24 + $0x1a0] sm:$0xff] }
  0x2e   : > { %5697 = vmatmul.mubr.msk.f32.vlgmr.msra.gmra.mxu1 %vm474_vm1, %v319_v30  ;;  %5699 = vmatprep.subr.mxu0 %v6371_v0  ;;  %7872 = vst [vmem:[#allocation11_spill] sm:$0xff] %v6752_v29  ;;  %v326_v30 = vld [vmem:[%s6456_s28 + $0x18] sm:$0x3] }
  0x2f   : > { %5710 = vmatprep.subr.mxu1 %v6371_v0  ;;  %5700 = vmatpush3.msra.mxu0 %v6573_v31 }
  0x30   : > { %5711 = vmatpush3.msra.mxu1 %v6576_v32  ;;  %5701 = vmatprep.subr.mxu0 %v6371_v0 }
  0x31   : > { %5712 = vmatprep.subr.mxu1 %v6371_v0  ;;  %5702 = vmatpush3.msra.mxu0 %v6583_v33 }
  0x32   : > { %5713 = vmatpush3.msra.mxu1 %v6586_v34  ;;  %5703 = vmatprep.subr.mxu0 %v6371_v0 }
  0x33   : > { %5714 = vmatprep.subr.mxu1 %v6371_v0  ;;  %5704 = vmatpush3.msra.mxu0 %v6593_v35 }
  0x34   : > { %5715 = vmatpush3.msra.mxu1 %v6596_v36  ;;  %5705 = vmatprep.subr.mxu0 %v6371_v0 }
  0x35   : > { %5716 = vmatprep.subr.mxu1 %v6371_v0  ;;  %5706 = vmatpush3.msra.mxu0 %v6603_v37 }
  0x36   : > { %5707 = vmatprep.mubr.msk.f32.mxu0 %vm6372_vm0, %v6371_v0  ;;  %5717 = vmatpush3.msra.mxu1 %v6608_v38 }
  0x37   : > { %5718 = vmatprep.mubr.msk.f32.mxu1 %vm6372_vm0, %v6371_v0  ;;  %5708 = vmatmul.mubr.msk.f32.vlgmr.msra.gmra.mxu0 %vm474_vm1, %v320_v39  ;;  %v327_v39 = vld [vmem:[%s6456_s28 + $0x1a] sm:$0x3] }
  0x38   : > { %5719 = vmatmul.mubr.msk.f32.vlgmr.msra.gmra.mxu1 %vm474_vm1, %v321_v40  ;;  %5721 = vmatprep.subr.mxu0 %v6371_v0  ;;  %v6765_v40 = vld [vmem:[%s6425_s24 + $0x1d8] sm:$0xff] }
  0x39   : > { %5732 = vmatprep.subr.mxu1 %v6371_v0  ;;  %5722 = vmatpush3.msra.mxu0 %v6621_v41  ;;  %7873 = vst [vmem:[#allocation12_spill] sm:$0xff] %v6765_v40 }
  0x3a   : > { %5733 = vmatpush3.msra.mxu1 %v6624_v42  ;;  %5723 = vmatprep.subr.mxu0 %v6371_v0 }
  0x3b   : > { %5734 = vmatprep.subr.mxu1 %v6371_v0  ;;  %5724 = vmatpush3.msra.mxu0 %v6631_v43 }
  0x3c   : > { %5735 = vmatpush3.msra.mxu1 %v6634_v44  ;;  %5725 = vmatprep.subr.mxu0 %v6371_v0 }
  0x3d   : > { %5736 = vmatprep.subr.mxu1 %v6371_v0  ;;  %5726 = vmatpush3.msra.mxu0 %v6641_v45 }
  0x3e   : > { %5737 = vmatpush3.msra.mxu1 %v6644_v46  ;;  %5727 = vmatprep.subr.mxu0 %v6371_v0 }
  0x3f   : > { %5738 = vmatprep.subr.mxu1 %v6371_v0  ;;  %5728 = vmatpush3.msra.mxu0 %v6651_v47 }
  0x40   : > { %5729 = vmatprep.mubr.msk.f32.mxu0 %vm6372_vm0, %v6371_v0  ;;  %5739 = vmatpush3.msra.mxu1 %v6656_v48 }
  0x41   : > { %5740 = vmatprep.mubr.msk.f32.mxu1 %vm6372_vm0, %v6371_v0  ;;  %5730 = vmatmul.mubr.msk.f32.vlgmr.msra.gmra.mxu0 %vm474_vm1, %v322_v49  ;;  %v6768_v49 = vld [vmem:[%s6425_s24 + $0x1f8] sm:$0xff] }
  0x42   : > { %5741 = vmatmul.mubr.msk.f32.vlgmr.msra.gmra.mxu1 %vm474_vm1, %v323_v50  ;;  %5743 = vmatprep.subr.mxu0 %v6371_v0  ;;  %7874 = vst [vmem:[#allocation13_spill] sm:$0xff] %v6768_v49  ;;  %v6775_v50 = vld [vmem:[%s6425_s24 + $0x1d0] sm:$0xff] }
  0x43   : > { %5754 = vmatprep.subr.mxu1 %v6371_v0  ;;  %5744 = vmatpush3.msra.mxu0 %v6669_v51  ;;  %7875 = vst [vmem:[#allocation14_spill] sm:$0xff] %v6775_v50 }
  0x44   : > { %5755 = vmatpush3.msra.mxu1 %v6672_v52  ;;  %5745 = vmatprep.subr.mxu0 %v6371_v0 }
  0x45   : > { %5756 = vmatprep.subr.mxu1 %v6371_v0  ;;  %5746 = vmatpush3.msra.mxu0 %v6679_v53 }
  0x46   : > { %5757 = vmatpush3.msra.mxu1 %v6682_v54  ;;  %5747 = vmatprep.subr.mxu0 %v6371_v0 }
  0x47   : > { %5758 = vmatprep.subr.mxu1 %v6371_v0  ;;  %5748 = vmatpush3.msra.mxu0 %v6689_v55 }
  0x48   : > { %5759 = vmatpush3.msra.mxu1 %v6692_v56  ;;  %5749 = vmatprep.subr.mxu0 %v6371_v0 }
  0x49   : > { %5760 = vmatprep.subr.mxu1 %v6371_v0  ;;  %5750 = vmatpush3.msra.mxu0 %v6699_v57  ;;  %v7244_v57 = vld [vmem:[%s6851_s9 + $0x1c] sm:$0x3] }
  0x4a   : > { %5751 = vmatprep.mubr.msk.f32.mxu0 %vm6372_vm0, %v6371_v0  ;;  %5761 = vmatpush3.msra.mxu1 %v6704_v58  ;;  %v7119_v58 = vld [vmem:[%s6802_s6 + $0x168] sm:$0xff] }
  0x4b   : > { %5762 = vmatprep.mubr.msk.f32.mxu1 %vm6372_vm0, %v6371_v0  ;;  %5752 = vmatmul.mubr.msk.f32.vlgmr.msra.gmra.mxu0 %vm474_vm1, %v324_v59  ;;  %v6778_v59 = vld [vmem:[%s6425_s24 + $0x1f0] sm:$0xff]  ;;  %7926 = vst [vmem:[#allocation65_spill] sm:$0xff] %v7119_v58 }
  0x4c   : > { %5763 = vmatmul.mubr.msk.f32.vlgmr.msra.gmra.mxu1 %vm474_vm1, %v325_v60  ;;  %5765 = vmatprep.subr.mxu0 %v6371_v0  ;;  %7876 = vst [vmem:[#allocation15_spill] sm:$0xff] %v6778_v59  ;;  %v6785_v60 = vld [vmem:[%s6425_s24 + $0x1c8] sm:$0xff] }
  0x4d   : > { %5776 = vmatprep.subr.mxu1 %v6371_v0  ;;  %5766 = vmatpush3.msra.mxu0 %v6717_v61  ;;  %7877 = vst [vmem:[#allocation16_spill] sm:$0xff] %v6785_v60  ;;  %v7116_v61 = vld [vmem:[%s6802_s6 + $0x148] sm:$0xff] }
  0x4e   : > { %5777 = vmatpush3.msra.mxu1 %v6720_v62  ;;  %5767 = vmatprep.subr.mxu0 %v6371_v0  ;;  %v7065_v62 = vld [vmem:[%s6802_s6 + $0x128] sm:$0xff]  ;;  %7925 = vst [vmem:[#allocation64_spill] sm:$0xff] %v7116_v61 }
  0x4f   : > { %5778 = vmatprep.subr.mxu1 %v6371_v0  ;;  %5768 = vmatpush3.msra.mxu0 %v6727_v63  ;;  %v7062_v63 = vld [vmem:[%s6802_s6 + $0x108] sm:$0xff]  ;;  %7918 = vst [vmem:[#allocation57_spill] sm:$0xff] %v7065_v62 }
  0x50   : > { %5779 = vmatpush3.msra.mxu1 %v6730_v9  ;;  %5769 = vmatprep.subr.mxu0 %v6371_v0  ;;  %v7011_v9 = vld [vmem:[%s6802_s6 + $0xe8] sm:$0xff]  ;;  %7917 = vst [vmem:[#allocation56_spill] sm:$0xff] %v7062_v63 }
  0x51   : > { %5780 = vmatprep.subr.mxu1 %v6371_v0  ;;  %5770 = vmatpush3.msra.mxu0 %v6737_v10  ;;  %v7008_v10 = vld [vmem:[%s6802_s6 + $0xc8] sm:$0xff]  ;;  %7910 = vst [vmem:[#allocation49_spill] sm:$0xff] %v7011_v9 }
  0x52   : > { %5781 = vmatpush3.msra.mxu1 %v6740_v19  ;;  %5771 = vmatprep.subr.mxu0 %v6371_v0  ;;  %v6957_v19 = vld [vmem:[%s6802_s6 + $0xa8] sm:$0xff]  ;;  %7909 = vst [vmem:[#allocation48_spill] sm:$0xff] %v7008_v10 }
  0x53   : > { %5782 = vmatprep.subr.mxu1 %v6371_v0  ;;  %5772 = vmatpush3.msra.mxu0 %v6747_v20  ;;  %v6954_v20 = vld [vmem:[%s6802_s6 + $0x88] sm:$0xff]  ;;  %7902 = vst [vmem:[#allocation41_spill] sm:$0xff] %v6957_v19 }
  0x54   : > { %5773 = vmatprep.mubr.msk.f32.mxu0 %vm6372_vm0, %v6371_v0  ;;  %5783 = vmatpush3.msra.mxu1 %v6752_v29  ;;  %v6903_v29 = vld [vmem:[%s6802_s6 + $0x68] sm:$0xff]  ;;  %7901 = vst [vmem:[#allocation40_spill] sm:$0xff] %v6954_v20 }
  0x55   : > { %5784 = vmatprep.mubr.msk.f32.mxu1 %vm6372_vm0, %v6371_v0  ;;  %5774 = vmatmul.mubr.msk.f32.vlgmr.msra.gmra.mxu0 %vm474_vm1, %v326_v30  ;;  %v6788_v30 = vld [vmem:[%s6425_s24 + $0x1e8] sm:$0xff]  ;;  %7894 = vst [vmem:[#allocation33_spill] sm:$0xff] %v6903_v29 }
  0x56   : > { %5785 = vmatmul.mubr.msk.f32.vlgmr.msra.gmra.mxu1 %vm474_vm1, %v327_v39  ;;  %5787 = vmatprep.subr.mxu0 %v6371_v0  ;;  %7878 = vst [vmem:[#allocation17_spill] sm:$0xff] %v6788_v30  ;;  %v6795_v39 = vld [vmem:[%s6425_s24 + $0x1c0] sm:$0xff] }
  0x57   : > { %5798 = vmatprep.subr.mxu1 %v6371_v0  ;;  %5788 = vmatpush3.msra.mxu0 %v6765_v40  ;;  %7879 = vst [vmem:[#allocation18_spill] sm:$0xff] %v6795_v39  ;;  %v6900_v40 = vld [vmem:[%s6802_s6 + $0x48] sm:$0xff] }
  0x58   : > { %5799 = vmatpush3.msra.mxu1 %v6768_v49  ;;  %5789 = vmatprep.subr.mxu0 %v6371_v0  ;;  %v329_v49 = vld [vmem:[%s6456_s28 + $0x1e] sm:$0x3]  ;;  %7893 = vst [vmem:[#allocation32_spill] sm:$0xff] %v6900_v40 }
  0x59   : > { %5800 = vmatprep.subr.mxu1 %v6371_v0  ;;  %5790 = vmatpush3.msra.mxu0 %v6775_v50  ;;  %v328_v50 = vld [vmem:[%s6456_s28 + $0x1c] sm:$0x3] }
  0x5a   : > { %5801 = vmatpush3.msra.mxu1 %v6778_v59  ;;  %5791 = vmatprep.subr.mxu0 %v6371_v0  ;;  %v6807_v59 = vld [vmem:[%s6425_s24 + $0x1e0] sm:$0xff] }
  0x5b   : > { %5802 = vmatprep.subr.mxu1 %v6371_v0  ;;  %5792 = vmatpush3.msra.mxu0 %v6785_v60  ;;  %7880 = vst [vmem:[#allocation19_spill] sm:$0xff] %v6807_v59  ;;  %v6823_v60 = vld [vmem:[%s6802_s6 + $0x38] sm:$0xff] }
  0x5c   : > { %5803 = vmatpush3.msra.mxu1 %v6788_v30  ;;  %5793 = vmatprep.subr.mxu0 %v6371_v0  ;;  %v6820_v30 = vld [vmem:[%s6802_s6 + $0x18] sm:$0xff]  ;;  %7882 = vst [vmem:[#allocation21_spill] sm:$0xff] %v6823_v60 }
  0x5d   : > { %5804 = vmatprep.subr.mxu1 %v6371_v0  ;;  %5794 = vmatpush3.msra.mxu0 %v6795_v39  ;;  %7881 = vst [vmem:[#allocation20_spill] sm:$0xff] %v6820_v30  ;;  %v6830_v39 = vld [vmem:[%s6802_s6 + $0x10] sm:$0xff] }
  0x5e   : > { %5795 = vmatprep.mubr.msk.f32.mxu0 %vm6372_vm0, %v6371_v0  ;;  %5805 = vmatpush3.msra.mxu1 %v6807_v59  ;;  %7883 = vst [vmem:[#allocation22_spill] sm:$0xff] %v6830_v39  ;;  %v6833_v59 = vld [vmem:[%s6802_s6 + $0x30] sm:$0xff] }
  0x5f   : > { %5806 = vmatprep.mubr.msk.f32.mxu1 %vm6372_vm0, %v6371_v0  ;;  %5796 = vmatmul.mubr.msk.f32.vlgmr.msra.gmra.mxu0 %vm474_vm1, %v328_v50  ;;  %7884 = vst [vmem:[#allocation23_spill] sm:$0xff] %v6833_v59  ;;  %v6840_v50 = vld [vmem:[%s6802_s6 + $0x8] sm:$0xff] }
  0x60   : > { %5807 = vmatmul.mubr.msk.f32.vlgmr.msra.gmra.mxu1 %vm474_vm1, %v329_v49  ;;  %5809 = vmatprep.subr.mxu0 %v6371_v0  ;;  %7885 = vst [vmem:[#allocation24_spill] sm:$0xff] %v6840_v50  ;;  %v6843_v49 = vld [vmem:[%s6802_s6 + $0x28] sm:$0xff] }
  0x61   : > { %5820 = vmatprep.subr.mxu1 %v6371_v0  ;;  %5810 = vmatpush3.msra.mxu0 %v6820_v30  ;;  %7886 = vst [vmem:[#allocation25_spill] sm:$0xff] %v6843_v49  ;;  %v6869_v30 = vld [vmem:[%s6851_s9 + $0x2] sm:$0x3] }
  0x62   : > { %5821 = vmatpush3.msra.mxu1 %v6823_v60  ;;  %5811 = vmatprep.subr.mxu0 %v6371_v0  ;;  %v6856_v60 = vld [vmem:[%s6802_s6] sm:$0xff] }
  0x63   : > { %5822 = vmatprep.subr.mxu1 %v6371_v0  ;;  %5812 = vmatpush3.msra.mxu0 %v6830_v39  ;;  %7887 = vst [vmem:[#allocation26_spill] sm:$0xff] %v6856_v60  ;;  %v6866_v39 = vld [vmem:[%s6851_s9] sm:$0x3] }
  0x64   : > { %5823 = vmatpush3.msra.mxu1 %v6833_v59  ;;  %5813 = vmatprep.subr.mxu0 %v6371_v0  ;;  %v6861_v59 = vld [vmem:[%s6802_s6 + $0x20] sm:$0xff] }
  0x65   : > { %5824 = vmatprep.subr.mxu1 %v6371_v0  ;;  %5814 = vmatpush3.msra.mxu0 %v6840_v50  ;;  %7888 = vst [vmem:[#allocation27_spill] sm:$0xff] %v6861_v59  ;;  %v6881_v50 = vld [vmem:[%s6802_s6 + $0x78] sm:$0xff] }
  0x66   : > { %5825 = vmatpush3.msra.mxu1 %v6843_v49  ;;  %5815 = vmatprep.subr.mxu0 %v6371_v0  ;;  %v6878_v49 = vld [vmem:[%s6802_s6 + $0x58] sm:$0xff]  ;;  %7890 = vst [vmem:[#allocation29_spill] sm:$0xff] %v6881_v50 }
  0x67   : > { %5826 = vmatprep.subr.mxu1 %v6371_v0  ;;  %5816 = vmatpush3.msra.mxu0 %v6856_v60  ;;  %7889 = vst [vmem:[#allocation28_spill] sm:$0xff] %v6878_v49  ;;  %v6893_v60 = vld [vmem:[%s6802_s6 + $0x70] sm:$0xff] }
  0x68   : > { %5817 = vmatprep.mubr.msk.f32.mxu0 %vm6372_vm0, %v6371_v0  ;;  %5827 = vmatpush3.msra.mxu1 %v6861_v59  ;;  %v6890_v59 = vld [vmem:[%s6802_s6 + $0x50] sm:$0xff]  ;;  %7892 = vst [vmem:[#allocation31_spill] sm:$0xff] %v6893_v60 }
  0x69   : > { %5828 = vmatprep.mubr.msk.f32.mxu1 %vm6372_vm0, %v6371_v0  ;;  %5818 = vmatmul.mubr.msk.f32.vlgmr.msra.gmra.mxu0 %vm474_vm1, %v6866_v39  ;;  %7891 = vst [vmem:[#allocation30_spill] sm:$0xff] %v6890_v59 }
  0x6a   : > { %5829 = vmatmul.mubr.msk.f32.vlgmr.msra.gmra.mxu1 %vm474_vm1, %v6869_v30  ;;  %5831 = vmatprep.subr.mxu0 %v6371_v0 }
  0x6b   : > { %5842 = vmatprep.subr.mxu1 %v6371_v0  ;;  %5832 = vmatpush3.msra.mxu0 %v6878_v49  ;;  %v6915_v49 = vld [vmem:[%s6802_s6 + $0x60] sm:$0xff] }
  0x6c   : > { %5843 = vmatpush3.msra.mxu1 %v6881_v50  ;;  %5833 = vmatprep.subr.mxu0 %v6371_v0  ;;  %v6910_v50 = vld [vmem:[%s6802_s6 + $0x40] sm:$0xff]  ;;  %7896 = vst [vmem:[#allocation35_spill] sm:$0xff] %v6915_v49 }
  0x6d   : > { %5844 = vmatprep.subr.mxu1 %v6371_v0  ;;  %5834 = vmatpush3.msra.mxu0 %v6890_v59  ;;  %7895 = vst [vmem:[#allocation34_spill] sm:$0xff] %v6910_v50  ;;  %v6923_v59 = vld [vmem:[%s6851_s9 + $0x6] sm:$0x3] }
  0x6e   : > { %5845 = vmatpush3.msra.mxu1 %v6893_v60  ;;  %5835 = vmatprep.subr.mxu0 %v6371_v0  ;;  %v6920_v60 = vld [vmem:[%s6851_s9 + $0x4] sm:$0x3] }
  0x6f   : > { %5846 = vmatprep.subr.mxu1 %v6371_v0  ;;  %5836 = vmatpush3.msra.mxu0 %v6900_v40  ;;  %v6935_v40 = vld [vmem:[%s6802_s6 + $0xb8] sm:$0xff] }
  0x70   : > { %5847 = vmatpush3.msra.mxu1 %v6903_v29  ;;  %5837 = vmatprep.subr.mxu0 %v6371_v0  ;;  %v6932_v29 = vld [vmem:[%s6802_s6 + $0x98] sm:$0xff]  ;;  %7898 = vst [vmem:[#allocation37_spill] sm:$0xff] %v6935_v40 }
  0x71   : > { %5848 = vmatprep.subr.mxu1 %v6371_v0  ;;  %5838 = vmatpush3.msra.mxu0 %v6910_v50  ;;  %7897 = vst [vmem:[#allocation36_spill] sm:$0xff] %v6932_v29  ;;  %v6947_v50 = vld [vmem:[%s6802_s6 + $0xb0] sm:$0xff] }
  0x72   : > { %5839 = vmatprep.mubr.msk.f32.mxu0 %vm6372_vm0, %v6371_v0  ;;  %5849 = vmatpush3.msra.mxu1 %v6915_v49  ;;  %v6944_v49 = vld [vmem:[%s6802_s6 + $0x90] sm:$0xff]  ;;  %7900 = vst [vmem:[#allocation39_spill] sm:$0xff] %v6947_v50 }
  0x73   : > { %5850 = vmatprep.mubr.msk.f32.mxu1 %vm6372_vm0, %v6371_v0  ;;  %5840 = vmatmul.mubr.msk.f32.vlgmr.msra.gmra.mxu0 %vm474_vm1, %v6920_v60  ;;  %7899 = vst [vmem:[#allocation38_spill] sm:$0xff] %v6944_v49 }
  0x74   : > { %5851 = vmatmul.mubr.msk.f32.vlgmr.msra.gmra.mxu1 %vm474_vm1, %v6923_v59  ;;  %5853 = vmatprep.subr.mxu0 %v6371_v0 }
  0x75   : > { %5864 = vmatprep.subr.mxu1 %v6371_v0  ;;  %5854 = vmatpush3.msra.mxu0 %v6932_v29  ;;  %v6969_v29 = vld [vmem:[%s6802_s6 + $0xa0] sm:$0xff] }
  0x76   : > { %5865 = vmatpush3.msra.mxu1 %v6935_v40  ;;  %5855 = vmatprep.subr.mxu0 %v6371_v0  ;;  %v6964_v40 = vld [vmem:[%s6802_s6 + $0x80] sm:$0xff]  ;;  %7904 = vst [vmem:[#allocation43_spill] sm:$0xff] %v6969_v29 }
  0x77   : > { %5866 = vmatprep.subr.mxu1 %v6371_v0  ;;  %5856 = vmatpush3.msra.mxu0 %v6944_v49  ;;  %7903 = vst [vmem:[#allocation42_spill] sm:$0xff] %v6964_v40  ;;  %v6977_v49 = vld [vmem:[%s6851_s9 + $0xa] sm:$0x3] }
  0x78   : > { %5867 = vmatpush3.msra.mxu1 %v6947_v50  ;;  %5857 = vmatprep.subr.mxu0 %v6371_v0  ;;  %v6974_v50 = vld [vmem:[%s6851_s9 + $0x8] sm:$0x3] }
  0x79   : > { %5868 = vmatprep.subr.mxu1 %v6371_v0  ;;  %5858 = vmatpush3.msra.mxu0 %v6954_v20  ;;  %v6989_v20 = vld [vmem:[%s6802_s6 + $0xf8] sm:$0xff] }
  0x7a   : > { %5869 = vmatpush3.msra.mxu1 %v6957_v19  ;;  %5859 = vmatprep.subr.mxu0 %v6371_v0  ;;  %v6986_v19 = vld [vmem:[%s6802_s6 + $0xd8] sm:$0xff]  ;;  %7906 = vst [vmem:[#allocation45_spill] sm:$0xff] %v6989_v20 }
  0x7b   : > { %5870 = vmatprep.subr.mxu1 %v6371_v0  ;;  %5860 = vmatpush3.msra.mxu0 %v6964_v40  ;;  %7905 = vst [vmem:[#allocation44_spill] sm:$0xff] %v6986_v19  ;;  %v7001_v40 = vld [vmem:[%s6802_s6 + $0xf0] sm:$0xff] }
  0x7c   : > { %5861 = vmatprep.mubr.msk.f32.mxu0 %vm6372_vm0, %v6371_v0  ;;  %5871 = vmatpush3.msra.mxu1 %v6969_v29  ;;  %v6998_v29 = vld [vmem:[%s6802_s6 + $0xd0] sm:$0xff]  ;;  %7908 = vst [vmem:[#allocation47_spill] sm:$0xff] %v7001_v40 }
  0x7d   : > { %5872 = vmatprep.mubr.msk.f32.mxu1 %vm6372_vm0, %v6371_v0  ;;  %5862 = vmatmul.mubr.msk.f32.vlgmr.msra.gmra.mxu0 %vm474_vm1, %v6974_v50  ;;  %7907 = vst [vmem:[#allocation46_spill] sm:$0xff] %v6998_v29 }
  0x7e   : > { %5873 = vmatmul.mubr.msk.f32.vlgmr.msra.gmra.mxu1 %vm474_vm1, %v6977_v49  ;;  %5875 = vmatprep.subr.mxu0 %v6371_v0 }
  0x7f   : > { %5886 = vmatprep.subr.mxu1 %v6371_v0  ;;  %5876 = vmatpush3.msra.mxu0 %v6986_v19  ;;  %v7023_v19 = vld [vmem:[%s6802_s6 + $0xe0] sm:$0xff] }
  0x80   : > { %5887 = vmatpush3.msra.mxu1 %v6989_v20  ;;  %5877 = vmatprep.subr.mxu0 %v6371_v0  ;;  %v7018_v20 = vld [vmem:[%s6802_s6 + $0xc0] sm:$0xff]  ;;  %7912 = vst [vmem:[#allocation51_spill] sm:$0xff] %v7023_v19 }
  0x81   : > { %5888 = vmatprep.subr.mxu1 %v6371_v0  ;;  %5878 = vmatpush3.msra.mxu0 %v6998_v29  ;;  %7911 = vst [vmem:[#allocation50_spill] sm:$0xff] %v7018_v20  ;;  %v7031_v29 = vld [vmem:[%s6851_s9 + $0xe] sm:$0x3] }
  0x82   : > { %5889 = vmatpush3.msra.mxu1 %v7001_v40  ;;  %5879 = vmatprep.subr.mxu0 %v6371_v0  ;;  %v7028_v40 = vld [vmem:[%s6851_s9 + $0xc] sm:$0x3] }
  0x83   : > { %5890 = vmatprep.subr.mxu1 %v6371_v0  ;;  %5880 = vmatpush3.msra.mxu0 %v7008_v10  ;;  %v7043_v10 = vld [vmem:[%s6802_s6 + $0x138] sm:$0xff] }
  0x84   : > { %5891 = vmatpush3.msra.mxu1 %v7011_v9  ;;  %5881 = vmatprep.subr.mxu0 %v6371_v0  ;;  %v7040_v9 = vld [vmem:[%s6802_s6 + $0x118] sm:$0xff]  ;;  %7914 = vst [vmem:[#allocation53_spill] sm:$0xff] %v7043_v10 }
  0x85   : > { %5892 = vmatprep.subr.mxu1 %v6371_v0  ;;  %5882 = vmatpush3.msra.mxu0 %v7018_v20  ;;  %7913 = vst [vmem:[#allocation52_spill] sm:$0xff] %v7040_v9  ;;  %v7055_v20 = vld [vmem:[%s6802_s6 + $0x130] sm:$0xff] }
  0x86   : > { %5883 = vmatprep.mubr.msk.f32.mxu0 %vm6372_vm0, %v6371_v0  ;;  %5893 = vmatpush3.msra.mxu1 %v7023_v19  ;;  %v7052_v19 = vld [vmem:[%s6802_s6 + $0x110] sm:$0xff]  ;;  %7916 = vst [vmem:[#allocation55_spill] sm:$0xff] %v7055_v20 }
  0x87   : > { %5894 = vmatprep.mubr.msk.f32.mxu1 %vm6372_vm0, %v6371_v0  ;;  %5884 = vmatmul.mubr.msk.f32.vlgmr.msra.gmra.mxu0 %vm474_vm1, %v7028_v40  ;;  %7915 = vst [vmem:[#allocation54_spill] sm:$0xff] %v7052_v19 }
  0x88   : > { %5895 = vmatmul.mubr.msk.f32.vlgmr.msra.gmra.mxu1 %vm474_vm1, %v7031_v29  ;;  %5897 = vmatprep.subr.mxu0 %v6371_v0 }
  0x89   : > { %5908 = vmatprep.subr.mxu1 %v6371_v0  ;;  %5898 = vmatpush3.msra.mxu0 %v7040_v9  ;;  %v7077_v9 = vld [vmem:[%s6802_s6 + $0x120] sm:$0xff] }
  0x8a   : > { %5909 = vmatpush3.msra.mxu1 %v7043_v10  ;;  %5899 = vmatprep.subr.mxu0 %v6371_v0  ;;  %v7072_v10 = vld [vmem:[%s6802_s6 + $0x100] sm:$0xff]  ;;  %7920 = vst [vmem:[#allocation59_spill] sm:$0xff] %v7077_v9 }
  0x8b   : > { %5910 = vmatprep.subr.mxu1 %v6371_v0  ;;  %5900 = vmatpush3.msra.mxu0 %v7052_v19  ;;  %7919 = vst [vmem:[#allocation58_spill] sm:$0xff] %v7072_v10  ;;  %v7085_v19 = vld [vmem:[%s6851_s9 + $0x12] sm:$0x3] }
  0x8c   : > { %5911 = vmatpush3.msra.mxu1 %v7055_v20  ;;  %5901 = vmatprep.subr.mxu0 %v6371_v0  ;;  %v7082_v20 = vld [vmem:[%s6851_s9 + $0x10] sm:$0x3] }
  0x8d   : > { %5912 = vmatprep.subr.mxu1 %v6371_v0  ;;  %5902 = vmatpush3.msra.mxu0 %v7062_v63  ;;  %v7097_v63 = vld [vmem:[%s6802_s6 + $0x178] sm:$0xff] }
  0x8e   : > { %5913 = vmatpush3.msra.mxu1 %v7065_v62  ;;  %5903 = vmatprep.subr.mxu0 %v6371_v0  ;;  %v7094_v62 = vld [vmem:[%s6802_s6 + $0x158] sm:$0xff]  ;;  %7922 = vst [vmem:[#allocation61_spill] sm:$0xff] %v7097_v63 }
  0x8f   : > { %5914 = vmatprep.subr.mxu1 %v6371_v0  ;;  %5904 = vmatpush3.msra.mxu0 %v7072_v10  ;;  %7921 = vst [vmem:[#allocation60_spill] sm:$0xff] %v7094_v62  ;;  %v7109_v10 = vld [vmem:[%s6802_s6 + $0x170] sm:$0xff] }
  0x90   : > { %5905 = vmatprep.mubr.msk.f32.mxu0 %vm6372_vm0, %v6371_v0  ;;  %5915 = vmatpush3.msra.mxu1 %v7077_v9  ;;  %v7106_v9 = vld [vmem:[%s6802_s6 + $0x150] sm:$0xff]  ;;  %7924 = vst [vmem:[#allocation63_spill] sm:$0xff] %v7109_v10 }
  0x91   : > { %5916 = vmatprep.mubr.msk.f32.mxu1 %vm6372_vm0, %v6371_v0  ;;  %5906 = vmatmul.mubr.msk.f32.vlgmr.msra.gmra.mxu0 %vm474_vm1, %v7082_v20  ;;  %7923 = vst [vmem:[#allocation62_spill] sm:$0xff] %v7106_v9 }
  0x92   : > { %5917 = vmatmul.mubr.msk.f32.vlgmr.msra.gmra.mxu1 %vm474_vm1, %v7085_v19  ;;  %5919 = vmatprep.subr.mxu0 %v6371_v0 }
  0x93   : > { %5930 = vmatprep.subr.mxu1 %v6371_v0  ;;  %5920 = vmatpush3.msra.mxu0 %v7094_v62  ;;  %v7131_v62 = vld [vmem:[%s6802_s6 + $0x160] sm:$0xff] }
  0x94   : > { %5931 = vmatpush3.msra.mxu1 %v7097_v63  ;;  %5921 = vmatprep.subr.mxu0 %v6371_v0  ;;  %v7126_v63 = vld [vmem:[%s6802_s6 + $0x140] sm:$0xff]  ;;  %7928 = vst [vmem:[#allocation67_spill] sm:$0xff] %v7131_v62 }
  0x95   : > { %5932 = vmatprep.subr.mxu1 %v6371_v0  ;;  %5922 = vmatpush3.msra.mxu0 %v7106_v9  ;;  %7927 = vst [vmem:[#allocation66_spill] sm:$0xff] %v7126_v63  ;;  %v7139_v9 = vld [vmem:[%s6851_s9 + $0x16] sm:$0x3] }
  0x96   : > { %5933 = vmatpush3.msra.mxu1 %v7109_v10  ;;  %5923 = vmatprep.subr.mxu0 %v6371_v0  ;;  %v7136_v10 = vld [vmem:[%s6851_s9 + $0x14] sm:$0x3]  ;;  %7930 = vst [vmem:[#allocation69_spill] sm:$0xff] %v7139_v9 }
  0x97   : > { %5934 = vmatprep.subr.mxu1 %v6371_v0  ;;  %5924 = vmatpush3.msra.mxu0 %v7116_v61  ;;  %7929 = vst [vmem:[#allocation68_spill] sm:$0xff] %v7136_v10  ;;  %v7151_v61 = vld [vmem:[%s6802_s6 + $0x1b8] sm:$0xff] }
  0x98   : > { %5935 = vmatpush3.msra.mxu1 %v7119_v58  ;;  %5925 = vmatprep.subr.mxu0 %v6371_v0  ;;  %v7148_v58 = vld [vmem:[%s6802_s6 + $0x198] sm:$0xff]  ;;  %7932 = vst [vmem:[#allocation71_spill] sm:$0xff] %v7151_v61 }
  0x99   : > { %5936 = vmatprep.subr.mxu1 %v6371_v0  ;;  %5926 = vmatpush3.msra.mxu0 %v7126_v63  ;;  %7931 = vst [vmem:[#allocation70_spill] sm:$0xff] %v7148_v58  ;;  %v7163_v63 = vld [vmem:[%s6802_s6 + $0x1b0] sm:$0xff] }
  0x9a   : > { %5927 = vmatprep.mubr.msk.f32.mxu0 %vm6372_vm0, %v6371_v0  ;;  %5937 = vmatpush3.msra.mxu1 %v7131_v62  ;;  %v7160_v62 = vld [vmem:[%s6802_s6 + $0x190] sm:$0xff]  ;;  %7934 = vst [vmem:[#allocation73_spill] sm:$0xff] %v7163_v63 }
  0x9b   : > { %5938 = vmatprep.mubr.msk.f32.mxu1 %vm6372_vm0, %v6371_v0  ;;  %5928 = vmatmul.mubr.msk.f32.vlgmr.msra.gmra.mxu0 %vm474_vm1, %v7136_v10  ;;  %7933 = vst [vmem:[#allocation72_spill] sm:$0xff] %v7160_v62  ;;  %v7173_v10 = vld [vmem:[%s6802_s6 + $0x1a8] sm:$0xff] }
  0x9c   : > { %5939 = vmatmul.mubr.msk.f32.vlgmr.msra.gmra.mxu1 %vm474_vm1, %v7139_v9  ;;  %5941 = vmatprep.subr.mxu0 %v6371_v0  ;;  %v7170_v9 = vld [vmem:[%s6802_s6 + $0x188] sm:$0xff]  ;;  %7936 = vst [vmem:[#allocation75_spill] sm:$0xff] %v7173_v10 }
  0x9d   : > { %5952 = vmatprep.subr.mxu1 %v6371_v0  ;;  %5942 = vmatpush3.msra.mxu0 %v7148_v58  ;;  %7935 = vst [vmem:[#allocation74_spill] sm:$0xff] %v7170_v9  ;;  %v7185_v58 = vld [vmem:[%s6802_s6 + $0x1a0] sm:$0xff] }
  0x9e   : > { %5953 = vmatpush3.msra.mxu1 %v7151_v61  ;;  %5943 = vmatprep.subr.mxu0 %v6371_v0  ;;  %v7180_v61 = vld [vmem:[%s6802_s6 + $0x180] sm:$0xff]  ;;  %7938 = vst [vmem:[#allocation77_spill] sm:$0xff] %v7185_v58 }
  0x9f   : > { %5954 = vmatprep.subr.mxu1 %v6371_v0  ;;  %5944 = vmatpush3.msra.mxu0 %v7160_v62  ;;  %7937 = vst [vmem:[#allocation76_spill] sm:$0xff] %v7180_v61  ;;  %v7193_v62 = vld [vmem:[%s6851_s9 + $0x1a] sm:$0x3] }
  0xa0   : > { %5955 = vmatpush3.msra.mxu1 %v7163_v63  ;;  %5945 = vmatprep.subr.mxu0 %v6371_v0  ;;  %v7190_v63 = vld [vmem:[%s6851_s9 + $0x18] sm:$0x3]  ;;  %7940 = vst [vmem:[#allocation79_spill] sm:$0xff] %v7193_v62 }
  0xa1   : > { %5956 = vmatprep.subr.mxu1 %v6371_v0  ;;  %5946 = vmatpush3.msra.mxu0 %v7170_v9  ;;  %7939 = vst [vmem:[#allocation78_spill] sm:$0xff] %v7190_v63  ;;  %v7205_v9 = vld [vmem:[%s6802_s6 + $0x1f8] sm:$0xff] }
  0xa2   : > { %5957 = vmatpush3.msra.mxu1 %v7173_v10  ;;  %5947 = vmatprep.subr.mxu0 %v6371_v0  ;;  %v7202_v10 = vld [vmem:[%s6802_s6 + $0x1d8] sm:$0xff]  ;;  %7942 = vst [vmem:[#allocation81_spill] sm:$0xff] %v7205_v9 }
  0xa3   : > { %5958 = vmatprep.subr.mxu1 %v6371_v0  ;;  %5948 = vmatpush3.msra.mxu0 %v7180_v61  ;;  %7941 = vst [vmem:[#allocation80_spill] sm:$0xff] %v7202_v10  ;;  %v7217_v61 = vld [vmem:[%s6802_s6 + $0x1f0] sm:$0xff] }
  0xa4   : > { %5949 = vmatprep.mubr.msk.f32.mxu0 %vm6372_vm0, %v6371_v0  ;;  %5959 = vmatpush3.msra.mxu1 %v7185_v58  ;;  %v7214_v58 = vld [vmem:[%s6802_s6 + $0x1d0] sm:$0xff] }
  0xa5   : > { %5960 = vmatprep.mubr.msk.f32.mxu1 %vm6372_vm0, %v6371_v0  ;;  %5950 = vmatmul.mubr.msk.f32.vlgmr.msra.gmra.mxu0 %vm474_vm1, %v7190_v63  ;;  %7943 = vst [vmem:[#allocation82_spill] sm:$0xff] %v7214_v58  ;;  %v7227_v63 = vld [vmem:[%s6802_s6 + $0x1e8] sm:$0xff] }
  0xa6   : > { %5961 = vmatmul.mubr.msk.f32.vlgmr.msra.gmra.mxu1 %vm474_vm1, %v7193_v62  ;;  %5963 = vmatprep.subr.mxu0 %v6371_v0  ;;  %v7224_v62 = vld [vmem:[%s6802_s6 + $0x1c8] sm:$0xff] }
  0xa7   : > { %5974 = vmatprep.subr.mxu1 %v6371_v0  ;;  %5964 = vmatpush3.msra.mxu0 %v7202_v10  ;;  %v7234_v10 = vld [vmem:[%s6802_s6 + $0x1c0] sm:$0xff] }
  0xa8   : > { %5975 = vmatpush3.msra.mxu1 %v7205_v9  ;;  %5965 = vmatprep.subr.mxu0 %v6371_v0  ;;  %v7239_v9 = vld [vmem:[%s6802_s6 + $0x1e0] sm:$0xff] }
  0xa9   : > { %5976 = vmatprep.subr.mxu1 %v6371_v0  ;;  %5966 = vmatpush3.msra.mxu0 %v7214_v58  ;;  %v7247_v58 = vld [vmem:[%s6851_s9 + $0x1e] sm:$0x3] }
  0xaa   : > { %5977 = vmatpush3.msra.mxu1 %v7217_v61  ;;  %5967 = vmatprep.subr.mxu0 %v6371_v0 }
  0xab   : > { %5978 = vmatprep.subr.mxu1 %v6371_v0  ;;  %5968 = vmatpush3.msra.mxu0 %v7224_v62 }
  0xac   : > { %5979 = vmatpush3.msra.mxu1 %v7227_v63  ;;  %5969 = vmatprep.subr.mxu0 %v6371_v0 }
  0xad   : > { %5980 = vmatprep.subr.mxu1 %v6371_v0  ;;  %5970 = vmatpush3.msra.mxu0 %v7234_v10 }
  0xae   : > { %5971 = vmatprep.mubr.msk.f32.mxu0 %vm6372_vm0, %v6371_v0  ;;  %5981 = vmatpush3.msra.mxu1 %v7239_v9 }
  0xaf   : > { %5982 = vmatprep.mubr.msk.f32.mxu1 %vm6372_vm0, %v6371_v0  ;;  %5972 = vmatmul.mubr.msk.f32.vlgmr.msra.gmra.mxu0 %vm474_vm1, %v7244_v57 }
  0xb0   : > { %5983 = vmatmul.mubr.msk.f32.vlgmr.msra.gmra.mxu1 %vm474_vm1, %v7247_v58  ;;  %5985 = vmatprep.subr.mxu0 %v6371_v0 }
  0xb1   : > { %5996 = vmatprep.subr.mxu1 %v6371_v0  ;;  %5986 = vmatpush3.msra.mxu0 %v6431_v1 }
  0xb2   : > { %5997 = vmatpush3.msra.mxu1 %v6434_v2  ;;  %5987 = vmatprep.subr.mxu0 %v6371_v0 }
  0xb3   : > { %5998 = vmatprep.subr.mxu1 %v6371_v0  ;;  %5988 = vmatpush3.msra.mxu0 %v6437_v3 }
  0xb4   : > { %5999 = vmatpush3.msra.mxu1 %v6442_v4  ;;  %5989 = vmatprep.subr.mxu0 %v6371_v0 }
  0xb5   : > { %6000 = vmatprep.subr.mxu1 %v6371_v0  ;;  %5990 = vmatpush3.msra.mxu0 %v6447_v5 }
  0xb6   : > { %6001 = vmatpush3.msra.mxu1 %v6450_v6  ;;  %5991 = vmatprep.subr.mxu0 %v6371_v0 }
  0xb7   : > { %6002 = vmatprep.subr.mxu1 %v6371_v0  ;;  %5992 = vmatpush3.msra.mxu0 %v6463_v7 }
  0xb8   : > { %5993 = vmatprep.mubr.msk.f32.mxu0 %vm6372_vm0, %v6371_v0  ;;  %6003 = vmatpush3.msra.mxu1 %v6466_v8 }
  0xb9   : > { %6004 = vmatprep.mubr.msk.f32.mxu1 %vm6372_vm0, %v6371_v0  ;;  %5994 = vmatmul.mubr.msk.f32.vlgmr.msra.gmra.mxu0 %vm474_vm1, %v6866_v39 }
  0xba   : > { %6005 = vmatmul.mubr.msk.f32.vlgmr.msra.gmra.mxu1 %vm474_vm1, %v6869_v30  ;;  %6007 = vmatprep.subr.mxu0 %v6371_v0 }
  0xbb   : > { %6018 = vmatprep.subr.mxu1 %v6371_v0  ;;  %6008 = vmatpush3.msra.mxu0 %v6477_v11  ;;  %v7944_v11 = vld [vmem:[#allocation2_spill] sm:$0xff] }
  0xbc   : > { %6019 = vmatpush3.msra.mxu1 %v6480_v12  ;;  %6009 = vmatprep.subr.mxu0 %v6371_v0  ;;  %v7945_v12 = vld [vmem:[#allocation3_spill] sm:$0xff] }
  0xbd   : > { %6020 = vmatprep.subr.mxu1 %v6371_v0  ;;  %6010 = vmatpush3.msra.mxu0 %v6487_v13  ;;  %v7946_v13 = vld [vmem:[#allocation68_spill] sm:$0xff] }
  0xbe   : > { %6021 = vmatpush3.msra.mxu1 %v6490_v14  ;;  %6011 = vmatprep.subr.mxu0 %v6371_v0  ;;  %v7947_v14 = vld [vmem:[#allocation69_spill] sm:$0xff] }
  0xbf   : > { %6022 = vmatprep.subr.mxu1 %v6371_v0  ;;  %6012 = vmatpush3.msra.mxu0 %v6497_v15  ;;  %v7948_v15 = vld [vmem:[#allocation4_spill] sm:$0xff] }
  0xc0   : > { %6023 = vmatpush3.msra.mxu1 %v6500_v16  ;;  %6013 = vmatprep.subr.mxu0 %v6371_v0  ;;  %v7949_v16 = vld [vmem:[#allocation5_spill] sm:$0xff] }
  0xc1   : > { %6024 = vmatprep.subr.mxu1 %v6371_v0  ;;  %6014 = vmatpush3.msra.mxu0 %v6507_v17 }
  0xc2   : > { %6015 = vmatprep.mubr.msk.f32.mxu0 %vm6372_vm0, %v6371_v0  ;;  %6025 = vmatpush3.msra.mxu1 %v6512_v18 }
  0xc3   : > { %6026 = vmatprep.mubr.msk.f32.mxu1 %vm6372_vm0, %v6371_v0  ;;  %6016 = vmatmul.mubr.msk.f32.vlgmr.msra.gmra.mxu0 %vm474_vm1, %v6920_v60  ;;  %v7975_v60 = vld [vmem:[#allocation29_spill] sm:$0xff] }
  0xc4   : > { %6027 = vmatmul.mubr.msk.f32.vlgmr.msra.gmra.mxu1 %vm474_vm1, %v6923_v59  ;;  %6029 = vmatprep.subr.mxu0 %v6371_v0  ;;  %v7974_v59 = vld [vmem:[#allocation28_spill] sm:$0xff] }
  0xc5   : > { %6040 = vmatprep.subr.mxu1 %v6371_v0  ;;  %6030 = vmatpush3.msra.mxu0 %v6525_v21  ;;  %v7950_v21 = vld [vmem:[#allocation6_spill] sm:$0xff] }
  0xc6   : > { %6041 = vmatpush3.msra.mxu1 %v6528_v22  ;;  %6031 = vmatprep.subr.mxu0 %v6371_v0  ;;  %v7951_v22 = vld [vmem:[#allocation7_spill] sm:$0xff] }
  0xc7   : > { %6042 = vmatprep.subr.mxu1 %v6371_v0  ;;  %6032 = vmatpush3.msra.mxu0 %v6535_v23 }
  0xc8   : > { %6043 = vmatpush3.msra.mxu1 %v6538_v24  ;;  %6033 = vmatprep.subr.mxu0 %v6371_v0 }
  0xc9   : > { %6044 = vmatprep.subr.mxu1 %v6371_v0  ;;  %6034 = vmatpush3.msra.mxu0 %v6545_v25  ;;  %v7952_v25 = vld [vmem:[#allocation8_spill] sm:$0xff] }
  0xca   : > { %6045 = vmatpush3.msra.mxu1 %v6548_v26  ;;  %6035 = vmatprep.subr.mxu0 %v6371_v0  ;;  %v7953_v26 = vld [vmem:[#allocation9_spill] sm:$0xff] }
  0xcb   : > { %6046 = vmatprep.subr.mxu1 %v6371_v0  ;;  %6036 = vmatpush3.msra.mxu0 %v6555_v27  ;;  %v7954_v27 = vld [vmem:[#allocation10_spill] sm:$0xff] }
  0xcc   : > { %6037 = vmatprep.mubr.msk.f32.mxu0 %vm6372_vm0, %v6371_v0  ;;  %6047 = vmatpush3.msra.mxu1 %v6560_v28  ;;  %v7955_v28 = vld [vmem:[#allocation11_spill] sm:$0xff] }
  0xcd   : > { %6048 = vmatprep.mubr.msk.f32.mxu1 %vm6372_vm0, %v6371_v0  ;;  %6038 = vmatmul.mubr.msk.f32.vlgmr.msra.gmra.mxu0 %vm474_vm1, %v6974_v50  ;;  %v7976_v50 = vld [vmem:[#allocation30_spill] sm:$0xff] }
  0xce   : > { %6049 = vmatmul.mubr.msk.f32.vlgmr.msra.gmra.mxu1 %vm474_vm1, %v6977_v49  ;;  %6051 = vmatprep.subr.mxu0 %v6371_v0  ;;  %v7977_v49 = vld [vmem:[#allocation31_spill] sm:$0xff] }
  0xcf   : > { %6062 = vmatprep.subr.mxu1 %v6371_v0  ;;  %6052 = vmatpush3.msra.mxu0 %v6573_v31  ;;  %v7956_v31 = vld [vmem:[#allocation78_spill] sm:$0xff] }
  0xd0   : > { %6063 = vmatpush3.msra.mxu1 %v6576_v32  ;;  %6053 = vmatprep.subr.mxu0 %v6371_v0  ;;  %v7957_v32 = vld [vmem:[#allocation79_spill] sm:$0xff] }
  0xd1   : > { %6064 = vmatprep.subr.mxu1 %v6371_v0  ;;  %6054 = vmatpush3.msra.mxu0 %v6583_v33  ;;  %v7958_v33 = vld [vmem:[#allocation12_spill] sm:$0xff] }
  0xd2   : > { %6065 = vmatpush3.msra.mxu1 %v6586_v34  ;;  %6055 = vmatprep.subr.mxu0 %v6371_v0  ;;  %v7959_v34 = vld [vmem:[#allocation13_spill] sm:$0xff] }
  0xd3   : > { %6066 = vmatprep.subr.mxu1 %v6371_v0  ;;  %6056 = vmatpush3.msra.mxu0 %v6593_v35 }
  0xd4   : > { %6067 = vmatpush3.msra.mxu1 %v6596_v36  ;;  %6057 = vmatprep.subr.mxu0 %v6371_v0 }
  0xd5   : > { %6068 = vmatprep.subr.mxu1 %v6371_v0  ;;  %6058 = vmatpush3.msra.mxu0 %v6603_v37  ;;  %v7960_v37 = vld [vmem:[#allocation14_spill] sm:$0xff] }
  0xd6   : > { %6059 = vmatprep.mubr.msk.f32.mxu0 %vm6372_vm0, %v6371_v0  ;;  %6069 = vmatpush3.msra.mxu1 %v6608_v38  ;;  %v7961_v38 = vld [vmem:[#allocation15_spill] sm:$0xff] }
  0xd7   : > { %6070 = vmatprep.mubr.msk.f32.mxu1 %vm6372_vm0, %v6371_v0  ;;  %6060 = vmatmul.mubr.msk.f32.vlgmr.msra.gmra.mxu0 %vm474_vm1, %v7028_v40  ;;  %v6348_v40 = vld [vmem:[%s6456_s28 + $0x2] sm:$0x3] }
  0xd8   : > { %6071 = vmatmul.mubr.msk.f32.vlgmr.msra.gmra.mxu1 %vm474_vm1, %v7031_v29  ;;  %6073 = vmatprep.subr.mxu0 %v6371_v0  ;;  %v6347_v29 = vld [vmem:[%s6456_s28] sm:$0x3] }
  0xd9   : > { %6084 = vmatprep.subr.mxu1 %v6371_v0  ;;  %6074 = vmatpush3.msra.mxu0 %v6621_v41  ;;  %v7359_v1 = vpop.f32.mrf.mxu0 }
  0xda   : > { %6085 = vmatpush3.msra.mxu1 %v6624_v42  ;;  %v7361_v2 = vpop.f32.mrf.mxu1  ;;  %6075 = vmatprep.subr.mxu0 %v6371_v0 }
  0xdb   : > { %6086 = vmatprep.subr.mxu1 %v6371_v0  ;;  %6076 = vmatpush3.msra.mxu0 %v6631_v43  ;;  %v5643_v3 = vpop.f32.mrf.mxu0  ;;  %v7962_v43 = vld [vmem:[#allocation16_spill] sm:$0xff] }
  0xdc   : > { %6087 = vmatpush3.msra.mxu1 %v6634_v44  ;;  %v5654_v4 = vpop.f32.mrf.mxu1  ;;  %6077 = vmatprep.subr.mxu0 %v6371_v0  ;;  %v7963_v44 = vld [vmem:[#allocation17_spill] sm:$0xff] }
  0xdd   : > { %6088 = vmatprep.subr.mxu1 %v6371_v0  ;;  %6078 = vmatpush3.msra.mxu0 %v6641_v45  ;;  %v7964_v45 = vld [vmem:[#allocation18_spill] sm:$0xff] }
  0xde   : > { %6089 = vmatpush3.msra.mxu1 %v6644_v46  ;;  %6079 = vmatprep.subr.mxu0 %v6371_v0  ;;  %v7965_v46 = vld [vmem:[#allocation19_spill] sm:$0xff] }
  0xdf   : > { %6090 = vmatprep.subr.mxu1 %v6371_v0  ;;  %6080 = vmatpush3.msra.mxu0 %v6651_v47  ;;  %v7966_v47 = vld [vmem:[#allocation20_spill] sm:$0xff] }
  0xe0   : > { %6081 = vmatprep.mubr.msk.f32.mxu0 %vm6372_vm0, %v6371_v0  ;;  %6091 = vmatpush3.msra.mxu1 %v6656_v48  ;;  %v7967_v48 = vld [vmem:[#allocation21_spill] sm:$0xff] }
  0xe1   : > { %6092 = vmatprep.mubr.msk.f32.mxu1 %vm6372_vm0, %v6371_v0  ;;  %6082 = vmatmul.mubr.msk.f32.vlgmr.msra.gmra.mxu0 %vm474_vm1, %v7082_v20  ;;  %v7973_v20 = vld [vmem:[#allocation27_spill] sm:$0xff] }
  0xe2   : > { %6093 = vmatmul.mubr.msk.f32.vlgmr.msra.gmra.mxu1 %vm474_vm1, %v7085_v19  ;;  %6095 = vmatprep.subr.mxu0 %v6371_v0  ;;  %v7972_v19 = vld [vmem:[#allocation26_spill] sm:$0xff] }
  0xe3   : > { %6106 = vmatprep.subr.mxu1 %v6371_v0  ;;  %6096 = vmatpush3.msra.mxu0 %v6669_v51  ;;  %v7387_v5 = vpop.f32.mrf.mxu0 }
  0xe4   : > { %6107 = vmatpush3.msra.mxu1 %v6672_v52  ;;  %v7389_v6 = vpop.f32.mrf.mxu1  ;;  %6097 = vmatprep.subr.mxu0 %v6371_v0 }
  0xe5   : > { %6108 = vmatprep.subr.mxu1 %v6371_v0  ;;  %6098 = vmatpush3.msra.mxu0 %v6679_v53  ;;  %v5665_v7 = vpop.f32.mrf.mxu0  ;;  %v7968_v53 = vld [vmem:[#allocation22_spill] sm:$0xff] }
  0xe6   : > { %6109 = vmatpush3.msra.mxu1 %v6682_v54  ;;  %v5676_v8 = vpop.f32.mrf.mxu1  ;;  %6099 = vmatprep.subr.mxu0 %v6371_v0  ;;  %v7969_v54 = vld [vmem:[#allocation23_spill] sm:$0xff]  ;;  %v7978_v7 = vld [vmem:[#allocation32_spill] sm:$0xff] }
  0xe7   : > { %6110 = vmatprep.subr.mxu1 %v6371_v0  ;;  %6100 = vmatpush3.msra.mxu0 %v6689_v55  ;;  %v7979_v8 = vld [vmem:[#allocation33_spill] sm:$0xff] }
  0xe8   : > { %6111 = vmatpush3.msra.mxu1 %v6692_v56  ;;  %6101 = vmatprep.subr.mxu0 %v6371_v0 }
  0xe9   : > { %6112 = vmatprep.subr.mxu1 %v6371_v0  ;;  %6102 = vmatpush3.msra.mxu0 %v7944_v11  ;;  %v7980_v11 = vld [vmem:[#allocation34_spill] sm:$0xff] }
  0xea   : > { %6103 = vmatprep.mubr.msk.f32.mxu0 %vm6372_vm0, %v6371_v0  ;;  %6113 = vmatpush3.msra.mxu1 %v7945_v12  ;;  %v7981_v12 = vld [vmem:[#allocation35_spill] sm:$0xff] }
  0xeb   : > { %6114 = vmatprep.mubr.msk.f32.mxu1 %vm6372_vm0, %v6371_v0  ;;  %6104 = vmatmul.mubr.msk.f32.vlgmr.msra.gmra.mxu0 %vm474_vm1, %v7946_v13  ;;  %v6349_v13 = vld [vmem:[%s6456_s28 + $0x4] sm:$0x3] }
  0xec   : > { %6115 = vmatmul.mubr.msk.f32.vlgmr.msra.gmra.mxu1 %vm474_vm1, %v7947_v14  ;;  %6117 = vmatprep.subr.mxu0 %v6371_v0  ;;  %v6350_v14 = vld [vmem:[%s6456_s28 + $0x6] sm:$0x3] }
  0xed   : > { %6128 = vmatprep.subr.mxu1 %v6371_v0  ;;  %6118 = vmatpush3.msra.mxu0 %v7948_v15  ;;  %v7415_v17 = vpop.f32.mrf.mxu0  ;;  %v7982_v15 = vld [vmem:[#allocation36_spill] sm:$0xff] }
  0xee   : > { %6129 = vmatpush3.msra.mxu1 %v7949_v16  ;;  %v7417_v18 = vpop.f32.mrf.mxu1  ;;  %6119 = vmatprep.subr.mxu0 %v6371_v0  ;;  %v7983_v16 = vld [vmem:[#allocation37_spill] sm:$0xff] }
  0xef   : > { %6130 = vmatprep.subr.mxu1 %v6371_v0  ;;  %6120 = vmatpush3.msra.mxu0 %v7950_v21  ;;  %v5687_v23 = vpop.f32.mrf.mxu0 }
  0xf0   : > { %6131 = vmatpush3.msra.mxu1 %v7951_v22  ;;  %v5698_v24 = vpop.f32.mrf.mxu1  ;;  %6121 = vmatprep.subr.mxu0 %v6371_v0  ;;  %v7984_v23 = vld [vmem:[#allocation38_spill] sm:$0xff] }
  0xf1   : > { %6132 = vmatprep.subr.mxu1 %v6371_v0  ;;  %6122 = vmatpush3.msra.mxu0 %v7952_v25  ;;  %v7985_v24 = vld [vmem:[#allocation39_spill] sm:$0xff] }
  0xf2   : > { %6133 = vmatpush3.msra.mxu1 %v7953_v26  ;;  %6123 = vmatprep.subr.mxu0 %v6371_v0 }
  0xf3   : > { %6134 = vmatprep.subr.mxu1 %v6371_v0  ;;  %6124 = vmatpush3.msra.mxu0 %v7954_v27  ;;  %v7986_v27 = vld [vmem:[#allocation40_spill] sm:$0xff] }
  0xf4   : > { %6125 = vmatprep.mubr.msk.f32.mxu0 %vm6372_vm0, %v6371_v0  ;;  %6135 = vmatpush3.msra.mxu1 %v7955_v28  ;;  %v7987_v28 = vld [vmem:[#allocation41_spill] sm:$0xff] }
  0xf5   : > { %6136 = vmatprep.mubr.msk.f32.mxu1 %vm6372_vm0, %v6371_v0  ;;  %6126 = vmatmul.mubr.msk.f32.vlgmr.msra.gmra.mxu0 %vm474_vm1, %v7956_v31  ;;  %v7988_v31 = vld [vmem:[#allocation42_spill] sm:$0xff] }
  0xf6   : > { %6137 = vmatmul.mubr.msk.f32.vlgmr.msra.gmra.mxu1 %vm474_vm1, %v7957_v32  ;;  %6139 = vmatprep.subr.mxu0 %v6371_v0  ;;  %v7989_v32 = vld [vmem:[#allocation43_spill] sm:$0xff] }
  0xf7   : > { %6150 = vmatprep.subr.mxu1 %v6371_v0  ;;  %6140 = vmatpush3.msra.mxu0 %v7958_v33  ;;  %v7443_v35 = vpop.f32.mrf.mxu0  ;;  %v6351_v33 = vld [vmem:[%s6456_s28 + $0x8] sm:$0x3] }
  0xf8   : > { %6151 = vmatpush3.msra.mxu1 %v7959_v34  ;;  %v7445_v36 = vpop.f32.mrf.mxu1  ;;  %6141 = vmatprep.subr.mxu0 %v6371_v0  ;;  %v6352_v34 = vld [vmem:[%s6456_s28 + $0xa] sm:$0x3] }
  0xf9   : > { %6152 = vmatprep.subr.mxu1 %v6371_v0  ;;  %6142 = vmatpush3.msra.mxu0 %v7960_v37  ;;  %v5709_v41 = vpop.f32.mrf.mxu0  ;;  %v7990_v37 = vld [vmem:[#allocation44_spill] sm:$0xff] }
  0xfa   : > { %6153 = vmatpush3.msra.mxu1 %v7961_v38  ;;  %v5720_v42 = vpop.f32.mrf.mxu1  ;;  %6143 = vmatprep.subr.mxu0 %v6371_v0  ;;  %v7991_v38 = vld [vmem:[#allocation45_spill] sm:$0xff] }
  0xfb   : > { %6154 = vmatprep.subr.mxu1 %v6371_v0  ;;  %6144 = vmatpush3.msra.mxu0 %v7962_v43  ;;  %v7992_v43 = vld [vmem:[#allocation46_spill] sm:$0xff] }
  0xfc   : > { %6155 = vmatpush3.msra.mxu1 %v7963_v44  ;;  %6145 = vmatprep.subr.mxu0 %v6371_v0  ;;  %v7993_v44 = vld [vmem:[#allocation47_spill] sm:$0xff] }
  0xfd   : > { %6156 = vmatprep.subr.mxu1 %v6371_v0  ;;  %6146 = vmatpush3.msra.mxu0 %v7964_v45 }
  0xfe   : > { %6147 = vmatprep.mubr.msk.f32.mxu0 %vm6372_vm0, %v6371_v0  ;;  %6157 = vmatpush3.msra.mxu1 %v7965_v46 }
  0xff   : > { %6158 = vmatprep.mubr.msk.f32.mxu1 %vm6372_vm0, %v6371_v0  ;;  %6148 = vmatmul.mubr.msk.f32.vlgmr.msra.gmra.mxu0 %vm474_vm1, %v7244_v57  ;;  %v7970_v57 = vld [vmem:[#allocation24_spill] sm:$0xff] }
 0x100   : > { %6159 = vmatmul.mubr.msk.f32.vlgmr.msra.gmra.mxu1 %vm474_vm1, %v7247_v58  ;;  %6161 = vmatprep.subr.mxu0 %v6371_v0  ;;  %v7971_v58 = vld [vmem:[#allocation25_spill] sm:$0xff] }
 0x101   : > { %6172 = vmatprep.subr.mxu1 %v6371_v0  ;;  %6162 = vmatpush3.msra.mxu0 %v7966_v47  ;;  %v7471_v51 = vpop.f32.mrf.mxu0  ;;  %v7994_v47 = vld [vmem:[#allocation48_spill] sm:$0xff] }
 0x102   : > { %6173 = vmatpush3.msra.mxu1 %v7967_v48  ;;  %v7473_v52 = vpop.f32.mrf.mxu1  ;;  %6163 = vmatprep.subr.mxu0 %v6371_v0  ;;  %v7995_v48 = vld [vmem:[#allocation49_spill] sm:$0xff] }
 0x103   : > { %6174 = vmatprep.subr.mxu1 %v6371_v0  ;;  %6164 = vmatpush3.msra.mxu0 %v7968_v53  ;;  %v5731_v55 = vpop.f32.mrf.mxu0  ;;  %v7996_v53 = vld [vmem:[#allocation50_spill] sm:$0xff] }
 0x104   : > { %6175 = vmatpush3.msra.mxu1 %v7969_v54  ;;  %v5742_v56 = vpop.f32.mrf.mxu1  ;;  %6165 = vmatprep.subr.mxu0 %v6371_v0  ;;  %v7997_v54 = vld [vmem:[#allocation51_spill] sm:$0xff] }
 0x105   : > { %6176 = vmatprep.subr.mxu1 %v6371_v0  ;;  %6166 = vmatpush3.msra.mxu0 %v7970_v57  ;;  %v6353_v55 = vld [vmem:[%s6456_s28 + $0xc] sm:$0x3]  ;;  %v6354_v56 = vld [vmem:[%s6456_s28 + $0xe] sm:$0x3]  ;;  %v7998_v57 = vld [vmem:[#allocation52_spill] sm:$0xff] }
 0x106   : > { %6177 = vmatpush3.msra.mxu1 %v7971_v58  ;;  %6167 = vmatprep.subr.mxu0 %v6371_v0  ;;  %v7999_v58 = vld [vmem:[#allocation53_spill] sm:$0xff] }
 0x107   : > { %6178 = vmatprep.subr.mxu1 %v6371_v0  ;;  %6168 = vmatpush3.msra.mxu0 %v7972_v19 }
 0x108   : > { %6169 = vmatprep.mubr.msk.f32.mxu0 %vm6372_vm0, %v6371_v0  ;;  %6179 = vmatpush3.msra.mxu1 %v7973_v20 }
 0x109   : > { %6180 = vmatprep.mubr.msk.f32.mxu1 %vm6372_vm0, %v6371_v0  ;;  %6170 = vmatmul.mubr.msk.f32.vlgmr.msra.gmra.mxu0 %vm474_vm1, %v6347_v29 }
 0x10a   : > { %6181 = vmatmul.mubr.msk.f32.vlgmr.msra.gmra.mxu1 %vm474_vm1, %v6348_v40  ;;  %6183 = vmatprep.subr.mxu0 %v6371_v0 }
 0x10b   : > { %6194 = vmatprep.subr.mxu1 %v6371_v0  ;;  %6184 = vmatpush3.msra.mxu0 %v7974_v59  ;;  %v7499_v30 = vpop.f32.mrf.mxu0  ;;  %v8000_v59 = vld [vmem:[#allocation54_spill] sm:$0xff] }
 0x10c   : > { %6195 = vmatpush3.msra.mxu1 %v7975_v60  ;;  %v7501_v39 = vpop.f32.mrf.mxu1  ;;  %6185 = vmatprep.subr.mxu0 %v6371_v0  ;;  %v8001_v60 = vld [vmem:[#allocation55_spill] sm:$0xff] }
 0x10d   : > { %6196 = vmatprep.subr.mxu1 %v6371_v0  ;;  %6186 = vmatpush3.msra.mxu0 %v7976_v50  ;;  %v5753_v3 = vpop.f32.mrf.mxu0 }
 0x10e   : > { %6197 = vmatpush3.msra.mxu1 %v7977_v49  ;;  %v5764_v4 = vpop.f32.mrf.mxu1  ;;  %6187 = vmatprep.subr.mxu0 %v6371_v0  ;;  %v8002_v3 = vld [vmem:[#allocation56_spill] sm:$0xff] }
 0x10f   : > { %6198 = vmatprep.subr.mxu1 %v6371_v0  ;;  %6188 = vmatpush3.msra.mxu0 %v7978_v7  ;;  %v8005_v4 = vld [vmem:[#allocation59_spill] sm:$0xff]  ;;  %v6355_v7 = vld [vmem:[%s6456_s28 + $0x10] sm:$0x3] }
 0x110   : > { %6199 = vmatpush3.msra.mxu1 %v7979_v8  ;;  %6189 = vmatprep.subr.mxu0 %v6371_v0  ;;  %v6356_v8 = vld [vmem:[%s6456_s28 + $0x12] sm:$0x3] }
 0x111   : > { %6200 = vmatprep.subr.mxu1 %v6371_v0  ;;  %6190 = vmatpush3.msra.mxu0 %v7980_v11  ;;  %v8006_v11 = vld [vmem:[#allocation60_spill] sm:$0xff] }
 0x112   : > { %6191 = vmatprep.mubr.msk.f32.mxu0 %vm6372_vm0, %v6371_v0  ;;  %6201 = vmatpush3.msra.mxu1 %v7981_v12  ;;  %v8007_v12 = vld [vmem:[#allocation61_spill] sm:$0xff] }
 0x113   : > { %6202 = vmatprep.mubr.msk.f32.mxu1 %vm6372_vm0, %v6371_v0  ;;  %6192 = vmatmul.mubr.msk.f32.vlgmr.msra.gmra.mxu0 %vm474_vm1, %v6349_v13 }
 0x114   : > { %6203 = vmatmul.mubr.msk.f32.vlgmr.msra.gmra.mxu1 %vm474_vm1, %v6350_v14  ;;  %6205 = vmatprep.subr.mxu0 %v6371_v0 }
 0x115   : > { %6216 = vmatprep.subr.mxu1 %v6371_v0  ;;  %6206 = vmatpush3.msra.mxu0 %v7982_v15  ;;  %v7527_v21 = vpop.f32.mrf.mxu0 }
 0x116   : > { %6217 = vmatpush3.msra.mxu1 %v7983_v16  ;;  %v7529_v22 = vpop.f32.mrf.mxu1  ;;  %6207 = vmatprep.subr.mxu0 %v6371_v0 }
 0x117   : > { %6218 = vmatprep.subr.mxu1 %v6371_v0  ;;  %6208 = vmatpush3.msra.mxu0 %v7984_v23  ;;  %v5775_v25 = vpop.f32.mrf.mxu0  ;;  %v8008_v23 = vld [vmem:[#allocation62_spill] sm:$0xff] }
 0x118   : > { %6219 = vmatpush3.msra.mxu1 %v7985_v24  ;;  %v5786_v26 = vpop.f32.mrf.mxu1  ;;  %6209 = vmatprep.subr.mxu0 %v6371_v0  ;;  %v8009_v24 = vld [vmem:[#allocation63_spill] sm:$0xff] }
 0x119   : > { %6220 = vmatprep.subr.mxu1 %v6371_v0  ;;  %6210 = vmatpush3.msra.mxu0 %v7986_v27  ;;  %v8010_v27 = vld [vmem:[#allocation64_spill] sm:$0xff] }
 0x11a   : > { %6221 = vmatpush3.msra.mxu1 %v7987_v28  ;;  %6211 = vmatprep.subr.mxu0 %v6371_v0  ;;  %v8013_v28 = vld [vmem:[#allocation67_spill] sm:$0xff] }
 0x11b   : > { %6222 = vmatprep.subr.mxu1 %v6371_v0  ;;  %6212 = vmatpush3.msra.mxu0 %v7988_v31  ;;  %v6357_v31 = vld [vmem:[%s6456_s28 + $0x14] sm:$0x3] }
 0x11c   : > { %6213 = vmatprep.mubr.msk.f32.mxu0 %vm6372_vm0, %v6371_v0  ;;  %6223 = vmatpush3.msra.mxu1 %v7989_v32  ;;  %v6358_v32 = vld [vmem:[%s6456_s28 + $0x16] sm:$0x3] }
 0x11d   : > { %6224 = vmatprep.mubr.msk.f32.mxu1 %vm6372_vm0, %v6371_v0  ;;  %6214 = vmatmul.mubr.msk.f32.vlgmr.msra.gmra.mxu0 %vm474_vm1, %v6351_v33  ;;  %v8014_v33 = vld [vmem:[#allocation70_spill] sm:$0xff] }
 0x11e   : > { %6225 = vmatmul.mubr.msk.f32.vlgmr.msra.gmra.mxu1 %vm474_vm1, %v6352_v34  ;;  %6227 = vmatprep.subr.mxu0 %v6371_v0  ;;  %v8015_v34 = vld [vmem:[#allocation71_spill] sm:$0xff] }
 0x11f   : > { %6238 = vmatprep.subr.mxu1 %v6371_v0  ;;  %6228 = vmatpush3.msra.mxu0 %v7990_v37  ;;  %v7555_v41 = vpop.f32.mrf.mxu0 }
 0x120   : > { %6239 = vmatpush3.msra.mxu1 %v7991_v38  ;;  %v7557_v42 = vpop.f32.mrf.mxu1  ;;  %6229 = vmatprep.subr.mxu0 %v6371_v0 }
 0x121   : > { %6240 = vmatprep.subr.mxu1 %v6371_v0  ;;  %6230 = vmatpush3.msra.mxu0 %v7992_v43  ;;  %v5797_v45 = vpop.f32.mrf.mxu0 }
 0x122   : > { %6241 = vmatpush3.msra.mxu1 %v7993_v44  ;;  %v5808_v46 = vpop.f32.mrf.mxu1  ;;  %6231 = vmatprep.subr.mxu0 %v6371_v0  ;;  %v8016_v45 = vld [vmem:[#allocation72_spill] sm:$0xff] }
 0x123   : > { %6242 = vmatprep.subr.mxu1 %v6371_v0  ;;  %6232 = vmatpush3.msra.mxu0 %v7994_v47  ;;  %v8017_v46 = vld [vmem:[#allocation73_spill] sm:$0xff] }
 0x124   : > { %6243 = vmatpush3.msra.mxu1 %v7995_v48  ;;  %6233 = vmatprep.subr.mxu0 %v6371_v0 }
 0x125   : > { %6244 = vmatprep.subr.mxu1 %v6371_v0  ;;  %6234 = vmatpush3.msra.mxu0 %v7996_v53  ;;  %v8018_v53 = vld [vmem:[#allocation74_spill] sm:$0xff] }
 0x126   : > { %6235 = vmatprep.mubr.msk.f32.mxu0 %vm6372_vm0, %v6371_v0  ;;  %6245 = vmatpush3.msra.mxu1 %v7997_v54  ;;  %v8021_v54 = vld [vmem:[#allocation77_spill] sm:$0xff] }
 0x127   : > { %6246 = vmatprep.mubr.msk.f32.mxu1 %vm6372_vm0, %v6371_v0  ;;  %6236 = vmatmul.mubr.msk.f32.vlgmr.msra.gmra.mxu0 %vm474_vm1, %v6353_v55  ;;  %v6359_v55 = vld [vmem:[%s6456_s28 + $0x18] sm:$0x3] }
 0x128   : > { %6247 = vmatmul.mubr.msk.f32.vlgmr.msra.gmra.mxu1 %vm474_vm1, %v6354_v56  ;;  %6249 = vmatprep.subr.mxu0 %v6371_v0  ;;  %v6360_v56 = vld [vmem:[%s6456_s28 + $0x1a] sm:$0x3] }
 0x129   : > { %6260 = vmatprep.subr.mxu1 %v6371_v0  ;;  %6250 = vmatpush3.msra.mxu0 %v7998_v57  ;;  %v1712_v19 = vpop.f32.mrf.mxu0  ;;  %v8022_v57 = vld [vmem:[#allocation80_spill] sm:$0xff] }
 0x12a   : > { %6261 = vmatpush3.msra.mxu1 %v7999_v58  ;;  %v1785_v20 = vpop.f32.mrf.mxu1  ;;  %6251 = vmatprep.subr.mxu0 %v6371_v0  ;;  %v2811_v29 = vsub.f32 %v7359_v1, %v1712_v19  ;;  %v8003_v1 = vld [vmem:[#allocation57_spill] sm:$0xff] }
 0x12b   : > { %6262 = vmatprep.subr.mxu1 %v6371_v0  ;;  %v2812_v40 = vsub.f32 %v7361_v2, %v1785_v20  ;;  %6252 = vmatpush3.msra.mxu0 %v8000_v59  ;;  %v5819_v50 = vpop.f32.mrf.mxu0  ;;  %v8004_v2 = vld [vmem:[#allocation58_spill] sm:$0xff]  ;;  %v8023_v58 = vld [vmem:[#allocation81_spill] sm:$0xff] }
 0x12c   : > { %6263 = vmatpush3.msra.mxu1 %v8001_v60  ;;  %v5830_v49 = vpop.f32.mrf.mxu1  ;;  %6253 = vmatprep.subr.mxu0 %v6371_v0  ;;  %2828 = vst.msk [vmem:[%s7587_s12] sm:$0x3] %vm2827_vm2, %v2811_v29  ;;  %v8024_v59 = vld [vmem:[#allocation82_spill] sm:$0xff] }
 0x12d   : > { %6264 = vmatprep.subr.mxu1 %v6371_v0  ;;  %2829 = vst.msk [vmem:[%s7587_s12 + $0x2] sm:$0x3] %vm2827_vm2, %v2812_v40  ;;  %6254 = vmatpush3.msra.mxu0 %v8002_v3 }
 0x12e   : > { %6265 = vmatpush3.msra.mxu1 %v8003_v1  ;;  %6255 = vmatprep.subr.mxu0 %v6371_v0 }
 0x12f   : > { %6266 = vmatprep.subr.mxu1 %v6371_v0  ;;  %6256 = vmatpush3.msra.mxu0 %v8004_v2 }
 0x130   : > { %6257 = vmatprep.mubr.msk.f32.mxu0 %vm6372_vm0, %v6371_v0  ;;  %6267 = vmatpush3.msra.mxu1 %v8005_v4 }
 0x131   : > { %6268 = vmatprep.mubr.msk.f32.mxu1 %vm6372_vm0, %v6371_v0  ;;  %6258 = vmatmul.mubr.msk.f32.vlgmr.msra.gmra.mxu0 %vm474_vm1, %v6355_v7 }
 0x132   : > { %6269 = vmatmul.mubr.msk.f32.vlgmr.msra.gmra.mxu1 %vm474_vm1, %v6356_v8  ;;  %6271 = vmatprep.subr.mxu0 %v6371_v0 }
 0x133   : > { %6282 = vmatprep.subr.mxu1 %v6371_v0  ;;  %6272 = vmatpush3.msra.mxu0 %v8006_v11  ;;  %v1858_v13 = vpop.f32.mrf.mxu0 }
 0x134   : > { %6283 = vmatpush3.msra.mxu1 %v8007_v12  ;;  %v1931_v14 = vpop.f32.mrf.mxu1  ;;  %6273 = vmatprep.subr.mxu0 %v6371_v0  ;;  %v2813_v15 = vsub.f32 %v7387_v5, %v1858_v13  ;;  %v8011_v5 = vld [vmem:[#allocation65_spill] sm:$0xff] }
 0x135   : > { %6284 = vmatprep.subr.mxu1 %v6371_v0  ;;  %v2814_v16 = vsub.f32 %v7389_v6, %v1931_v14  ;;  %6274 = vmatpush3.msra.mxu0 %v8008_v23  ;;  %v5841_v25 = vpop.f32.mrf.mxu0  ;;  %v8012_v6 = vld [vmem:[#allocation66_spill] sm:$0xff] }
 0x136   : > { %6285 = vmatpush3.msra.mxu1 %v8009_v24  ;;  %v5852_v26 = vpop.f32.mrf.mxu1  ;;  %6275 = vmatprep.subr.mxu0 %v6371_v0  ;;  %2830 = vst.msk [vmem:[%s7587_s12 + $0x4] sm:$0x3] %vm2827_vm2, %v2813_v15 }
 0x137   : > { %6286 = vmatprep.subr.mxu1 %v6371_v0  ;;  %2831 = vst.msk [vmem:[%s7587_s12 + $0x6] sm:$0x3] %vm2827_vm2, %v2814_v16  ;;  %6276 = vmatpush3.msra.mxu0 %v8010_v27 }
 0x138   : > { %6287 = vmatpush3.msra.mxu1 %v8011_v5  ;;  %6277 = vmatprep.subr.mxu0 %v6371_v0 }
 0x139   : > { %6288 = vmatprep.subr.mxu1 %v6371_v0  ;;  %6278 = vmatpush3.msra.mxu0 %v8012_v6 }
 0x13a   : > { %6279 = vmatprep.mubr.msk.f32.mxu0 %vm6372_vm0, %v6371_v0  ;;  %6289 = vmatpush3.msra.mxu1 %v8013_v28 }
 0x13b   : > { %6290 = vmatprep.mubr.msk.f32.mxu1 %vm6372_vm0, %v6371_v0  ;;  %6280 = vmatmul.mubr.msk.f32.vlgmr.msra.gmra.mxu0 %vm474_vm1, %v6357_v31 }
 0x13c   : > { %6291 = vmatmul.mubr.msk.f32.vlgmr.msra.gmra.mxu1 %vm474_vm1, %v6358_v32  ;;  %6293 = vmatprep.subr.mxu0 %v6371_v0 }
 0x13d   : > { %6304 = vmatprep.subr.mxu1 %v6371_v0  ;;  %6294 = vmatpush3.msra.mxu0 %v8014_v33  ;;  %v2004_v37 = vpop.f32.mrf.mxu0 }
 0x13e   : > { %6305 = vmatpush3.msra.mxu1 %v8015_v34  ;;  %v2077_v38 = vpop.f32.mrf.mxu1  ;;  %6295 = vmatprep.subr.mxu0 %v6371_v0  ;;  %v2815_v43 = vsub.f32 %v7415_v17, %v2004_v37  ;;  %v8019_v17 = vld [vmem:[#allocation75_spill] sm:$0xff] }
 0x13f   : > { %6306 = vmatprep.subr.mxu1 %v6371_v0  ;;  %v2816_v44 = vsub.f32 %v7417_v18, %v2077_v38  ;;  %6296 = vmatpush3.msra.mxu0 %v8016_v45  ;;  %v5863_v47 = vpop.f32.mrf.mxu0  ;;  %v8020_v18 = vld [vmem:[#allocation76_spill] sm:$0xff] }
 0x140   : > { %6307 = vmatpush3.msra.mxu1 %v8017_v46  ;;  %v5874_v48 = vpop.f32.mrf.mxu1  ;;  %6297 = vmatprep.subr.mxu0 %v6371_v0  ;;  %2832 = vst.msk [vmem:[%s7587_s12 + $0x8] sm:$0x3] %vm2827_vm2, %v2815_v43 }
 0x141   : > { %6308 = vmatprep.subr.mxu1 %v6371_v0  ;;  %2833 = vst.msk [vmem:[%s7587_s12 + $0xa] sm:$0x3] %vm2827_vm2, %v2816_v44  ;;  %6298 = vmatpush3.msra.mxu0 %v8018_v53 }
 0x142   : > { %6309 = vmatpush3.msra.mxu1 %v8019_v17  ;;  %6299 = vmatprep.subr.mxu0 %v6371_v0 }
 0x143   : > { %6310 = vmatprep.subr.mxu1 %v6371_v0  ;;  %6300 = vmatpush3.msra.mxu0 %v8020_v18 }
 0x144   : > { %6301 = vmatprep.mubr.msk.f32.mxu0 %vm6372_vm0, %v6371_v0  ;;  %6311 = vmatpush3.msra.mxu1 %v8021_v54 }
 0x145   : > { %6312 = vmatprep.mubr.msk.f32.mxu1 %vm6372_vm0, %v6371_v0  ;;  %6302 = vmatmul.mubr.msk.f32.vlgmr.msra.gmra.mxu0 %vm474_vm1, %v6359_v55 }
 0x146   : > { %6313 = vmatmul.mubr.msk.f32.vlgmr.msra.gmra.mxu1 %vm474_vm1, %v6360_v56  ;;  %6315 = vmatprep.subr.mxu0 %v6371_v0 }
 0x147   : > { %6326 = vmatprep.subr.mxu1 %v6371_v0  ;;  %6316 = vmatpush3.msra.mxu0 %v8022_v57  ;;  %v2150_v19 = vpop.f32.mrf.mxu0 }
 0x148   : > { %6327 = vmatpush3.msra.mxu1 %v8023_v58  ;;  %v2223_v20 = vpop.f32.mrf.mxu1  ;;  %6317 = vmatprep.subr.mxu0 %v6371_v0  ;;  %v2817_v29 = vsub.f32 %v7443_v35, %v2150_v19 }
 0x149   : > { %6328 = vmatprep.subr.mxu1 %v6371_v0  ;;  %v2818_v40 = vsub.f32 %v7445_v36, %v2223_v20  ;;  %6318 = vmatpush3.msra.mxu0 %v8024_v59  ;;  %v5885_v60 = vpop.f32.mrf.mxu0 }
 0x14a   : > { %6329 = vmatpush3.msra.mxu1 %v7217_v61  ;;  %v5896_v50 = vpop.f32.mrf.mxu1  ;;  %6319 = vmatprep.subr.mxu0 %v6371_v0  ;;  %2834 = vst.msk [vmem:[%s7587_s12 + $0xc] sm:$0x3] %vm2827_vm2, %v2817_v29  ;;  %v6361_v61 = vld [vmem:[%s6456_s28 + $0x1c] sm:$0x3] }
 0x14b   : > { %6330 = vmatprep.subr.mxu1 %v6371_v0  ;;  %2835 = vst.msk [vmem:[%s7587_s12 + $0xe] sm:$0x3] %vm2827_vm2, %v2818_v40  ;;  %6320 = vmatpush3.msra.mxu0 %v7224_v62  ;;  %v6362_v62 = vld [vmem:[%s6456_s28 + $0x1e] sm:$0x3] }
 0x14c   : > { %6331 = vmatpush3.msra.mxu1 %v7227_v63  ;;  %6321 = vmatprep.subr.mxu0 %v6371_v0 }
 0x14d   : > { %6332 = vmatprep.subr.mxu1 %v6371_v0  ;;  %6322 = vmatpush3.msra.mxu0 %v7234_v10 }
 0x14e   : > { %6323 = vmatprep.mubr.msk.f32.mxu0 %vm6372_vm0, %v6371_v0  ;;  %6333 = vmatpush3.msra.mxu1 %v7239_v9 }
 0x14f   : > { %6334 = vmatprep.mubr.msk.f32.mxu1 %vm6372_vm0, %v6371_v0  ;;  %6324 = vmatmul.mubr.msk.f32.vlgmr.msra.gmra.mxu0 %vm474_vm1, %v6361_v61 }
 0x150   : > { %6335 = vmatmul.mubr.msk.f32.vlgmr.msra.gmra.mxu1 %vm474_vm1, %v6362_v62 }
 0x151   : > { %v2296_v63 = vpop.f32.mrf.mxu0 }
 0x152   : > { %v2369_v35 = vpop.f32.mrf.mxu1  ;;  %v2819_v10 = vsub.f32 %v7471_v51, %v2296_v63 }
 0x153   : > { %v2820_v36 = vsub.f32 %v7473_v52, %v2369_v35  ;;  %v5907_v49 = vpop.f32.mrf.mxu0 }
 0x154   : > { %v5918_v3 = vpop.f32.mrf.mxu1  ;;  %2836 = vst.msk [vmem:[%s7587_s12 + $0x10] sm:$0x3] %vm2827_vm2, %v2819_v10 }
 0x155   : > { %2837 = vst.msk [vmem:[%s7587_s12 + $0x12] sm:$0x3] %vm2827_vm2, %v2820_v36 }
 0x15b   : > { %v2442_v0 = vpop.f32.mrf.mxu0 }
 0x15c   : > { %v2515_v9 = vpop.f32.mrf.mxu1  ;;  %v2821_v1 = vsub.f32 %v7499_v30, %v2442_v0 }
 0x15d   : > { %v2822_v2 = vsub.f32 %v7501_v39, %v2515_v9  ;;  %v5929_v4 = vpop.f32.mrf.mxu0 }
 0x15e   : > { %v5940_v7 = vpop.f32.mrf.mxu1  ;;  %2838 = vst.msk [vmem:[%s7587_s12 + $0x14] sm:$0x3] %vm2827_vm2, %v2821_v1 }
 0x15f   : > { %2839 = vst.msk [vmem:[%s7587_s12 + $0x16] sm:$0x3] %vm2827_vm2, %v2822_v2 }
 0x165   : > { %v2588_v51 = vpop.f32.mrf.mxu0 }
 0x166   : > { %v2661_v52 = vpop.f32.mrf.mxu1  ;;  %v2823_v8 = vsub.f32 %v7527_v21, %v2588_v51 }
 0x167   : > { %v2824_v11 = vsub.f32 %v7529_v22, %v2661_v52  ;;  %v5951_v12 = vpop.f32.mrf.mxu0 }
 0x168   : > { %v5962_v13 = vpop.f32.mrf.mxu1  ;;  %2840 = vst.msk [vmem:[%s7587_s12 + $0x18] sm:$0x3] %vm2827_vm2, %v2823_v8 }
 0x169   : > { %2841 = vst.msk [vmem:[%s7587_s12 + $0x1a] sm:$0x3] %vm2827_vm2, %v2824_v11 }
 0x16f   : > { %v2734_v30 = vpop.f32.mrf.mxu0 }
 0x170   : > { %v2807_v39 = vpop.f32.mrf.mxu1  ;;  %v2825_v14 = vsub.f32 %v7555_v41, %v2734_v30 }
 0x171   : > { %v2826_v15 = vsub.f32 %v7557_v42, %v2807_v39  ;;  %v5973_v16 = vpop.f32.mrf.mxu0 }
 0x172   : > { %v5984_v23 = vpop.f32.mrf.mxu1  ;;  %2842 = vst.msk [vmem:[%s7587_s12 + $0x1c] sm:$0x3] %vm2827_vm2, %v2825_v14 }
 0x173   : > { %2843 = vst.msk [vmem:[%s7587_s12 + $0x1e] sm:$0x3] %vm2827_vm2, %v2826_v15 }
 0x179   : > { %v2910_v21 = vpop.f32.mrf.mxu0 }
 0x17a   : > { %v2980_v22 = vpop.f32.mrf.mxu1 }
 0x17b   : > { %v5995_v24 = vpop.f32.mrf.mxu0 }
 0x17c   : > { %v6006_v25 = vpop.f32.mrf.mxu1 }
 0x183   : > { %v3050_v26 = vpop.f32.mrf.mxu0 }
 0x184   : > { %v3120_v27 = vpop.f32.mrf.mxu1 }
 0x185   : > { %v6017_v5 = vpop.f32.mrf.mxu0 }
 0x186   : > { %v6028_v6 = vpop.f32.mrf.mxu1 }
 0x18d   : > { %v3190_v28 = vpop.f32.mrf.mxu0 }
 0x18e   : > { %v3260_v31 = vpop.f32.mrf.mxu1 }
 0x18f   : > { %v6039_v32 = vpop.f32.mrf.mxu0 }
 0x190   : > { %v6050_v41 = vpop.f32.mrf.mxu1 }
 0x197   : > { %v3330_v33 = vpop.f32.mrf.mxu0 }
 0x198   : > { %v3400_v42 = vpop.f32.mrf.mxu1 }
 0x199   : > { %v6061_v34 = vpop.f32.mrf.mxu0 }
 0x19a   : > { %v6072_v37 = vpop.f32.mrf.mxu1 }
 0x1a1   : > { %v3470_v38 = vpop.f32.mrf.mxu0 }
 0x1a2   : > { %v3540_v43 = vpop.f32.mrf.mxu1 }
 0x1a3   : > { %v6083_v44 = vpop.f32.mrf.mxu0 }
 0x1a4   : > { %v6094_v45 = vpop.f32.mrf.mxu1 }
 0x1ab   : > { %v3610_v46 = vpop.f32.mrf.mxu0 }
 0x1ac   : > { %v3680_v47 = vpop.f32.mrf.mxu1 }
 0x1ad   : > { %v6105_v48 = vpop.f32.mrf.mxu0 }
 0x1ae   : > { %v6116_v53 = vpop.f32.mrf.mxu1 }
 0x1b5   : > { %v3750_v17 = vpop.f32.mrf.mxu0 }
 0x1b6   : > { %v3820_v18 = vpop.f32.mrf.mxu1 }
 0x1b7   : > { %v6127_v54 = vpop.f32.mrf.mxu0 }
 0x1b8   : > { %v6138_v55 = vpop.f32.mrf.mxu1 }
 0x1bf   : > { %v7729_v56 = vpop.f32.mrf.mxu0 }
 0x1c0   : > { %v7731_v57 = vpop.f32.mrf.mxu1 }
 0x1c1   : > { %v6149_v58 = vpop.f32.mrf.mxu0 }
 0x1c2   : > { %v6160_v19 = vpop.f32.mrf.mxu1 }
 0x1c9   : > { %v4030_v20 = vpop.f32.mrf.mxu0 }
 0x1ca   : > { %v4100_v29 = vpop.f32.mrf.mxu1  ;;  %v4031_v40 = vadd.f32 %v4030_v20, %v2910_v21 }
 0x1cb   : > { %v4101_v59 = vadd.f32 %v4100_v29, %v2980_v22  ;;  %v6171_v60 = vpop.f32.mrf.mxu0 }
 0x1cc   : > { %v6182_v50 = vpop.f32.mrf.mxu1  ;;  %5084 = vst.msk [vmem:[%s7737_s15] sm:$0x3] %vm2827_vm2, %v4031_v40 }
 0x1cd   : > { %5085 = vst.msk [vmem:[%s7737_s15 + $0x2] sm:$0x3] %vm2827_vm2, %v4101_v59 }
 0x1d3   : > { %v4170_v61 = vpop.f32.mrf.mxu0 }
 0x1d4   : > { %v4240_v62 = vpop.f32.mrf.mxu1  ;;  %v4171_v63 = vadd.f32 %v4170_v61, %v3050_v26 }
 0x1d5   : > { %v4241_v35 = vadd.f32 %v4240_v62, %v3120_v27  ;;  %v6193_v10 = vpop.f32.mrf.mxu0 }
 0x1d6   : > { %v6204_v36 = vpop.f32.mrf.mxu1  ;;  %5086 = vst.msk [vmem:[%s7737_s15 + $0x4] sm:$0x3] %vm2827_vm2, %v4171_v63 }
 0x1d7   : > { %5087 = vst.msk [vmem:[%s7737_s15 + $0x6] sm:$0x3] %vm2827_vm2, %v4241_v35 }
 0x1dd   : > { %v4310_v49 = vpop.f32.mrf.mxu0 }
 0x1de   : > { %v4380_v3 = vpop.f32.mrf.mxu1  ;;  %v4311_v0 = vadd.f32 %v4310_v49, %v3190_v28 }
 0x1df   : > { %v4381_v9 = vadd.f32 %v4380_v3, %v3260_v31  ;;  %v6215_v1 = vpop.f32.mrf.mxu0 }
 0x1e0   : > { %v6226_v2 = vpop.f32.mrf.mxu1  ;;  %5088 = vst.msk [vmem:[%s7737_s15 + $0x8] sm:$0x3] %vm2827_vm2, %v4311_v0 }
 0x1e1   : > { %5089 = vst.msk [vmem:[%s7737_s15 + $0xa] sm:$0x3] %vm2827_vm2, %v4381_v9 }
 0x1e7   : > { %v4450_v4 = vpop.f32.mrf.mxu0 }
 0x1e8   : > { %v4520_v7 = vpop.f32.mrf.mxu1  ;;  %v4451_v51 = vadd.f32 %v4450_v4, %v3330_v33 }
 0x1e9   : > { %v4521_v52 = vadd.f32 %v4520_v7, %v3400_v42  ;;  %v6237_v8 = vpop.f32.mrf.mxu0 }
 0x1ea   : > { %v6248_v11 = vpop.f32.mrf.mxu1  ;;  %5090 = vst.msk [vmem:[%s7737_s15 + $0xc] sm:$0x3] %vm2827_vm2, %v4451_v51 }
 0x1eb   : > { %5091 = vst.msk [vmem:[%s7737_s15 + $0xe] sm:$0x3] %vm2827_vm2, %v4521_v52 }
 0x1f1   : > { %v4590_v12 = vpop.f32.mrf.mxu0 }
 0x1f2   : > { %v4660_v13 = vpop.f32.mrf.mxu1  ;;  %v4591_v30 = vadd.f32 %v4590_v12, %v3470_v38 }
 0x1f3   : > { %v4661_v39 = vadd.f32 %v4660_v13, %v3540_v43  ;;  %v6259_v14 = vpop.f32.mrf.mxu0 }
 0x1f4   : > { %v6270_v15 = vpop.f32.mrf.mxu1  ;;  %5092 = vst.msk [vmem:[%s7737_s15 + $0x10] sm:$0x3] %vm2827_vm2, %v4591_v30 }
 0x1f5   : > { %5093 = vst.msk [vmem:[%s7737_s15 + $0x12] sm:$0x3] %vm2827_vm2, %v4661_v39 }
 0x1fb   : > { %v4730_v16 = vpop.f32.mrf.mxu0 }
 0x1fc   : > { %v4800_v23 = vpop.f32.mrf.mxu1  ;;  %v4731_v21 = vadd.f32 %v4730_v16, %v3610_v46 }
 0x1fd   : > { %v4801_v22 = vadd.f32 %v4800_v23, %v3680_v47  ;;  %v6281_v24 = vpop.f32.mrf.mxu0 }
 0x1fe   : > { %v6292_v25 = vpop.f32.mrf.mxu1  ;;  %5094 = vst.msk [vmem:[%s7737_s15 + $0x14] sm:$0x3] %vm2827_vm2, %v4731_v21 }
 0x1ff   : > { %5095 = vst.msk [vmem:[%s7737_s15 + $0x16] sm:$0x3] %vm2827_vm2, %v4801_v22 }
 0x205   : > { %v4870_v26 = vpop.f32.mrf.mxu0 }
 0x206   : > { %v4940_v27 = vpop.f32.mrf.mxu1  ;;  %v4871_v5 = vadd.f32 %v4870_v26, %v3750_v17 }
 0x207   : > { %v4941_v6 = vadd.f32 %v4940_v27, %v3820_v18  ;;  %v6303_v28 = vpop.f32.mrf.mxu0 }
 0x208   : > { %v6314_v31 = vpop.f32.mrf.mxu1  ;;  %5096 = vst.msk [vmem:[%s7737_s15 + $0x18] sm:$0x3] %vm2827_vm2, %v4871_v5 }
 0x209   : > { %5097 = vst.msk [vmem:[%s7737_s15 + $0x1a] sm:$0x3] %vm2827_vm2, %v4941_v6 }
 0x20f   : > { %v5010_v32 = vpop.f32.mrf.mxu0 }
 0x210   : > { %v5080_v41 = vpop.f32.mrf.mxu1  ;;  %v5011_v33 = vadd.f32 %v5010_v32, %v7729_v56 }
 0x211   : > { %v5081_v42 = vadd.f32 %v5080_v41, %v7731_v57  ;;  %v6325_v34 = vpop.f32.mrf.mxu0 }
 0x212   : > { %v6336_v37 = vpop.f32.mrf.mxu1  ;;  %5098 = vst.msk [vmem:[%s7737_s15 + $0x1c] sm:$0x3] %vm2827_vm2, %v5011_v33 }
 0x213   : > { %5099 = vst.msk [vmem:[%s7737_s15 + $0x1e] sm:$0x3] %vm2827_vm2, %v5081_v42 }
 0x214 PF: > { %s16_s18 = sadd.s32 1, %s6369_s18  }
 0x215   : > { %p13_p4 = scmp.ge.s32.totalorder %s16_s18, 4  }
 0x217   :  { %15 = sbr.rel (!%p13_p4) target bundleno = 1 (0x1), region = 87 }

// kernel: forward.11
= control target key start
LH: loop header
LB: loop body
LE: loop exit
PB: predicated region body
PF: predicated region fallthrough
CT: control target
= control target key end

     0   :  { %s796_s21 = smov 0   ;;  %s933_s0 = inlined_call_operand.vmem [shape: f32[2,32,256], index: 0, kind: input, shape index: {}]   ;;  %s934_s1 = inlined_call_operand.vmem [shape: f32[2,32,256], index: 1, kind: input, shape index: {}]   ;;  %s935_s2 = inlined_call_operand.vmem [shape: f32[64,32], index: 2, kind: input, shape index: {}]   ;;  %s936_s3 = inlined_call_operand.vmem [shape: f32[64,1], index: 3, kind: input, shape index: {}]   ;;  %s937_s4 = inlined_call_operand.vmem [shape: f32[32,64], index: 4, kind: input, shape index: {}]   ;;  %s938_s5 = inlined_call_operand.vmem [shape: f32[32,1], index: 5, kind: input, shape index: {}]   ;;  %s939_s6 = inlined_call_operand.vmem [shape: f32[2,32,256], index: 6, kind: output, shape index: {}]  }
   0x1 LB: > { %s711_s22 = sadd.s32 4294967295, %s757_s21   ;;  %p715_p0 = scmp.ge.s32.totalorder %s757_s21, 1  ;;  %s757_s21 = sphi %s796_s21, %s16_s21  }
   0x2   : > { %p222_p1 = scmp.lt.s32.totalorder %s757_s21, 3 }
   0x4   : > { %p223_p2 = pnand %p715_p0, %p222_p1 }
   0x5   : > { %p257_p3 = scmp.lt.s32.totalorder (!%p223_p2), %s711_s22, 1 }
   0x6   : > { %226 = sbr.rel (%p223_p2) target bundleno = 480 (0x1e0), region = 44 }
   0xb   : > { %v759_v0 = vmov 0.0   ;;  %s941_s22 = smov (!%p257_p3, %s711_s22), 1  ;;  %v760_v1 = vmov 0   ;;  %v293_v2 = vld [vmem:[%s936_s3 + $0x28] sm:$0xff]  ;;  %v295_v3 = vld [vmem:[%s936_s3 + $0x38] sm:$0xff]  ;;  %v292_v4 = vld [vmem:[%s936_s3 + $0x20] sm:$0xff] }
   0xc   : > { %425 = vmatprep.mubr.f32.mxu0 %v759_v0  ;;  %595 = vmatprep.mubr.f32.mxu1 %v759_v0  ;;  %s812_s27 = sshll.u32 %s941_s22, 6  ;;  %v294_v5 = vld [vmem:[%s936_s3 + $0x30] sm:$0xff]  ;;  %v291_v13 = vld [vmem:[%s936_s3 + $0x18] sm:$0xff]  ;;  %v272_v16 = vld [vmem:[%s935_s2] sm:$0xff]  ;;  %vm336_vm0 = vcmask 261120   ;;  %vm518_vm1 = vcmask 523264  }
   0xd   : > { %750 = vset.pattern.permute.xlu1 %v760_v1  ;;  %749 = vset.pattern.permute.xlu0 %v760_v1  ;;  %s261_s8 = scalar_lea.vmem %s933_s0, %s812_s27  ;;  %v290_v11 = vld [vmem:[%s936_s3 + $0x10] sm:$0xff]  ;;  %v288_v17 = vld [vmem:[%s936_s3] sm:$0xff]  ;;  %v289_v18 = vld [vmem:[%s936_s3 + $0x8] sm:$0xff]  ;;  %s906_s9 = scalar_lea.vmem %s934_s1, %s812_s27 }
   0xe   : > { %323 = vperm.xlu1 %750, %v293_v2   ;;  %333 = vperm.xlu0 %749, %v295_v3   ;;  %v287_v6 = vld [vmem:[%s261_s8 + $0x38] sm:$0xff]  ;;  %v286_v7 = vld [vmem:[%s261_s8 + $0x30] sm:$0xff]  ;;  %v285_v8 = vld [vmem:[%s261_s8 + $0x28] sm:$0xff]  ;;  %s913_s12 = scalar_lea.vmem %s939_s6, %s812_s27 }
   0xf   : > { %385 = vmatprep.subr.mxu0 %v287_v6  ;;  %v284_v9 = vld [vmem:[%s261_s8 + $0x20] sm:$0xff]  ;;  %v283_v10 = vld [vmem:[%s261_s8 + $0x18] sm:$0xff]  ;;  %v282_v12 = vld [vmem:[%s261_s8 + $0x10] sm:$0xff] }
  0x10   : > { %386 = vmatpush1.msra.mxu0 %v286_v7  ;;  %v281_v14 = vld [vmem:[%s261_s8 + $0x8] sm:$0xff]  ;;  %v280_v15 = vld [vmem:[%s261_s8] sm:$0xff]  ;;  %v274_v22 = vld [vmem:[%s935_s2 + $0x10] sm:$0xff] }
  0x11   : > { %387 = vmatprep.subr.mxu0 %v285_v8  ;;  %v273_v19 = vld [vmem:[%s935_s2 + $0x8] sm:$0xff]  ;;  %v494_v21 = vld [vmem:[%s938_s5] sm:$0xff]  ;;  %v497_v23 = vld [vmem:[%s938_s5 + $0x18] sm:$0xff] }
  0x12   : > { %318 = vperm.xlu1 %750, %v292_v4   ;;  %328 = vperm.xlu0 %749, %v294_v5   ;;  %v495_v20 = vld [vmem:[%s938_s5 + $0x8] sm:$0xff]  ;;  %v496_v24 = vld [vmem:[%s938_s5 + $0x10] sm:$0xff]  ;;  %v275_v25 = vld [vmem:[%s935_s2 + $0x18] sm:$0xff] }
  0x13   : > { %388 = vmatpush1.msra.mxu0 %v284_v9  ;;  %v276_v26 = vld [vmem:[%s935_s2 + $0x20] sm:$0xff]  ;;  %v277_v27 = vld [vmem:[%s935_s2 + $0x28] sm:$0xff]  ;;  %v278_v28 = vld [vmem:[%s935_s2 + $0x30] sm:$0xff] }
  0x14   : > { %389 = vmatprep.subr.mxu0 %v283_v10  ;;  %v279_v29 = vld [vmem:[%s935_s2 + $0x38] sm:$0xff] }
  0x15   : > { %390 = vmatpush1.msra.mxu0 %v282_v12 }
  0x16   : > { %308 = vperm.xlu1 %750, %v290_v11   ;;  %313 = vperm.xlu0 %749, %v291_v13  }
  0x17   : > { %391 = vmatprep.subr.mxu0 %v281_v14 }
  0x18   : > { %392 = vmatpush1.msra.mxu0 %v280_v15 }
  0x19   : > { %722 = vmatmul.mubr.msk.f32.vlgmr.msra.gmra.mxu0 %vm336_vm0, %v272_v16 }
  0x1a   : > { %298 = vperm.xlu1 %750, %v288_v17   ;;  %431 = vmatprep.mubr.f32.mxu0 %v759_v0 }
  0x1b   : > { %303 = vperm.xlu0 %749, %v289_v18  }
  0x1d   : > { %723 = vmatmul.mubr.msk.f32.gmra.mxu0 %vm336_vm0, %v273_v19 }
  0x1e   : > { %505 = vperm.xlu1 %750, %v495_v20   ;;  %437 = vmatprep.mubr.f32.mxu0 %v759_v0 }
  0x1f   : > { %500 = vperm.xlu0 %749, %v494_v21  }
  0x21   : > { %724 = vmatmul.mubr.msk.f32.gmra.mxu0 %vm336_vm0, %v274_v22 }
  0x22   : > { %515 = vperm.xlu1 %750, %v497_v23   ;;  %443 = vmatprep.mubr.f32.mxu0 %v759_v0  ;;  %v490_v23 = vld [vmem:[%s937_s4] sm:$0xff] }
  0x23   : > { %510 = vperm.xlu0 %749, %v496_v24   ;;  %v491_v24 = vld [vmem:[%s937_s4 + $0x8] sm:$0xff] }
  0x25   : > { %725 = vmatmul.mubr.msk.f32.gmra.mxu0 %vm336_vm0, %v275_v25  ;;  %v492_v25 = vld [vmem:[%s937_s4 + $0x10] sm:$0xff] }
  0x26   : > { %449 = vmatprep.mubr.f32.mxu0 %v759_v0 }
  0x29   : > { %726 = vmatmul.mubr.msk.f32.gmra.mxu0 %vm336_vm0, %v276_v26  ;;  %v493_v26 = vld [vmem:[%s937_s4 + $0x18] sm:$0xff] }
  0x2a   : > { %455 = vmatprep.mubr.f32.mxu0 %v759_v0 }
  0x2d   : > { %727 = vmatmul.mubr.msk.f32.gmra.mxu0 %vm336_vm0, %v277_v27 }
  0x2e   : > { %461 = vmatprep.mubr.f32.mxu0 %v759_v0 }
  0x31   : > { %728 = vmatmul.mubr.msk.f32.gmra.mxu0 %vm336_vm0, %v278_v28 }
  0x32   : > { %467 = vmatprep.mubr.f32.mxu0 %v759_v0 }
  0x35   : > { %729 = vmatmul.mubr.msk.f32.gmra.mxu0 %vm336_vm0, %v279_v29  ;;  %v620_v29 = vld [vmem:[%s906_s9] sm:$0xff] }
  0x89   : > { %v334_v41 = vpop.permute.xlu0 %333  ;;  %v324_v43 = vpop.permute.xlu1 %323 }
  0x8d   : > { %v329_v46 = vpop.permute.xlu0 %328  ;;  %v319_v48 = vpop.permute.xlu1 %318 }
  0x91   : > { %v314_v54 = vpop.permute.xlu0 %313  ;;  %v309_v59 = vpop.permute.xlu1 %308 }
  0x95   : > { %v299_v10 = vpop.permute.xlu1 %298 }
  0x96   : > { %v304_v5 = vpop.permute.xlu0 %303 }
  0x9a   : > { %v501_v27 = vpop.permute.xlu0 %500 }
  0xd9   : > { %v427_v30 = vpop.f32.mrf.mxu0 }
  0xda   : > { %v428_v17 = vadd.f32 %v427_v30, %v299_v10 }
  0xdb   : > { %v429_v31 = vpop.f32.mrf.mxu0 }
  0xdc   : > { %v430_v15 = vadd.f32 %v429_v31, %v299_v10  ;;  %v474_v22 = vmax.f32 %v428_v17, 0.0  ;;  %v621_v31 = vld [vmem:[%s906_s9 + $0x8] sm:$0xff] }
  0xdd   : > { %v433_v32 = vpop.f32.mrf.mxu0 }
  0xde   : > { %v434_v13 = vadd.f32 %v433_v32, %v304_v5  ;;  %v475_v21 = vmax.f32 %v430_v15, 0.0 }
  0xdf   : > { %v435_v33 = vpop.f32.mrf.mxu0 }
  0xe0   : > { %v436_v11 = vadd.f32 %v435_v33, %v304_v5  ;;  %v476_v20 = vmax.f32 %v434_v13, 0.0 }
  0xe1   : > { %v439_v34 = vpop.f32.mrf.mxu0 }
  0xe2   : > { %v440_v8 = vadd.f32 %v439_v34, %v309_v59  ;;  %v477_v19 = vmax.f32 %v436_v11, 0.0  ;;  %v506_v34 = vpop.permute.xlu1 %505 }
  0xe3   : > { %v441_v35 = vpop.f32.mrf.mxu0 }
  0xe4   : > { %v442_v6 = vadd.f32 %v441_v35, %v309_v59  ;;  %v478_v18 = vmax.f32 %v440_v8, 0.0 }
  0xe5   : > { %v445_v36 = vpop.f32.mrf.mxu0 }
  0xe6   : > { %v446_v3 = vadd.f32 %v445_v36, %v314_v54  ;;  %v479_v16 = vmax.f32 %v442_v6, 0.0  ;;  %v622_v36 = vld [vmem:[%s906_s9 + $0x10] sm:$0xff] }
  0xe7   : > { %v447_v37 = vpop.f32.mrf.mxu0 }
  0xe8   : > { %v448_v1 = vadd.f32 %v447_v37, %v314_v54  ;;  %v480_v14 = vmax.f32 %v446_v3, 0.0  ;;  %v626_v54 = vld [vmem:[%s906_s9 + $0x30] sm:$0xff] }
  0xe9   : > { %v451_v38 = vpop.f32.mrf.mxu0 }
  0xea   : > { %v452_v62 = vadd.f32 %v451_v38, %v319_v48  ;;  %v481_v12 = vmax.f32 %v448_v1, 0.0 }
  0xeb   : > { %v453_v39 = vpop.f32.mrf.mxu0 }
  0xec   : > { %v454_v60 = vadd.f32 %v453_v39, %v319_v48  ;;  %v482_v9 = vmax.f32 %v452_v62, 0.0 }
  0xed   : > { %v457_v40 = vpop.f32.mrf.mxu0 }
  0xee   : > { %v458_v57 = vadd.f32 %v457_v40, %v324_v43  ;;  %v483_v7 = vmax.f32 %v454_v60, 0.0  ;;  %v623_v40 = vld [vmem:[%s906_s9 + $0x18] sm:$0xff] }
  0xef   : > { %v459_v42 = vpop.f32.mrf.mxu0 }
  0xf0   : > { %v460_v55 = vadd.f32 %v459_v42, %v324_v43  ;;  %v484_v4 = vmax.f32 %v458_v57, 0.0  ;;  %v511_v43 = vpop.permute.xlu0 %510 }
  0xf1   : > { %v463_v44 = vpop.f32.mrf.mxu0 }
  0xf2   : > { %v464_v53 = vadd.f32 %v463_v44, %v329_v46  ;;  %v485_v2 = vmax.f32 %v460_v55, 0.0 }
  0xf3   : > { %v465_v45 = vpop.f32.mrf.mxu0 }
  0xf4   : > { %v466_v51 = vadd.f32 %v465_v45, %v329_v46  ;;  %v486_v63 = vmax.f32 %v464_v53, 0.0  ;;  %v624_v45 = vld [vmem:[%s906_s9 + $0x20] sm:$0xff] }
  0xf5   : > { %v469_v47 = vpop.f32.mrf.mxu0 }
  0xf6   : > { %v470_v49 = vadd.f32 %v469_v47, %v334_v41  ;;  %v487_v61 = vmax.f32 %v466_v51, 0.0 }
  0xf7   : > { %v471_v50 = vpop.f32.mrf.mxu0 }
  0xf8   : > { %v472_v52 = vadd.f32 %v471_v50, %v334_v41  ;;  %v488_v58 = vmax.f32 %v470_v49, 0.0  ;;  %v625_v49 = vld [vmem:[%s906_s9 + $0x28] sm:$0xff] }
  0xfa   : > { %v489_v56 = vmax.f32 %v472_v52, 0.0  ;;  %v516_v52 = vpop.permute.xlu1 %515 }
  0xfc   : > { %547 = vmatprep.subr.mxu1 %v489_v56 }
  0xfd   : > { %548 = vmatpush1.msra.mxu1 %v488_v58  ;;  %v627_v58 = vld [vmem:[%s906_s9 + $0x38] sm:$0xff] }
  0xfe   : > { %549 = vmatprep.subr.mxu1 %v487_v61 }
  0xff   : > { %550 = vmatpush1.msra.mxu1 %v486_v63 }
 0x100   : > { %551 = vmatprep.subr.mxu1 %v485_v2 }
 0x101   : > { %552 = vmatpush1.msra.mxu1 %v484_v4 }
 0x102   : > { %553 = vmatprep.subr.mxu1 %v483_v7 }
 0x103   : > { %554 = vmatpush1.msra.mxu1 %v482_v9 }
 0x104   : > { %555 = vmatprep.subr.mxu1 %v481_v12 }
 0x105   : > { %556 = vmatpush1.msra.mxu1 %v480_v14 }
 0x106   : > { %557 = vmatprep.subr.mxu1 %v479_v16 }
 0x107   : > { %558 = vmatpush1.msra.mxu1 %v478_v18 }
 0x108   : > { %559 = vmatprep.subr.mxu1 %v477_v19 }
 0x109   : > { %560 = vmatpush1.msra.mxu1 %v476_v20 }
 0x10a   : > { %561 = vmatprep.subr.mxu1 %v475_v21 }
 0x10b   : > { %562 = vmatpush1.msra.mxu1 %v474_v22 }
 0x10c   : > { %730 = vmatmul.mubr.msk.f32.vlgmr.msra.gmra.mxu1 %vm518_vm1, %v490_v23 }
 0x10d   : > { %601 = vmatprep.mubr.f32.mxu1 %v759_v0 }
 0x110   : > { %731 = vmatmul.mubr.msk.f32.gmra.mxu1 %vm518_vm1, %v491_v24 }
 0x111   : > { %607 = vmatprep.mubr.f32.mxu1 %v759_v0 }
 0x114   : > { %732 = vmatmul.mubr.msk.f32.gmra.mxu1 %vm518_vm1, %v492_v25 }
 0x115   : > { %613 = vmatprep.mubr.f32.mxu1 %v759_v0 }
 0x118   : > { %733 = vmatmul.mubr.msk.f32.gmra.mxu1 %vm518_vm1, %v493_v26 }
 0x1cc   : > { %v597_v28 = vpop.f32.mrf.mxu1 }
 0x1cd   : > { %v598_v30 = vadd.f32 %v597_v28, %v501_v27 }
 0x1ce   : > { %v599_v0 = vpop.f32.mrf.mxu1 }
 0x1cf   : > { %v628_v32 = vsub.f32 %v620_v29, %v598_v30  ;;  %v600_v33 = vadd.f32 %v599_v0, %v501_v27 }
 0x1d0   : > { %v603_v35 = vpop.f32.mrf.mxu1 }
 0x1d1   : > { %636 = vst [vmem:[%s913_s12] sm:$0xff] %v628_v32  ;;  %v629_v37 = vsub.f32 %v621_v31, %v600_v33  ;;  %v604_v38 = vadd.f32 %v603_v35, %v506_v34 }
 0x1d2   : > { %v605_v39 = vpop.f32.mrf.mxu1 }
 0x1d3   : > { %637 = vst [vmem:[%s913_s12 + $0x8] sm:$0xff] %v629_v37  ;;  %v630_v41 = vsub.f32 %v622_v36, %v604_v38  ;;  %v606_v42 = vadd.f32 %v605_v39, %v506_v34 }
 0x1d4   : > { %v609_v44 = vpop.f32.mrf.mxu1 }
 0x1d5   : > { %638 = vst [vmem:[%s913_s12 + $0x10] sm:$0xff] %v630_v41  ;;  %v631_v46 = vsub.f32 %v623_v40, %v606_v42  ;;  %v610_v47 = vadd.f32 %v609_v44, %v511_v43 }
 0x1d6   : > { %v611_v48 = vpop.f32.mrf.mxu1 }
 0x1d7   : > { %639 = vst [vmem:[%s913_s12 + $0x18] sm:$0xff] %v631_v46  ;;  %v632_v50 = vsub.f32 %v624_v45, %v610_v47  ;;  %v612_v51 = vadd.f32 %v611_v48, %v511_v43 }
 0x1d8   : > { %v615_v53 = vpop.f32.mrf.mxu1 }
 0x1d9   : > { %640 = vst [vmem:[%s913_s12 + $0x20] sm:$0xff] %v632_v50  ;;  %v633_v55 = vsub.f32 %v625_v49, %v612_v51  ;;  %v616_v56 = vadd.f32 %v615_v53, %v516_v52 }
 0x1da   : > { %v617_v57 = vpop.f32.mrf.mxu1 }
 0x1db   : > { %641 = vst [vmem:[%s913_s12 + $0x28] sm:$0xff] %v633_v55  ;;  %v634_v59 = vsub.f32 %v626_v54, %v616_v56  ;;  %v618_v60 = vadd.f32 %v617_v57, %v516_v52 }
 0x1dd   : > { %642 = vst [vmem:[%s913_s12 + $0x30] sm:$0xff] %v634_v59  ;;  %v635_v61 = vsub.f32 %v627_v58, %v618_v60 }
 0x1df   : > { %643 = vst [vmem:[%s913_s12 + $0x38] sm:$0xff] %v635_v61 }
 0x1e0 PF: > { %s16_s21 = sadd.s32 1, %s757_s21  }
 0x1e1   : > { %p13_p4 = scmp.ge.s32.totalorder %s16_s21, 4  }
 0x1e3   :  { %15 = sbr.rel (!%p13_p4) target bundleno = 1 (0x1), region = 77 }

// kernel: forward.17
= control target key start
LH: loop header
LB: loop body
LE: loop exit
PB: predicated region body
PF: predicated region fallthrough
CT: control target
= control target key end

     0   :  { %s1449_s19 = smov 0   ;;  %s1744_s0 = inlined_call_operand.vmem [shape: f32[2,32,256], index: 0, kind: input, shape index: {}]   ;;  %s1745_s1 = inlined_call_operand.vmem [shape: f32[64,32], index: 1, kind: input, shape index: {}]   ;;  %s1746_s2 = inlined_call_operand.vmem [shape: f32[64,1], index: 2, kind: input, shape index: {}]   ;;  %s1747_s3 = inlined_call_operand.vmem [shape: f32[32,64], index: 3, kind: input, shape index: {}]   ;;  %s1748_s4 = inlined_call_operand.vmem [shape: f32[32,1], index: 4, kind: input, shape index: {}]   ;;  %s1749_s5 = inlined_call_operand.vmem [shape: f32[2,32,1], index: 5, kind: input, shape index: {}]   ;;  %s1750_s6 = inlined_call_operand.vmem [shape: f32[2,1,1], index: 6, kind: input, shape index: {}]   ;;  %s1751_s7 = inlined_call_operand.vmem [shape: f32[128,32], index: 7, kind: input, shape index: {}]   ;;  %s1752_s8 = inlined_call_operand.vmem [shape: f32[128,1], index: 8, kind: input, shape index: {}]   ;;  %s1753_s9 = inlined_call_operand.vmem [shape: f32[1,128], index: 9, kind: input, shape index: {}]   ;;  %s1754_s10 = inlined_call_operand.<no memory space> [shape: f32[1,1], index: 10, kind: input, shape index: {}]   ;;  %s1755_s11 = inlined_call_operand.vmem [shape: f32[2,1,256], index: 11, kind: output, shape index: {}]  }
   0x1   :  { %v16_v0 = vstv %s1754_s10 }
   0x2   :  { %17 = vst [vmem:[#allocation2] sm:$0x1] %v16_v0 }
   0x3 LB: > { %s1319_s20 = sadd.s32 4294967295, %s1381_s19   ;;  %p1323_p0 = scmp.ge.s32.totalorder %s1381_s19, 1  ;;  %s1381_s19 = sphi %s1449_s19, %s23_s19  }
   0x4   : > { %p357_p1 = scmp.lt.s32.totalorder %s1381_s19, 3 }
   0x6   : > { %p358_p2 = pnand %p1323_p0, %p357_p1 }
   0x7   : > { %p404_p3 = scmp.lt.s32.totalorder (!%p358_p2), %s1319_s20, 1 }
   0x8   : > { %361 = sbr.rel (%p358_p2) target bundleno = 984 (0x3d8), region = 64 }
   0xd   : > { %v1383_v1 = vmov 0.0   ;;  %s1757_s20 = smov (!%p404_p3, %s1319_s20), 1  ;;  %v1384_v2 = vmov 0   ;;  %v444_v3 = vld [vmem:[%s1746_s2 + $0x38] sm:$0xff]  ;;  %v442_v4 = vld [vmem:[%s1746_s2 + $0x28] sm:$0xff]  ;;  %v443_v5 = vld [vmem:[%s1746_s2 + $0x30] sm:$0xff] }
   0xe   : > { %574 = vmatprep.mubr.f32.mxu0 %v1383_v1  ;;  %1043 = vmatprep.mubr.f32.mxu1 %v1383_v1  ;;  %s1360_s24 = sshll.u32 %s1757_s20, 6  ;;  %v441_v6 = vld [vmem:[%s1746_s2 + $0x20] sm:$0xff]  ;;  %v440_v12 = vld [vmem:[%s1746_s2 + $0x18] sm:$0xff]  ;;  %v439_v14 = vld [vmem:[%s1746_s2 + $0x10] sm:$0xff]  ;;  %vm485_vm0 = vcmask 261120   ;;  %s416_s22 = scalar_lea.vmem %s1750_s6, %s1757_s20  ;;  %vm667_vm1 = vcmask 523264  }
   0xf   : > { %1373 = vset.pattern.permute.xlu0 %v1384_v2  ;;  %1374 = vset.pattern.permute.xlu1 %v1384_v2  ;;  %s408_s29 = scalar_lea.vmem %s1744_s0, %s1360_s24  ;;  %v421_v17 = vld [vmem:[%s1745_s1] sm:$0xff]  ;;  %v438_v18 = vld [vmem:[%s1746_s2 + $0x8] sm:$0xff]  ;;  %s1361_s24 = sshll.u32 %s1757_s20, 5  ;;  %v646_v21 = vld [vmem:[%s1748_s4 + $0x18] sm:$0xff] }
  0x10   : > { %482 = vperm.xlu0 %1373, %v444_v3   ;;  %472 = vperm.xlu1 %1374, %v442_v4   ;;  %v436_v7 = vld [vmem:[%s408_s29 + $0x38] sm:$0xff]  ;;  %v435_v8 = vld [vmem:[%s408_s29 + $0x30] sm:$0xff]  ;;  %v434_v9 = vld [vmem:[%s408_s29 + $0x28] sm:$0xff]  ;;  %s413_s12 = scalar_lea.vmem %s1749_s5, %s1361_s24 }
  0x11   : > { %534 = vmatprep.subr.mxu0 %v436_v7  ;;  %v433_v10 = vld [vmem:[%s408_s29 + $0x20] sm:$0xff]  ;;  %v432_v11 = vld [vmem:[%s408_s29 + $0x18] sm:$0xff]  ;;  %v431_v13 = vld [vmem:[%s408_s29 + $0x10] sm:$0xff] }
  0x12   : > { %535 = vmatpush1.msra.mxu0 %v435_v8  ;;  %v430_v15 = vld [vmem:[%s408_s29 + $0x8] sm:$0xff]  ;;  %v429_v16 = vld [vmem:[%s408_s29] sm:$0xff]  ;;  %v645_v22 = vld [vmem:[%s1748_s4 + $0x10] sm:$0xff] }
  0x13   : > { %536 = vmatprep.subr.mxu0 %v434_v9  ;;  %v437_v19 = vld [vmem:[%s1746_s2] sm:$0xff]  ;;  %v422_v20 = vld [vmem:[%s1745_s1 + $0x8] sm:$0xff]  ;;  %v423_v23 = vld [vmem:[%s1745_s1 + $0x10] sm:$0xff] }
  0x14   : > { %477 = vperm.xlu0 %1373, %v443_v5   ;;  %467 = vperm.xlu1 %1374, %v441_v6   ;;  %v772_v24 = vld [vmem:[%s413_s12 + $0x18] sm:$0xff]  ;;  %v644_v25 = vld [vmem:[%s1748_s4 + $0x8] sm:$0xff]  ;;  %v771_v27 = vld [vmem:[%s413_s12 + $0x10] sm:$0xff] }
  0x15   : > { %537 = vmatpush1.msra.mxu0 %v433_v10  ;;  %v424_v26 = vld [vmem:[%s1745_s1 + $0x18] sm:$0xff]  ;;  %v1341_v28 = vld [vmem:[%s416_s22] ss:$0 sm:$0xff]  ;;  %v770_v31 = vld [vmem:[%s413_s12 + $0x8] sm:$0xff] }
  0x16   : > { %538 = vmatprep.subr.mxu0 %v432_v11  ;;  %v425_v29 = vld [vmem:[%s1745_s1 + $0x20] sm:$0xff]  ;;  %v426_v32 = vld [vmem:[%s1745_s1 + $0x28] sm:$0xff]  ;;  %v850_v34 = vld [vmem:[%s1752_s8 + $0x78] sm:$0xff] }
  0x17   : > { %539 = vmatpush1.msra.mxu0 %v431_v13  ;;  %v643_v30 = vld [vmem:[%s1748_s4] sm:$0xff]  ;;  %v427_v35 = vld [vmem:[%s1745_s1 + $0x30] sm:$0xff]  ;;  %v848_v37 = vld [vmem:[%s1752_s8 + $0x68] sm:$0xff] }
  0x18   : > { %462 = vperm.xlu0 %1373, %v440_v12   ;;  %457 = vperm.xlu1 %1374, %v439_v14   ;;  %v769_v33 = vld [vmem:[%s413_s12] sm:$0xff]  ;;  %v849_v36 = vld [vmem:[%s1752_s8 + $0x70] sm:$0xff]  ;;  %v428_v38 = vld [vmem:[%s1745_s1 + $0x38] sm:$0xff]  ;;  %s1328_s12 = sshll.u32 %s1757_s20, 1 }
  0x19   : > { %540 = vmatprep.subr.mxu0 %v430_v15  ;;  %v847_v39 = vld [vmem:[%s1752_s8 + $0x60] sm:$0xff]  ;;  %v846_v40 = vld [vmem:[%s1752_s8 + $0x58] sm:$0xff]  ;;  %v845_v41 = vld [vmem:[%s1752_s8 + $0x50] sm:$0xff]  ;;  %s420_s22 = scalar_lea.vmem %s1755_s11, %s1328_s12 }
  0x1a   : > { %541 = vmatpush1.msra.mxu0 %v429_v16  ;;  %v844_v42 = vld [vmem:[%s1752_s8 + $0x48] sm:$0xff]  ;;  %v843_v43 = vld [vmem:[%s1752_s8 + $0x40] sm:$0xff]  ;;  %v842_v44 = vld [vmem:[%s1752_s8 + $0x38] sm:$0xff] }
  0x1b   : > { %1329 = vmatmul.mubr.msk.f32.vlgmr.msra.gmra.mxu0 %vm485_vm0, %v421_v17  ;;  %v841_v45 = vld [vmem:[%s1752_s8 + $0x30] sm:$0xff]  ;;  %v840_v46 = vld [vmem:[%s1752_s8 + $0x28] sm:$0xff]  ;;  %v839_v47 = vld [vmem:[%s1752_s8 + $0x20] sm:$0xff] }
  0x1c   : > { %452 = vperm.xlu0 %1373, %v438_v18   ;;  %580 = vmatprep.mubr.f32.mxu0 %v1383_v1  ;;  %v838_v48 = vld [vmem:[%s1752_s8 + $0x18] sm:$0xff]  ;;  %v837_v49 = vld [vmem:[%s1752_s8 + $0x10] sm:$0xff]  ;;  %v836_v50 = vld [vmem:[%s1752_s8 + $0x8] sm:$0xff] }
  0x1d   : > { %447 = vperm.xlu1 %1374, %v437_v19   ;;  %v835_v51 = vld [vmem:[%s1752_s8] sm:$0xff] }
  0x1e   : > { %v1141_v52 = vld [vmem:[#allocation2] sm:$0x1] }
  0x1f   : > { %1330 = vmatmul.mubr.msk.f32.gmra.mxu0 %vm485_vm0, %v422_v20 }
  0x20   : > { %664 = vperm.xlu0 %1373, %v646_v21   ;;  %586 = vmatprep.mubr.f32.mxu0 %v1383_v1 }
  0x21   : > { %659 = vperm.xlu1 %1374, %v645_v22  }
  0x23   : > { %1331 = vmatmul.mubr.msk.f32.gmra.mxu0 %vm485_vm0, %v423_v23 }
  0x24   : > { %790 = vperm.xlu0 %1373, %v772_v24   ;;  %592 = vmatprep.mubr.f32.mxu0 %v1383_v1 }
  0x25   : > { %654 = vperm.xlu1 %1374, %v644_v25  }
  0x27   : > { %1332 = vmatmul.mubr.msk.f32.gmra.mxu0 %vm485_vm0, %v424_v26 }
  0x28   : > { %785 = vperm.xlu0 %1373, %v771_v27   ;;  %598 = vmatprep.mubr.f32.mxu0 %v1383_v1 }
  0x29   : > { %808 = vperm.xlu1 %1374, %v1341_v28  }
  0x2b   : > { %1333 = vmatmul.mubr.msk.f32.gmra.mxu0 %vm485_vm0, %v425_v29 }
  0x2c   : > { %649 = vperm.xlu0 %1373, %v643_v30   ;;  %604 = vmatprep.mubr.f32.mxu0 %v1383_v1 }
  0x2d   : > { %780 = vperm.xlu1 %1374, %v770_v31  }
  0x2f   : > { %1334 = vmatmul.mubr.msk.f32.gmra.mxu0 %vm485_vm0, %v426_v32 }
  0x30   : > { %775 = vperm.xlu0 %1373, %v769_v33   ;;  %610 = vmatprep.mubr.f32.mxu0 %v1383_v1 }
  0x31   : > { %928 = vperm.xlu1 %1374, %v850_v34  }
  0x33   : > { %1335 = vmatmul.mubr.msk.f32.gmra.mxu0 %vm485_vm0, %v427_v35 }
  0x34   : > { %923 = vperm.xlu0 %1373, %v849_v36   ;;  %616 = vmatprep.mubr.f32.mxu0 %v1383_v1 }
  0x35   : > { %918 = vperm.xlu1 %1374, %v848_v37  }
  0x37   : > { %1336 = vmatmul.mubr.msk.f32.gmra.mxu0 %vm485_vm0, %v428_v38 }
  0x38   : > { %913 = vperm.xlu0 %1373, %v847_v39   ;;  %744 = vmatprep.mubr.f32.mxu0 %v1383_v1 }
  0x39   : > { %908 = vperm.xlu1 %1374, %v846_v40  }
  0x3c   : > { %903 = vperm.xlu0 %1373, %v845_v41  }
  0x3d   : > { %898 = vperm.xlu1 %1374, %v844_v42  }
  0x40   : > { %893 = vperm.xlu0 %1373, %v843_v43  }
  0x41   : > { %888 = vperm.xlu1 %1374, %v842_v44  }
  0x44   : > { %883 = vperm.xlu0 %1373, %v841_v45  }
  0x45   : > { %878 = vperm.xlu1 %1374, %v840_v46   ;;  %v639_v46 = vld [vmem:[%s1747_s3] sm:$0xff] }
  0x48   : > { %873 = vperm.xlu0 %1373, %v839_v47   ;;  %v640_v47 = vld [vmem:[%s1747_s3 + $0x8] sm:$0xff] }
  0x49   : > { %868 = vperm.xlu1 %1374, %v838_v48   ;;  %v641_v48 = vld [vmem:[%s1747_s3 + $0x10] sm:$0xff] }
  0x4c   : > { %863 = vperm.xlu0 %1373, %v837_v49   ;;  %v642_v49 = vld [vmem:[%s1747_s3 + $0x18] sm:$0xff] }
  0x4d   : > { %858 = vperm.xlu1 %1374, %v836_v50  }
  0x50   : > { %853 = vperm.xlu0 %1373, %v835_v51  }
  0x51   : > { %1144 = vperm.xlu1 %1374, %v1141_v52  }
  0x8b   : > { %v483_v0 = vpop.permute.xlu0 %482  ;;  %v473_v3 = vpop.permute.xlu1 %472 }
  0x8f   : > { %v478_v6 = vpop.permute.xlu0 %477  ;;  %v468_v8 = vpop.permute.xlu1 %467 }
  0x93   : > { %v463_v16 = vpop.permute.xlu0 %462  ;;  %v458_v21 = vpop.permute.xlu1 %457 }
  0x97   : > { %v453_v30 = vpop.permute.xlu0 %452 }
  0x98   : > { %v448_v35 = vpop.permute.xlu1 %447 }
  0x9b   : > { %v665_v50 = vpop.permute.xlu0 %664 }
  0x9c   : > { %v660_v51 = vpop.permute.xlu1 %659 }
  0xdb   : > { %v576_v53 = vpop.f32.mrf.mxu0 }
  0xdc   : > { %v577_v40 = vadd.f32 %v576_v53, %v448_v35  ;;  %v791_v53 = vpop.permute.xlu0 %790 }
  0xdd   : > { %v578_v54 = vpop.f32.mrf.mxu0 }
  0xde   : > { %v579_v38 = vadd.f32 %v578_v54, %v448_v35  ;;  %v623_v45 = vmax.f32 %v577_v40, 0.0  ;;  %v826_v35 = vld [vmem:[%s1751_s7 + $0x38] sm:$0xff]  ;;  %v831_v40 = vld [vmem:[%s1751_s7 + $0x60] sm:$0xff] }
  0xdf   : > { %v582_v55 = vpop.f32.mrf.mxu0 }
  0xe0   : > { %v583_v36 = vadd.f32 %v582_v55, %v453_v30  ;;  %v624_v44 = vmax.f32 %v579_v38, 0.0  ;;  %v829_v38 = vld [vmem:[%s1751_s7 + $0x50] sm:$0xff] }
  0xe1   : > { %v584_v56 = vpop.f32.mrf.mxu0 }
  0xe2   : > { %v585_v33 = vadd.f32 %v584_v56, %v453_v30  ;;  %v625_v43 = vmax.f32 %v583_v36, 0.0  ;;  %v655_v56 = vpop.permute.xlu1 %654  ;;  %v821_v30 = vld [vmem:[%s1751_s7 + $0x10] sm:$0xff]  ;;  %v827_v36 = vld [vmem:[%s1751_s7 + $0x40] sm:$0xff] }
  0xe3   : > { %v588_v57 = vpop.f32.mrf.mxu0 }
  0xe4   : > { %v589_v31 = vadd.f32 %v588_v57, %v458_v21  ;;  %v626_v42 = vmax.f32 %v585_v33, 0.0  ;;  %v824_v33 = vld [vmem:[%s1751_s7 + $0x28] sm:$0xff] }
  0xe5   : > { %v590_v58 = vpop.f32.mrf.mxu0 }
  0xe6   : > { %v591_v28 = vadd.f32 %v590_v58, %v458_v21  ;;  %v627_v41 = vmax.f32 %v589_v31, 0.0  ;;  %v786_v58 = vpop.permute.xlu0 %785  ;;  %v822_v31 = vld [vmem:[%s1751_s7 + $0x18] sm:$0xff] }
  0xe7   : > { %v594_v59 = vpop.f32.mrf.mxu0 }
  0xe8   : > { %v595_v26 = vadd.f32 %v594_v59, %v463_v16  ;;  %v628_v39 = vmax.f32 %v591_v28, 0.0  ;;  %v819_v28 = vld [vmem:[%s1751_s7] sm:$0xff] }
  0xe9   : > { %v596_v60 = vpop.f32.mrf.mxu0 }
  0xea   : > { %v597_v24 = vadd.f32 %v596_v60, %v463_v16  ;;  %v629_v37 = vmax.f32 %v595_v26, 0.0 }
  0xeb   : > { %v600_v61 = vpop.f32.mrf.mxu0 }
  0xec   : > { %v601_v22 = vadd.f32 %v600_v61, %v468_v8  ;;  %v630_v34 = vmax.f32 %v597_v24, 0.0  ;;  %v809_v61 = vpop.permute.xlu1 %808 }
  0xed   : > { %v602_v62 = vpop.f32.mrf.mxu0 }
  0xee   : > { %v603_v19 = vadd.f32 %v602_v62, %v468_v8  ;;  %v631_v32 = vmax.f32 %v601_v22, 0.0 }
  0xef   : > { %v606_v63 = vpop.f32.mrf.mxu0 }
  0xf0   : > { %v607_v17 = vadd.f32 %v606_v63, %v473_v3  ;;  %v632_v29 = vmax.f32 %v603_v19, 0.0 }
  0xf1   : > { %v608_v2 = vpop.f32.mrf.mxu0 }
  0xf2   : > { %v609_v14 = vadd.f32 %v608_v2, %v473_v3  ;;  %v633_v27 = vmax.f32 %v607_v17, 0.0  ;;  %v650_v2 = vpop.permute.xlu0 %649 }
  0xf3   : > { %v612_v4 = vpop.f32.mrf.mxu0 }
  0xf4   : > { %v613_v13 = vadd.f32 %v612_v4, %v478_v6  ;;  %v634_v25 = vmax.f32 %v609_v14, 0.0 }
  0xf5   : > { %v614_v5 = vpop.f32.mrf.mxu0 }
  0xf6   : > { %v615_v11 = vadd.f32 %v614_v5, %v478_v6  ;;  %v635_v23 = vmax.f32 %v613_v13, 0.0  ;;  %v776_v17 = vpop.permute.xlu0 %775 }
  0xf7   : > { %v618_v7 = vpop.f32.mrf.mxu0 }
  0xf8   : > { %v619_v9 = vadd.f32 %v618_v7, %v483_v0  ;;  %v636_v20 = vmax.f32 %v615_v11, 0.0 }
  0xf9   : > { %v620_v10 = vpop.f32.mrf.mxu0 }
  0xfa   : > { %v621_v12 = vadd.f32 %v620_v10, %v483_v0  ;;  %v637_v18 = vmax.f32 %v619_v9, 0.0 }
  0xfc   : > { %v638_v15 = vmax.f32 %v621_v12, 0.0  ;;  %v781_v12 = vpop.permute.xlu1 %780 }
  0xfe   : > { %696 = vmatprep.subr.mxu0 %v638_v15 }
  0xff   : > { %697 = vmatpush1.msra.mxu0 %v637_v18 }
 0x100   : > { %698 = vmatprep.subr.mxu0 %v636_v20 }
 0x101   : > { %699 = vmatpush1.msra.mxu0 %v635_v23 }
 0x102   : > { %700 = vmatprep.subr.mxu0 %v634_v25 }
 0x103   : > { %701 = vmatpush1.msra.mxu0 %v633_v27 }
 0x104   : > { %702 = vmatprep.subr.mxu0 %v632_v29  ;;  %v820_v29 = vld [vmem:[%s1751_s7 + $0x8] sm:$0xff] }
 0x105   : > { %703 = vmatpush1.msra.mxu0 %v631_v32  ;;  %v823_v32 = vld [vmem:[%s1751_s7 + $0x20] sm:$0xff] }
 0x106   : > { %704 = vmatprep.subr.mxu0 %v630_v34  ;;  %v825_v34 = vld [vmem:[%s1751_s7 + $0x30] sm:$0xff] }
 0x107   : > { %705 = vmatpush1.msra.mxu0 %v629_v37  ;;  %v828_v37 = vld [vmem:[%s1751_s7 + $0x48] sm:$0xff] }
 0x108   : > { %706 = vmatprep.subr.mxu0 %v628_v39  ;;  %v830_v39 = vld [vmem:[%s1751_s7 + $0x58] sm:$0xff] }
 0x109   : > { %707 = vmatpush1.msra.mxu0 %v627_v41  ;;  %v832_v41 = vld [vmem:[%s1751_s7 + $0x68] sm:$0xff] }
 0x10a   : > { %708 = vmatprep.subr.mxu0 %v626_v42  ;;  %v833_v42 = vld [vmem:[%s1751_s7 + $0x70] sm:$0xff] }
 0x10b   : > { %709 = vmatpush1.msra.mxu0 %v625_v43  ;;  %v834_v43 = vld [vmem:[%s1751_s7 + $0x78] sm:$0xff] }
 0x10c   : > { %710 = vmatprep.subr.mxu0 %v624_v44 }
 0x10d   : > { %711 = vmatpush1.msra.mxu0 %v623_v45 }
 0x10e   : > { %1337 = vmatmul.mubr.msk.f32.vlgmr.msra.gmra.mxu0 %vm667_vm1, %v639_v46 }
 0x10f   : > { %750 = vmatprep.mubr.f32.mxu0 %v1383_v1 }
 0x112   : > { %1338 = vmatmul.mubr.msk.f32.gmra.mxu0 %vm667_vm1, %v640_v47 }
 0x113   : > { %756 = vmatprep.mubr.f32.mxu0 %v1383_v1 }
 0x116   : > { %1339 = vmatmul.mubr.msk.f32.gmra.mxu0 %vm667_vm1, %v641_v48 }
 0x117   : > { %762 = vmatprep.mubr.f32.mxu0 %v1383_v1 }
 0x11a   : > { %1340 = vmatmul.mubr.msk.f32.gmra.mxu0 %vm667_vm1, %v642_v49 }
 0x11b   : > { %1215 = vmatprep.mubr.f32.mxu0 %v1383_v1 }
 0x1ce   : > { %v746_v52 = vpop.f32.mrf.mxu0 }
 0x1cf   : > { %v747_v13 = vadd.f32 %v746_v52, %v650_v2 }
 0x1d0   : > { %v748_v54 = vpop.f32.mrf.mxu0 }
 0x1d1   : > { %v749_v9 = vadd.f32 %v748_v54, %v650_v2  ;;  %v793_v22 = vmul.f32 %v776_v17, %v747_v13 }
 0x1d2   : > { %v752_v55 = vpop.f32.mrf.mxu0 }
 0x1d3   : > { %v753_v7 = vadd.f32 %v752_v55, %v655_v56  ;;  %v794_v20 = vmul.f32 %v776_v17, %v749_v9  ;;  %v811_v27 = vadd.f32 %v809_v61, %v793_v22 }
 0x1d4   : > { %v754_v57 = vpop.f32.mrf.mxu0 }
 0x1d5   : > { %v755_v5 = vadd.f32 %v754_v57, %v655_v56  ;;  %v795_v18 = vmul.f32 %v781_v12, %v753_v7  ;;  %v812_v26 = vadd.f32 %v809_v61, %v794_v20 }
 0x1d6   : > { %v758_v59 = vpop.f32.mrf.mxu0 }
 0x1d7   : > { %v759_v3 = vadd.f32 %v758_v59, %v660_v51  ;;  %v796_v15 = vmul.f32 %v781_v12, %v755_v5  ;;  %v813_v25 = vadd.f32 %v809_v61, %v795_v18 }
 0x1d8   : > { %v760_v60 = vpop.f32.mrf.mxu0 }
 0x1d9   : > { %v761_v63 = vadd.f32 %v760_v60, %v660_v51  ;;  %v797_v14 = vmul.f32 %v786_v58, %v759_v3  ;;  %v814_v24 = vadd.f32 %v809_v61, %v796_v15 }
 0x1da   : > { %v764_v62 = vpop.f32.mrf.mxu0 }
 0x1db   : > { %v765_v0 = vadd.f32 %v764_v62, %v665_v50  ;;  %v798_v10 = vmul.f32 %v786_v58, %v761_v63  ;;  %v815_v23 = vadd.f32 %v809_v61, %v797_v14 }
 0x1dc   : > { %v766_v4 = vpop.f32.mrf.mxu0 }
 0x1dd   : > { %v767_v6 = vadd.f32 %v766_v4, %v665_v50  ;;  %v799_v8 = vmul.f32 %v791_v53, %v765_v0  ;;  %v816_v21 = vadd.f32 %v809_v61, %v798_v10  ;;  %v929_v4 = vpop.permute.xlu1 %928 }
 0x1df   : > { %v800_v11 = vmul.f32 %v791_v53, %v767_v6  ;;  %v817_v19 = vadd.f32 %v809_v61, %v799_v8  ;;  %v924_v6 = vpop.permute.xlu0 %923 }
 0x1e1   : > { %v818_v16 = vadd.f32 %v809_v61, %v800_v11  ;;  %v919_v9 = vpop.permute.xlu1 %918 }
 0x1e3   : > { %1003 = vmatprep.subr.mxu1 %v818_v16  ;;  %v914_v11 = vpop.permute.xlu0 %913 }
 0x1e4   : > { %1004 = vmatpush1.msra.mxu1 %v817_v19 }
 0x1e5   : > { %1005 = vmatprep.subr.mxu1 %v816_v21  ;;  %v909_v14 = vpop.permute.xlu1 %908 }
 0x1e6   : > { %1006 = vmatpush1.msra.mxu1 %v815_v23 }
 0x1e7   : > { %1007 = vmatprep.subr.mxu1 %v814_v24  ;;  %v904_v16 = vpop.permute.xlu0 %903 }
 0x1e8   : > { %1008 = vmatpush1.msra.mxu1 %v813_v25 }
 0x1e9   : > { %1009 = vmatprep.subr.mxu1 %v812_v26  ;;  %v899_v21 = vpop.permute.xlu1 %898 }
 0x1ea   : > { %1010 = vmatpush1.msra.mxu1 %v811_v27 }
 0x1eb   : > { %1342 = vmatmul.mubr.msk.f32.vlgmr.msra.gmra.mxu1 %vm485_vm0, %v819_v28  ;;  %v894_v24 = vpop.permute.xlu0 %893 }
 0x1ec   : > { %1049 = vmatprep.mubr.f32.mxu1 %v1383_v1 }
 0x1ef   : > { %1343 = vmatmul.mubr.msk.f32.gmra.mxu1 %vm485_vm0, %v820_v29  ;;  %v889_v29 = vpop.permute.xlu1 %888 }
 0x1f0   : > { %1055 = vmatprep.mubr.f32.mxu1 %v1383_v1 }
 0x1f3   : > { %1344 = vmatmul.mubr.msk.f32.gmra.mxu1 %vm485_vm0, %v821_v30 }
 0x1f4   : > { %1061 = vmatprep.mubr.f32.mxu1 %v1383_v1 }
 0x1f7   : > { %1345 = vmatmul.mubr.msk.f32.gmra.mxu1 %vm485_vm0, %v822_v31 }
 0x1f8   : > { %1067 = vmatprep.mubr.f32.mxu1 %v1383_v1 }
 0x1fb   : > { %1346 = vmatmul.mubr.msk.f32.gmra.mxu1 %vm485_vm0, %v823_v32  ;;  %v884_v32 = vpop.permute.xlu0 %883 }
 0x1fc   : > { %1073 = vmatprep.mubr.f32.mxu1 %v1383_v1 }
 0x1ff   : > { %1347 = vmatmul.mubr.msk.f32.gmra.mxu1 %vm485_vm0, %v824_v33 }
 0x200   : > { %1079 = vmatprep.mubr.f32.mxu1 %v1383_v1 }
 0x203   : > { %1348 = vmatmul.mubr.msk.f32.gmra.mxu1 %vm485_vm0, %v825_v34 }
 0x204   : > { %1085 = vmatprep.mubr.f32.mxu1 %v1383_v1 }
 0x207   : > { %1349 = vmatmul.mubr.msk.f32.gmra.mxu1 %vm485_vm0, %v826_v35 }
 0x208   : > { %1091 = vmatprep.mubr.f32.mxu1 %v1383_v1 }
 0x20b   : > { %1350 = vmatmul.mubr.msk.f32.gmra.mxu1 %vm485_vm0, %v827_v36 }
 0x20c   : > { %1097 = vmatprep.mubr.f32.mxu1 %v1383_v1 }
 0x20f   : > { %1351 = vmatmul.mubr.msk.f32.gmra.mxu1 %vm485_vm0, %v828_v37  ;;  %v879_v37 = vpop.permute.xlu1 %878 }
 0x210   : > { %1103 = vmatprep.mubr.f32.mxu1 %v1383_v1 }
 0x213   : > { %1352 = vmatmul.mubr.msk.f32.gmra.mxu1 %vm485_vm0, %v829_v38 }
 0x214   : > { %1109 = vmatprep.mubr.f32.mxu1 %v1383_v1 }
 0x217   : > { %1353 = vmatmul.mubr.msk.f32.gmra.mxu1 %vm485_vm0, %v830_v39 }
 0x218   : > { %1115 = vmatprep.mubr.f32.mxu1 %v1383_v1 }
 0x21b   : > { %1354 = vmatmul.mubr.msk.f32.gmra.mxu1 %vm485_vm0, %v831_v40  ;;  %v874_v40 = vpop.permute.xlu0 %873 }
 0x21c   : > { %1121 = vmatprep.mubr.f32.mxu1 %v1383_v1 }
 0x21f   : > { %1355 = vmatmul.mubr.msk.f32.gmra.mxu1 %vm485_vm0, %v832_v41 }
 0x220   : > { %1127 = vmatprep.mubr.f32.mxu1 %v1383_v1 }
 0x223   : > { %1356 = vmatmul.mubr.msk.f32.gmra.mxu1 %vm485_vm0, %v833_v42 }
 0x224   : > { %1133 = vmatprep.mubr.f32.mxu1 %v1383_v1 }
 0x227   : > { %1357 = vmatmul.mubr.msk.f32.gmra.mxu1 %vm485_vm0, %v834_v43 }
 0x2ab   : > { %v1692_v44 = vpop.f32.mrf.mxu1 }
 0x2ad   : > { %v1694_v45 = vpop.f32.mrf.mxu1 }
 0x2af   : > { %v1696_v46 = vpop.f32.mrf.mxu1 }
 0x2b1   : > { %v1698_v47 = vpop.f32.mrf.mxu1 }
 0x2b3   : > { %v1700_v48 = vpop.f32.mrf.mxu1 }
 0x2b5   : > { %v1702_v49 = vpop.f32.mrf.mxu1 }
 0x2b7   : > { %v1704_v50 = vpop.f32.mrf.mxu1 }
 0x2b9   : > { %v1706_v1 = vpop.f32.mrf.mxu1 }
 0x2bb   : > { %v1708_v51 = vpop.f32.mrf.mxu1 }
 0x2bd   : > { %v1710_v52 = vpop.f32.mrf.mxu1 }
 0x2bf   : > { %v1712_v53 = vpop.f32.mrf.mxu1 }
 0x2c1   : > { %v1714_v54 = vpop.f32.mrf.mxu1 }
 0x2c3   : > { %v1716_v55 = vpop.f32.mrf.mxu1 }
 0x2c4   : > { %v1082_v43 = vadd.f32 %v1716_v55, %v884_v32 }
 0x2c5   : > { %v1718_v56 = vpop.f32.mrf.mxu1 }
 0x2c6   : > { %v1084_v42 = vadd.f32 %v1718_v56, %v884_v32 }
 0x2c7   : > { %v1087_v57 = vpop.f32.mrf.mxu1 }
 0x2c8   : > { %v1088_v41 = vadd.f32 %v1087_v57, %v889_v29  ;;  %v1070_v57 = vadd.f32 %v1708_v51, %v874_v40 }
 0x2c9   : > { %v1089_v58 = vpop.f32.mrf.mxu1 }
 0x2ca   : > { %v1090_v39 = vadd.f32 %v1089_v58, %v889_v29  ;;  %v864_v58 = vpop.permute.xlu0 %863 }
 0x2cb   : > { %v1093_v59 = vpop.f32.mrf.mxu1 }
 0x2cc   : > { %v1094_v38 = vadd.f32 %v1093_v59, %v894_v24  ;;  %v1072_v59 = vadd.f32 %v1710_v52, %v874_v40 }
 0x2cd   : > { %v1095_v60 = vpop.f32.mrf.mxu1 }
 0x2ce   : > { %v1096_v36 = vadd.f32 %v1095_v60, %v894_v24  ;;  %v1076_v60 = vadd.f32 %v1712_v53, %v879_v37  ;;  %v1058_v53 = vadd.f32 %v1700_v48, %v864_v58 }
 0x2cf   : > { %v1099_v61 = vpop.f32.mrf.mxu1 }
 0x2d0   : > { %v1100_v35 = vadd.f32 %v1099_v61, %v899_v21  ;;  %v869_v61 = vpop.permute.xlu1 %868 }
 0x2d1   : > { %v1101_v62 = vpop.f32.mrf.mxu1  ;;  %v1066_v56 = vadd.f32 %v1706_v1, %v869_v61  ;;  %v1064_v55 = vadd.f32 %v1704_v50, %v869_v61 }
 0x2d2   : > { %v1102_v34 = vadd.f32 %v1101_v62, %v899_v21  ;;  %v1078_v62 = vadd.f32 %v1714_v54, %v879_v37  ;;  %v1060_v54 = vadd.f32 %v1702_v49, %v864_v58  ;;  %v1140_v49 = vld [vmem:[%s1753_s9] sm:$0x1] }
 0x2d3   : > { %v1105_v63 = vpop.f32.mrf.mxu1 }
 0x2d4   : > { %v1106_v33 = vadd.f32 %v1105_v63, %v904_v16  ;;  %v859_v63 = vpop.permute.xlu1 %858 }
 0x2d5   : > { %v1107_v0 = vpop.f32.mrf.mxu1  ;;  %v1054_v52 = vadd.f32 %v1698_v47, %v859_v63  ;;  %v1052_v51 = vadd.f32 %v1696_v46, %v859_v63  ;;  %v1147_v47 = vlaneseq }
 0x2d6   : > { %v1108_v31 = vadd.f32 %v1107_v0, %v904_v16  ;;  %v854_v0 = vpop.permute.xlu0 %853 }
 0x2d7   : > { %v1111_v2 = vpop.f32.mrf.mxu1  ;;  %v1048_v1 = vadd.f32 %v1694_v45, %v854_v0  ;;  %v1046_v50 = vadd.f32 %v1692_v44, %v854_v0  ;;  %v1148_v48 = vshrl.u32 %v1147_v47, 7  ;;  %vm1242_vm2 = vcmp.lt.s32.totalorder %v1147_v47, 256 }
 0x2d8   : > { %v1112_v30 = vadd.f32 %v1111_v2, %v909_v14  ;;  %v1385_v2 = vmov 1966171168  }
 0x2d9   : > { %v1113_v3 = vpop.f32.mrf.mxu1  ;;  %v1149_v46 = vsub.s32 0, %v1148_v48 }
 0x2da   : > { %v1114_v28 = vadd.f32 %v1113_v3, %v909_v14  ;;  %v1226_v3 = vunpack.c.l.s4 %v1385_v2 }
 0x2db   : > { %v1117_v5 = vpop.f32.mrf.mxu1 }
 0x2dc   : > { %v1118_v27 = vadd.f32 %v1117_v5, %v914_v11  ;;  %v1227_v5 = vunpack.c.0.s8 %v1226_v3 }
 0x2dd   : > { %v1119_v7 = vpop.f32.mrf.mxu1 }
 0x2de   : > { %v1120_v26 = vadd.f32 %v1119_v7, %v914_v11 }
 0x2df   : > { %v1123_v8 = vpop.f32.mrf.mxu1 }
 0x2e0   : > { %v1124_v25 = vadd.f32 %v1123_v8, %v919_v9 }
 0x2e1   : > { %v1125_v10 = vpop.f32.mrf.mxu1 }
 0x2e2   : > { %v1126_v23 = vadd.f32 %v1125_v10, %v919_v9  ;;  %v1230_v9 = vsub.s32 %v1227_v5, %v1148_v48 }
 0x2e3   : > { %v1129_v12 = vpop.f32.mrf.mxu1 }
 0x2e4   : > { %v1130_v22 = vadd.f32 %v1129_v12, %v924_v6 }
 0x2e5   : > { %v1131_v13 = vpop.f32.mrf.mxu1 }
 0x2e6   : > { %v1132_v20 = vadd.f32 %v1131_v13, %v924_v6 }
 0x2e7   : > { %v1135_v15 = vpop.f32.mrf.mxu1 }
 0x2e8   : > { %v1136_v19 = vadd.f32 %v1135_v15, %v929_v4 }
 0x2e9   : > { %v1137_v17 = vpop.f32.mrf.mxu1 }
 0x2ea   : > { %v1138_v18 = vadd.f32 %v1137_v17, %v929_v4  ;;  %v1145_v4 = vpop.permute.xlu1 %1144 }
 0x2eb   : > { %v1150_v6 = vrot.slane %v1145_v4, %v1149_v46 }
 0x2ec   : > { %1151 = vmatprep.subr.mxu0 %v1138_v18 }
 0x2ed   : > { %1152 = vmatpush1.msra.mxu0 %v1136_v19 }
 0x2ee   : > { %1153 = vmatprep.subr.mxu0 %v1132_v20 }
 0x2ef   : > { %1154 = vmatpush1.msra.mxu0 %v1130_v22 }
 0x2f0   : > { %1155 = vmatprep.subr.mxu0 %v1126_v23 }
 0x2f1   : > { %1156 = vmatpush1.msra.mxu0 %v1124_v25 }
 0x2f2   : > { %1157 = vmatprep.subr.mxu0 %v1120_v26 }
 0x2f3   : > { %1158 = vmatpush1.msra.mxu0 %v1118_v27 }
 0x2f4   : > { %1159 = vmatprep.subr.mxu0 %v1114_v28 }
 0x2f5   : > { %1160 = vmatpush1.msra.mxu0 %v1112_v30 }
 0x2f6   : > { %1161 = vmatprep.subr.mxu0 %v1108_v31 }
 0x2f7   : > { %1162 = vmatpush1.msra.mxu0 %v1106_v33 }
 0x2f8   : > { %1163 = vmatprep.subr.mxu0 %v1102_v34 }
 0x2f9   : > { %1164 = vmatpush1.msra.mxu0 %v1100_v35 }
 0x2fa   : > { %1165 = vmatprep.subr.mxu0 %v1096_v36 }
 0x2fb   : > { %1166 = vmatpush1.msra.mxu0 %v1094_v38 }
 0x2fc   : > { %1167 = vmatprep.subr.mxu0 %v1090_v39 }
 0x2fd   : > { %1168 = vmatpush1.msra.mxu0 %v1088_v41 }
 0x2fe   : > { %1169 = vmatprep.subr.mxu0 %v1084_v42 }
 0x2ff   : > { %1170 = vmatpush1.msra.mxu0 %v1082_v43 }
 0x300   : > { %1171 = vmatprep.subr.mxu0 %v1078_v62 }
 0x301   : > { %1172 = vmatpush1.msra.mxu0 %v1076_v60 }
 0x302   : > { %1173 = vmatprep.subr.mxu0 %v1072_v59 }
 0x303   : > { %1174 = vmatpush1.msra.mxu0 %v1070_v57 }
 0x304   : > { %1175 = vmatprep.subr.mxu0 %v1066_v56 }
 0x305   : > { %1176 = vmatpush1.msra.mxu0 %v1064_v55 }
 0x306   : > { %1177 = vmatprep.subr.mxu0 %v1060_v54 }
 0x307   : > { %1178 = vmatpush1.msra.mxu0 %v1058_v53 }
 0x308   : > { %1179 = vmatprep.subr.mxu0 %v1054_v52 }
 0x309   : > { %1180 = vmatpush1.msra.mxu0 %v1052_v51 }
 0x30a   : > { %1181 = vmatprep.subr.mxu0 %v1048_v1 }
 0x30b   : > { %1182 = vmatpush1.msra.mxu0 %v1046_v50 }
 0x30c   : > { %1216 = vmatmul.mubr.f32.vlgmr.msra.gmra.mxu0 %v1140_v49 }
 0x3cc   : > { %v1217_v45 = vpop.f32.mrf.mxu0 }
 0x3cd   : > { %v1218_v44 = vadd.f32 %v1217_v45, %v1150_v6 }
 0x3ce   : > { %v1219_v7 = vpop.f32.mrf.mxu0 }
 0x3cf   : > { %v1220_v8 = vadd.f32 %v1219_v7, %v1150_v6 }
 0x3d1   : > { %v1224_v10 = vcombine.low %v1218_v44, %v1220_v8 }
 0x3d3   : > { %v1231_v11 = vrot.slane %v1224_v10, %v1230_v9 }
 0x3d5   : > { %v1238_v12 = vrot.slane %v1231_v11, %v1230_v9 }
 0x3d7   : > { %1244 = vst.msk [vmem:[%s420_s22] sm:$0x3] %vm1242_vm2, %v1238_v12 }
 0x3d8 PF: > { %s23_s19 = sadd.s32 1, %s1381_s19  }
 0x3d9   : > { %p20_p4 = scmp.ge.s32.totalorder %s23_s19, 4  }
 0x3db   :  { %22 = sbr.rel (!%p20_p4) target bundleno = 3 (0x3), region = 100 }

</bundles_post_ra>
